<compile_context>
chip_gen: v5e
topology: v5e:2x2
jax: 0.10.0
libtpu: 0.0.40
codegen_flags: <defaults>
</compile_context>

<pallas_src>
import jax
import jax.numpy as jnp
from jax import lax
from jax.experimental import pallas as pl
from jax.experimental.pallas import tpu as pltpu


_LANE = 128


def _round_up(v, m):
    return ((v + m - 1) // m) * m


def _speaker_encoder_kernel(
    slopes_ref,                                   # SMEM (4,) f32: post-residual PReLU slopes
    x_ref,                                        # VMEM (1, N0, C) f32
    s_a1_ref, w_a1_ref, b_a1_ref, w_b1_ref, b_b1_ref,   # block1 (input conv fused in)
    s_a2_ref, w_a2_ref, b_a2_ref, w_b2_ref, b_b2_ref,   # block2 (skip conv fused in)
    s_a3_ref, w_a3_ref, b_a3_ref, w_b3_ref, b_b3_ref,   # block3 (identity carry)
    w_out_ref, b_out_ref,                         # (Pb3, O_pad) bf16, (1, O_pad) f32
    out_ref,                                      # VMEM (1, N3, O_pad) f32
    scr1, scr2, scr3,                             # f32 (N0,Pb1), (N1,Pb2), (N2,Pb3)
):
    n1 = scr2.shape[0]
    n2 = scr3.shape[0]
    n3 = out_ref.shape[1]

    def fused_block(h_bf16, s_a_ref, w_a_ref, b_a_ref, w_b_ref, b_b_ref,
                    a_out, scr_ref, n_out):
        # First MXU push: [carry | conv1(h)] share the same LHS (shared-LHS
        # weight concat).  Lane-wise PReLU (slope 1.0 on carry / padded lanes).
        z = jnp.dot(h_bf16, w_a_ref[...], preferred_element_type=jnp.float32)
        z = z + b_a_ref[...]
        z = jnp.where(z >= 0, z, s_a_ref[...] * z)
        # Second MXU push: [conv2 ; identity] folds the residual/skip add.
        u = jnp.dot(z.astype(jnp.bfloat16), w_b_ref[...],
                    preferred_element_type=jnp.float32)
        u = u + b_b_ref[...]
        u = jnp.where(u >= 0, u, a_out * u)
        # Lane-dense (128-wide) pre-pool store.
        # TODO(synk): a bf16 scratch would halve this traffic once stride-3
        # sublane reads on packed bf16 are confirmed to lower without unpacks.
        scr_ref[...] = u
        # MaxPool1d(kernel=3, stride=3) over time via strided sublane reads.
        # TODO(synk): collapse to one strided read with pltpu.roll once sublane
        # rolls spanning many vregs are validated on all generations.
        p = jnp.maximum(
            jnp.maximum(scr_ref[pl.ds(0, n_out, stride=3), :],
                        scr_ref[pl.ds(1, n_out, stride=3), :]),
            scr_ref[pl.ds(2, n_out, stride=3), :])
        return p.astype(jnp.bfloat16)

    x = x_ref[0]                                  # (N0, C): time rows (channels last)
    # LayerNorm over channels, eps=1e-5; gamma/beta are folded into w_a1/b_a1.
    mu = jnp.mean(x, axis=-1, keepdims=True)
    xc = x - mu
    var = jnp.mean(xc * xc, axis=-1, keepdims=True)
    h = (xc * lax.rsqrt(var + 1e-5)).astype(jnp.bfloat16)

    h = fused_block(h, s_a1_ref, w_a1_ref, b_a1_ref, w_b1_ref, b_b1_ref,
                    slopes_ref[0], scr1, n1)
    h = fused_block(h, s_a2_ref, w_a2_ref, b_a2_ref, w_b2_ref, b_b2_ref,
                    slopes_ref[1], scr2, n2)
    h = fused_block(h, s_a3_ref, w_a3_ref, b_a3_ref, w_b3_ref, b_b3_ref,
                    slopes_ref[2], scr3, n3)

    # Output 1x1 conv, lane-dense (O padded to a multiple of 128).
    out_ref[0] = (jnp.dot(h, w_out_ref[...], preferred_element_type=jnp.float32)
                  + b_out_ref[...])


_PARAM_ORDER = (
    "s_a1", "w_a1", "b_a1", "w_b1", "b_b1",
    "s_a2", "w_a2", "b_a2", "w_b2", "b_b2",
    "s_a3", "w_a3", "b_a3", "w_b3", "b_b3",
    "w_out", "b_out",
)


def _pad_cols(a, cols):
    return jnp.pad(a, ((0, 0), (0, cols - a.shape[1])))


def _pad2(a, rows, cols):
    return jnp.pad(a, ((0, rows - a.shape[0]), (0, cols - a.shape[1])))


def _prepare_kernel_params(params, out_pad):
    """Fold LayerNorm affine into the input conv, fuse shared-LHS weights,
    append identity blocks that carry residual/skip terms through the second
    matmul, zero-pad every weight/bias/slope to 128-lane-dense widths, and cast
    matmul weights to bf16."""
    f32, bf16 = jnp.float32, jnp.bfloat16
    a = params["prelu"]
    g, beta = params["ln_g"][0], params["ln_b"][0]
    w_in, b_in = params["w_in"], params["b_in"][0]
    r1 = w_in.shape[1]
    r2 = params["b2_w2"].shape[1]

    pa1 = _round_up(2 * r1, _LANE)   # block1 first-matmul output width
    pb1 = _round_up(r1, _LANE)       # block1 output / block2 input width
    pa2 = _round_up(2 * r2, _LANE)
    pb2 = _round_up(r2, _LANE)
    pa3 = _round_up(2 * r2, _LANE)
    pb3 = _round_up(r2, _LANE)

    # LayerNorm affine folded into the input conv.
    w_in_f = (w_in * g[:, None]).astype(f32)              # (C, R1)
    b_in_f = beta @ w_in + b_in                            # (R1,)

    eye_r1 = jnp.eye(r1, dtype=f32)
    eye_r2 = jnp.eye(r2, dtype=f32)

    def slope_vec(first, second, width):
        v = jnp.concatenate([first, second])
        # Padded lanes see z == 0, so the slope value is irrelevant; use 1.0.
        return jnp.pad(v, (0, width - v.shape[0]), constant_values=1.0)[None, :]

    kp = {}
    # Block 1: input conv fused with the block's first conv; the first R1 lanes
    # carry h1 (the residual input) untouched.
    w_a1 = jnp.concatenate([w_in_f, w_in_f @ params["b1_w1"]], axis=1)
    kp["w_a1"] = _pad_cols(w_a1, pa1).astype(bf16)
    b_a1 = jnp.concatenate(
        [b_in_f, b_in_f @ params["b1_w1"] + params["b1_b1"][0]])[None, :]
    kp["b_a1"] = _pad_cols(b_a1, pa1).astype(f32)
    kp["s_a1"] = slope_vec(jnp.ones((r1,), f32), jnp.full((r1,), a[0], f32), pa1)
    kp["w_b1"] = _pad2(jnp.concatenate([eye_r1, params["b1_w2"]], axis=0),
                       pa1, pb1).astype(bf16)
    kp["b_b1"] = _pad_cols(params["b1_b2"], pb1).astype(f32)
    # Block 2: first conv fused with the 1x1 downsample skip conv.
    w_a2 = jnp.concatenate([params["b2_w1"], params["b2_wd"]], axis=1)
    kp["w_a2"] = _pad2(w_a2, pb1, pa2).astype(bf16)
    b_a2 = jnp.concatenate([params["b2_b1"], params["b2_bd"]], axis=1)
    kp["b_a2"] = _pad_cols(b_a2, pa2).astype(f32)
    kp["s_a2"] = slope_vec(jnp.full((r2,), a[2], f32), jnp.ones((r2,), f32), pa2)
    kp["w_b2"] = _pad2(jnp.concatenate([params["b2_w2"], eye_r2], axis=0),
                       pa2, pb2).astype(bf16)
    kp["b_b2"] = _pad_cols(params["b2_b2"], pb2).astype(f32)
    # Block 3: identity carries the residual through both matmuls.
    w_a3 = jnp.concatenate([params["b3_w1"], eye_r2], axis=1)
    kp["w_a3"] = _pad2(w_a3, pb2, pa3).astype(bf16)
    b_a3 = jnp.concatenate([params["b3_b1"], jnp.zeros((1, r2), f32)], axis=1)
    kp["b_a3"] = _pad_cols(b_a3, pa3).astype(f32)
    kp["s_a3"] = slope_vec(jnp.full((r2,), a[4], f32), jnp.ones((r2,), f32), pa3)
    kp["w_b3"] = _pad2(jnp.concatenate([params["b3_w2"], eye_r2], axis=0),
                       pa3, pb3).astype(bf16)
    kp["b_b3"] = _pad_cols(params["b3_b2"], pb3).astype(f32)
    # Output conv, lane-dense rows and columns.
    kp["w_out"] = _pad2(params["w_out"], pb3, out_pad).astype(bf16)
    kp["b_out"] = _pad_cols(params["b_out"], out_pad).astype(f32)
    # Scalar slopes of the three post-residual PReLUs (SMEM).
    kp["slopes"] = jnp.asarray([a[1], a[3], a[5], 0.0], f32)
    return kp


def _vmem_limit_bytes(rows, c, pb1, pb2, pb3, out_pad):
    """Explicit scoped-VMEM limit sized from the real per-step footprint."""
    def buf(r, lanes, itemsize, nbuf=1):
        return _round_up(max(r, 1), 8) * _round_up(lanes, _LANE) * itemsize * nbuf
    total = buf(rows, c, 4, 2)                 # x slab, double-buffered
    total += buf(rows, pb1, 4)                 # scr1 (pre-pool, block 1)
    total += buf(rows // 3, pb2, 4)            # scr2
    total += buf(rows // 9, pb3, 4)            # scr3
    total += buf(rows // 27, out_pad, 4, 2)    # output, double-buffered
    total += 8 * (1 << 20)                     # weights (x2 buffers) + internal scratch headroom
    # 32 MiB floor (safe on every generation), 64 MiB ceiling (v7x physical).
    return int(min(64 * (1 << 20), max(32 * (1 << 20), total)))


def speaker_encoder_forward(x, params, *, max_rows_per_step=13824, num_tensorcores=1):
    """x: (B, in_channels, T) float32 (PyTorch NCL). Returns (B, out_channels, T//27).

    max_rows_per_step bounds the per-grid-step row slab (~25 MiB of VMEM at the
    default, fine for v5e/v6e/v7x with the explicit vmem_limit_bytes).  Pass
    num_tensorcores=2 on v7x so the batch axis always provides >=2 blocks.
    """
    B, C, T = x.shape
    T3 = T // 27
    if T3 < 1:
        raise ValueError("time dimension must be at least 27")
    T_use = 27 * T3                      # only these rows can reach the output
    out_ch = params["w_out"].shape[1]
    out_pad = _round_up(out_ch, _LANE)

    kp = _prepare_kernel_params(params, out_pad)
    pb1 = kp["w_b1"].shape[1]
    pb2 = kp["w_b2"].shape[1]
    pb3 = kp["w_b3"].shape[1]

    row_cap = max(27, 27 * (max_rows_per_step // 27))

    # NCL -> channels-last rows; truncate time.
    # TODO(synk): accept channels-last input upstream (or fuse the transpose
    # into the producer) to remove this extra HBM pass over x.
    x_nlc = jnp.transpose(x[:, :, :T_use], (0, 2, 1)).astype(jnp.float32)  # (B,T_use,C)

    if T_use <= row_cap:
        # Short sequences: pack Bb whole samples per grid step.  No forced
        # multi-step grid on single-TensorCore chips (v5e/v6e).
        bb = max(1, row_cap // T_use)
        G = pl.cdiv(B, bb)
        if num_tensorcores > 1:
            G = max(G, min(B, num_tensorcores))
        bb = pl.cdiv(B, G)
        B_pad = G * bb
        if B_pad > B:
            x_nlc = jnp.concatenate(
                [x_nlc, jnp.zeros((B_pad - B, T_use, C), jnp.float32)], axis=0)
        rows = bb * T_use
        x_blocks = x_nlc.reshape(G, rows, C)
        time_tiled = False
    else:
        # Long sequences: tile the time axis in multiples of 27 rows per sample
        # so stride-3 pool windows never straddle a tile or a sample boundary.
        rows = row_cap
        n_t = pl.cdiv(T_use, rows)
        T_pad = n_t * rows
        if T_pad > T_use:
            x_nlc = jnp.concatenate(
                [x_nlc, jnp.zeros((B, T_pad - T_use, C), jnp.float32)], axis=1)
        G = B * n_t
        x_blocks = x_nlc.reshape(G, rows, C)
        B_pad = B
        time_tiled = True

    n0, n1, n2, n3 = rows, rows // 3, rows // 9, rows // 27

    vmem_params = [kp[n] for n in _PARAM_ORDER]
    in_specs = [pl.BlockSpec(memory_space=pltpu.SMEM),               # PReLU slopes
                pl.BlockSpec((1, n0, C), lambda g: (g, 0, 0))]       # x rows
    in_specs += [pl.BlockSpec(p.shape, lambda g: (0, 0)) for p in vmem_params]

    out = pl.pallas_call(
        _speaker_encoder_kernel,
        out_shape=jax.ShapeDtypeStruct((G, n3, out_pad), jnp.float32),
        grid_spec=pltpu.PrefetchScalarGridSpec(
            num_scalar_prefetch=0,
            grid=(G,),
            in_specs=in_specs,
            out_specs=pl.BlockSpec((1, n3, out_pad), lambda g: (g, 0, 0)),
            scratch_shapes=[
                pltpu.VMEM((n0, pb1), jnp.float32),   # pre-pool activations, block 1
                pltpu.VMEM((n1, pb2), jnp.float32),   # block 2
                pltpu.VMEM((n2, pb3), jnp.float32),   # block 3
            ],
        ),
        # TODO(synk): on v7x use pltpu.CORE_PARALLEL (or pl.core_map over
        # create_tensorcore_mesh) to force true 2-TensorCore sharding.
        compiler_params=pltpu.CompilerParams(
            dimension_semantics=("parallel",),
            vmem_limit_bytes=_vmem_limit_bytes(n0, C, pb1, pb2, pb3, out_pad)),
    )(kp["slopes"], x_blocks, *vmem_params)

    if time_tiled:
        out = out.reshape(B, -1, out_pad)[:, :T3, :out_ch]
    else:
        out = out.reshape(B_pad, T3, out_pad)[:B, :, :out_ch]
    return jnp.transpose(out, (0, 2, 1))                             # (B, out_ch, T3)


def init_params(key, in_channels, out_channels, resnet_in, resnet_out):
    """Deterministic synthetic parameters. Conv1d(k=1) weights are stored
    pre-transposed as (C_in, C_out); BatchNorm (inference) is folded into the
    conv weight/bias."""
    keys = iter(jax.random.split(key, 64))
    nxt = lambda: next(keys)

    def conv(out_c, in_c):
        w = jax.random.normal(nxt(), (out_c, in_c), jnp.float32) / jnp.sqrt(in_c)
        b = 0.05 * jax.random.normal(nxt(), (out_c,), jnp.float32)
        return w, b

    def bn(c):
        g = 1.0 + 0.1 * jax.random.normal(nxt(), (c,), jnp.float32)
        beta = 0.05 * jax.random.normal(nxt(), (c,), jnp.float32)
        mean = 0.05 * jax.random.normal(nxt(), (c,), jnp.float32)
        var = jnp.abs(1.0 + 0.1 * jax.random.normal(nxt(), (c,), jnp.float32)) + 0.1
        return g, beta, mean, var

    def fold_conv_bn(w, b, g, beta, mean, var, eps=1e-5):
        s = g / jnp.sqrt(var + eps)
        w_eff = w * s[:, None]                 # (out, in)
        b_eff = b * s + (beta - mean * s)
        return jnp.transpose(w_eff), b_eff[None, :]

    def plain_conv(w, b):
        return jnp.transpose(w), b[None, :]

    p = {}
    p["ln_g"] = (1.0 + 0.1 * jax.random.normal(nxt(), (in_channels,), jnp.float32))[None, :]
    p["ln_b"] = (0.05 * jax.random.normal(nxt(), (in_channels,), jnp.float32))[None, :]

    p["w_in"], p["b_in"] = plain_conv(*conv(resnet_in, in_channels))

    def make_block(prefix, cin, cout, downsample):
        p[f"{prefix}_w1"], p[f"{prefix}_b1"] = fold_conv_bn(*conv(cout, cin), *bn(cout))
        p[f"{prefix}_w2"], p[f"{prefix}_b2"] = fold_conv_bn(*conv(cout, cout), *bn(cout))
        if downsample:
            p[f"{prefix}_wd"], p[f"{prefix}_bd"] = plain_conv(*conv(cout, cin))

    make_block("b1", resnet_in, resnet_in, downsample=False)
    make_block("b2", resnet_in, resnet_out, downsample=True)
    make_block("b3", resnet_out, resnet_out, downsample=False)

    p["w_out"], p["b_out"] = plain_conv(*conv(out_channels, resnet_out))

    p["prelu"] = 0.1 + 0.3 * jax.random.uniform(nxt(), (8,), jnp.float32)  # 6 used
    return p


def reference_forward(x, params):
    """Pure-JAX f32 reference with the original module semantics."""
    h = jnp.transpose(x, (0, 2, 1))                                    # (B,T,C)
    mu = h.mean(-1, keepdims=True)
    var = ((h - mu) ** 2).mean(-1, keepdims=True)
    h = (h - mu) / jnp.sqrt(var + 1e-5) * params["ln_g"] + params["ln_b"]
    h = h @ params["w_in"] + params["b_in"]

    prelu = lambda v, a: jnp.where(v >= 0, v, a * v)

    def pool3(v):
        tc = v.shape[1] // 3
        return v[:, : tc * 3].reshape(v.shape[0], tc, 3, v.shape[2]).max(axis=2)

    a = params["prelu"]
    # block1
    y = prelu(h @ params["b1_w1"] + params["b1_b1"], a[0])
    y = y @ params["b1_w2"] + params["b1_b2"]
    h = pool3(prelu(y + h, a[1]))
    # block2
    y = prelu(h @ params["b2_w1"] + params["b2_b1"], a[2])
    y = y @ params["b2_w2"] + params["b2_b2"]
    skip = h @ params["b2_wd"] + params["b2_bd"]
    h = pool3(prelu(y + skip, a[3]))
    # block3
    y = prelu(h @ params["b3_w1"] + params["b3_b1"], a[4])
    y = y @ params["b3_w2"] + params["b3_b2"]
    h = pool3(prelu(y + h, a[5]))
    out = h @ params["w_out"] + params["b_out"]
    return jnp.transpose(out, (0, 2, 1))


def reference_forward_fused(x, params, kp):
    """Plain-JAX emulation of the exact fused/bf16/lane-padded kernel math
    (tight check of the Pallas plumbing: blocking, fusion algebra, pooling)."""
    B, C, T = x.shape
    T3 = T // 27
    out_ch = params["w_out"].shape[1]
    a = params["prelu"]

    h = jnp.transpose(x[:, :, :27 * T3], (0, 2, 1)).astype(jnp.float32)
    mu = h.mean(-1, keepdims=True)
    var = ((h - mu) ** 2).mean(-1, keepdims=True)
    h = ((h - mu) * lax.rsqrt(var + 1e-5)).astype(jnp.bfloat16)

    dot = lambda u, w: jnp.dot(u, w, preferred_element_type=jnp.float32)

    def pool(v):
        b, n, r = v.shape
        return v.reshape(b, n // 3, 3, r).max(axis=2)

    def blk(h, i, a_out):
        z = dot(h, kp[f"w_a{i}"]) + kp[f"b_a{i}"]
        z = jnp.where(z >= 0, z, kp[f"s_a{i}"] * z)
        u = dot(z.astype(jnp.bfloat16), kp[f"w_b{i}"]) + kp[f"b_b{i}"]
        u = jnp.where(u >= 0, u, a_out * u)
        return pool(u).astype(jnp.bfloat16)

    h = blk(h, 1, a[1])
    h = blk(h, 2, a[3])
    h = blk(h, 3, a[5])
    out = dot(h, kp["w_out"]) + kp["b_out"]
    return jnp.transpose(out[..., :out_ch], (0, 2, 1))


if __name__ == "__main__":
    B = 4
    IN_CH, OUT_CH = 16, 64
    RES_IN, RES_OUT = 32, 32
    T = 81                                          # -> 27 -> 9 -> 3 after 3 maxpools

    key = jax.random.PRNGKey(0)
    k_x, k_p, k_x2 = jax.random.split(key, 3)
    x = jax.random.normal(k_x, (B, IN_CH, T), jnp.float32)
    params = init_params(k_p, IN_CH, OUT_CH, RES_IN, RES_OUT)

    out = jax.block_until_ready(speaker_encoder_forward(x, params))
    assert out.shape == (B, OUT_CH, T // 27), out.shape

    # Tight check: against a plain-JAX emulation of the exact fused bf16 math.
    kp = _prepare_kernel_params(params, _round_up(OUT_CH, _LANE))
    ref_fused = jax.block_until_ready(reference_forward_fused(x, params, kp))
    scale_f = float(jnp.max(jnp.abs(ref_fused))) + 1e-6
    err_f = float(jnp.max(jnp.abs(out - ref_fused)))
    assert err_f <= 5e-3 * scale_f, (err_f, scale_f)

    # Loose check: against the original f32 module semantics (gap = bf16 MXU operands).
    ref = jax.block_until_ready(reference_forward(x, params))
    scale = float(jnp.max(jnp.abs(ref))) + 1e-6
    err = float(jnp.max(jnp.abs(out - ref)))
    assert err <= 0.1 * scale + 1e-3, (err, scale)

    # Exercise the new time-tiled path: long T with a small row cap forces
    # 81-row (3x27) time tiles per sample, including a zero-padded tail tile.
    T_long = 189                                     # 27 * 7
    x_long = jax.random.normal(k_x2, (2, IN_CH, T_long), jnp.float32)
    out_long = jax.block_until_ready(
        speaker_encoder_forward(x_long, params, max_rows_per_step=100))
    assert out_long.shape == (2, OUT_CH, T_long // 27), out_long.shape
    ref_long = jax.block_until_ready(reference_forward_fused(x_long, params, kp))
    scale_l = float(jnp.max(jnp.abs(ref_long))) + 1e-6
    err_l = float(jnp.max(jnp.abs(out_long - ref_long)))
    assert err_l <= 5e-3 * scale_l, (err_l, scale_l)

    print("KERNEL_OK")
</pallas_src>

<mosaic_0001>
module attributes {stable_mosaic.version = 11 : i64} {
  func.func @_speaker_encoder_kernel(%arg0: i32, %arg1: memref<4xf32, #tpu.memory_space<smem>>, %arg2: memref<1x324x16xf32, #tpu.memory_space<vmem>>, %arg3: memref<1x128xf32, #tpu.memory_space<vmem>>, %arg4: memref<16x128xbf16, #tpu.memory_space<vmem>>, %arg5: memref<1x128xf32, #tpu.memory_space<vmem>>, %arg6: memref<128x128xbf16, #tpu.memory_space<vmem>>, %arg7: memref<1x128xf32, #tpu.memory_space<vmem>>, %arg8: memref<1x128xf32, #tpu.memory_space<vmem>>, %arg9: memref<128x128xbf16, #tpu.memory_space<vmem>>, %arg10: memref<1x128xf32, #tpu.memory_space<vmem>>, %arg11: memref<128x128xbf16, #tpu.memory_space<vmem>>, %arg12: memref<1x128xf32, #tpu.memory_space<vmem>>, %arg13: memref<1x128xf32, #tpu.memory_space<vmem>>, %arg14: memref<128x128xbf16, #tpu.memory_space<vmem>>, %arg15: memref<1x128xf32, #tpu.memory_space<vmem>>, %arg16: memref<128x128xbf16, #tpu.memory_space<vmem>>, %arg17: memref<1x128xf32, #tpu.memory_space<vmem>>, %arg18: memref<128x128xbf16, #tpu.memory_space<vmem>>, %arg19: memref<1x128xf32, #tpu.memory_space<vmem>>, %arg20: memref<1x12x128xf32, #tpu.memory_space<vmem>>, %arg21: memref<324x128xf32, #tpu.memory_space<vmem>>, %arg22: memref<108x128xf32, #tpu.memory_space<vmem>>, %arg23: memref<36x128xf32, #tpu.memory_space<vmem>>) attributes {dimension_semantics = [#tpu.dimension_semantics<parallel>], iteration_bounds = array<i64: 1>, scalar_prefetch = 0 : i64, scratch_operands = 3 : i64, tpu.core_type = #tpu.core_type<tc>, window_params = [{transform_indices = @transform_0, window_bounds = array<i64: 4>}, {transform_indices = @transform_1, window_bounds = array<i64: 1, 324, 16>}, {pipeline_mode = #tpu.pipeline_mode<synchronous>, transform_indices = @transform_2, window_bounds = array<i64: 1, 128>}, {pipeline_mode = #tpu.pipeline_mode<synchronous>, transform_indices = @transform_3, window_bounds = array<i64: 16, 128>}, {pipeline_mode = #tpu.pipeline_mode<synchronous>, transform_indices = @transform_4, window_bounds = array<i64: 1, 128>}, {pipeline_mode = #tpu.pipeline_mode<synchronous>, transform_indices = @transform_5, window_bounds = array<i64: 128, 128>}, {pipeline_mode = #tpu.pipeline_mode<synchronous>, transform_indices = @transform_6, window_bounds = array<i64: 1, 128>}, {pipeline_mode = #tpu.pipeline_mode<synchronous>, transform_indices = @transform_7, window_bounds = array<i64: 1, 128>}, {pipeline_mode = #tpu.pipeline_mode<synchronous>, transform_indices = @transform_8, window_bounds = array<i64: 128, 128>}, {pipeline_mode = #tpu.pipeline_mode<synchronous>, transform_indices = @transform_9, window_bounds = array<i64: 1, 128>}, {pipeline_mode = #tpu.pipeline_mode<synchronous>, transform_indices = @transform_10, window_bounds = array<i64: 128, 128>}, {pipeline_mode = #tpu.pipeline_mode<synchronous>, transform_indices = @transform_11, window_bounds = array<i64: 1, 128>}, {pipeline_mode = #tpu.pipeline_mode<synchronous>, transform_indices = @transform_12, window_bounds = array<i64: 1, 128>}, {pipeline_mode = #tpu.pipeline_mode<synchronous>, transform_indices = @transform_13, window_bounds = array<i64: 128, 128>}, {pipeline_mode = #tpu.pipeline_mode<synchronous>, transform_indices = @transform_14, window_bounds = array<i64: 1, 128>}, {pipeline_mode = #tpu.pipeline_mode<synchronous>, transform_indices = @transform_15, window_bounds = array<i64: 128, 128>}, {pipeline_mode = #tpu.pipeline_mode<synchronous>, transform_indices = @transform_16, window_bounds = array<i64: 1, 128>}, {pipeline_mode = #tpu.pipeline_mode<synchronous>, transform_indices = @transform_17, window_bounds = array<i64: 128, 128>}, {pipeline_mode = #tpu.pipeline_mode<synchronous>, transform_indices = @transform_18, window_bounds = array<i64: 1, 128>}, {transform_indices = @transform_19, window_bounds = array<i64: 1, 12, 128>}]} {
    %c0 = arith.constant 0 : index
    %c0_0 = arith.constant 0 : index
    %c0_1 = arith.constant 0 : index
    %0 = vector.load %arg2[%c0, %c0_0, %c0_1] : memref<1x324x16xf32, #tpu.memory_space<vmem>>, vector<1x324x16xf32>
    %1 = vector.shape_cast %0 : vector<1x324x16xf32> to vector<324x16xf32>
    %cst = arith.constant dense<0.000000e+00> : vector<324xf32>
    %2 = vector.multi_reduction <add>, %1, %cst [1] : vector<324x16xf32> to vector<324xf32>
    %3 = vector.shape_cast %2 : vector<324xf32> to vector<324x1xf32>
    %cst_2 = arith.constant 1.600000e+01 : f32
    %4 = vector.broadcast %cst_2 : f32 to vector<324x1xf32>
    %5 = arith.divf %3, %4 : vector<324x1xf32>
    %6 = vector.broadcast %5 : vector<324x1xf32> to vector<324x16xf32>
    %7 = arith.subf %1, %6 : vector<324x16xf32>
    %8 = arith.mulf %7, %7 : vector<324x16xf32>
    %cst_3 = arith.constant dense<0.000000e+00> : vector<324xf32>
    %9 = vector.multi_reduction <add>, %8, %cst_3 [1] : vector<324x16xf32> to vector<324xf32>
    %10 = vector.shape_cast %9 : vector<324xf32> to vector<324x1xf32>
    %cst_4 = arith.constant 1.600000e+01 : f32
    %11 = vector.broadcast %cst_4 : f32 to vector<324x1xf32>
    %12 = arith.divf %10, %11 : vector<324x1xf32>
    %cst_5 = arith.constant 9.99999974E-6 : f32
    %13 = vector.broadcast %cst_5 : f32 to vector<324x1xf32>
    %14 = arith.addf %12, %13 : vector<324x1xf32>
    %15 = math.rsqrt %14 : vector<324x1xf32>
    %16 = vector.broadcast %15 : vector<324x1xf32> to vector<324x16xf32>
    %17 = arith.mulf %7, %16 : vector<324x16xf32>
    %18 = arith.truncf %17 : vector<324x16xf32> to vector<324x16xbf16>
    %c0_6 = arith.constant 0 : index
    %19 = memref.load %arg1[%c0_6] : memref<4xf32, #tpu.memory_space<smem>>
    %c0_7 = arith.constant 0 : index
    %c0_8 = arith.constant 0 : index
    %20 = vector.load %arg4[%c0_7, %c0_8] : memref<16x128xbf16, #tpu.memory_space<vmem>>, vector<16x128xbf16>
    %cst_9 = arith.constant dense<0.000000e+00> : vector<324x128xf32>
    %21 = tpu.matmul %18, %20, %cst_9 {dimension_numbers = #tpu.dot_dimension_numbers<[1], [0], [0], [1], [0, 0, 1, 1], [], []>} : vector<324x16xbf16>, vector<16x128xbf16>, vector<324x128xf32> -> vector<324x128xf32>
    %c0_10 = arith.constant 0 : index
    %c0_11 = arith.constant 0 : index
    %22 = vector.load %arg5[%c0_10, %c0_11] : memref<1x128xf32, #tpu.memory_space<vmem>>, vector<1x128xf32>
    %23 = vector.broadcast %22 : vector<1x128xf32> to vector<324x128xf32>
    %24 = arith.addf %21, %23 : vector<324x128xf32>
    %cst_12 = arith.constant 0.000000e+00 : f32
    %25 = vector.broadcast %cst_12 : f32 to vector<324x128xf32>
    %26 = arith.cmpf oge, %24, %25 : vector<324x128xf32>
    %c0_13 = arith.constant 0 : index
    %c0_14 = arith.constant 0 : index
    %27 = vector.load %arg3[%c0_13, %c0_14] : memref<1x128xf32, #tpu.memory_space<vmem>>, vector<1x128xf32>
    %28 = vector.broadcast %27 : vector<1x128xf32> to vector<324x128xf32>
    %29 = arith.mulf %28, %24 : vector<324x128xf32>
    %30 = arith.select %26, %24, %29 : vector<324x128xi1>, vector<324x128xf32>
    %31 = arith.truncf %30 : vector<324x128xf32> to vector<324x128xbf16>
    %c0_15 = arith.constant 0 : index
    %c0_16 = arith.constant 0 : index
    %32 = vector.load %arg6[%c0_15, %c0_16] : memref<128x128xbf16, #tpu.memory_space<vmem>>, vector<128x128xbf16>
    %cst_17 = arith.constant dense<0.000000e+00> : vector<324x128xf32>
    %33 = tpu.matmul %31, %32, %cst_17 {dimension_numbers = #tpu.dot_dimension_numbers<[1], [0], [0], [1], [0, 0, 1, 1], [], []>} : vector<324x128xbf16>, vector<128x128xbf16>, vector<324x128xf32> -> vector<324x128xf32>
    %c0_18 = arith.constant 0 : index
    %c0_19 = arith.constant 0 : index
    %34 = vector.load %arg7[%c0_18, %c0_19] : memref<1x128xf32, #tpu.memory_space<vmem>>, vector<1x128xf32>
    %35 = vector.broadcast %34 : vector<1x128xf32> to vector<324x128xf32>
    %36 = arith.addf %33, %35 : vector<324x128xf32>
    %cst_20 = arith.constant 0.000000e+00 : f32
    %37 = vector.broadcast %cst_20 : f32 to vector<324x128xf32>
    %38 = arith.cmpf oge, %36, %37 : vector<324x128xf32>
    %39 = vector.broadcast %19 : f32 to vector<324x128xf32>
    %40 = arith.mulf %39, %36 : vector<324x128xf32>
    %41 = arith.select %38, %36, %40 : vector<324x128xi1>, vector<324x128xf32>
    %c0_21 = arith.constant 0 : index
    %c0_22 = arith.constant 0 : index
    %42 = vector.load %arg21[%c0_21, %c0_22] : memref<324x128xf32, #tpu.memory_space<vmem>>, vector<324x128xf32>
    tpu.vector_store %arg21[%c0_21, %c0_22], %41 {strides = array<i32>} : memref<324x128xf32, #tpu.memory_space<vmem>>, vector<324x128xf32>,
    %c0_23 = arith.constant 0 : index
    %c0_24 = arith.constant 0 : index
    %43 = tpu.strided_load %arg21[%c0_23, %c0_24] {strides = array<i32: 3, 1>} : memref<324x128xf32, #tpu.memory_space<vmem>>, vector<108x128xf32>
    %c1 = arith.constant 1 : index
    %c0_25 = arith.constant 0 : index
    %44 = tpu.strided_load %arg21[%c1, %c0_25] {strides = array<i32: 3, 1>} : memref<324x128xf32, #tpu.memory_space<vmem>>, vector<108x128xf32>
    %45 = arith.maximumf %43, %44 : vector<108x128xf32>
    %c2 = arith.constant 2 : index
    %c0_26 = arith.constant 0 : index
    %46 = tpu.strided_load %arg21[%c2, %c0_26] {strides = array<i32: 3, 1>} : memref<324x128xf32, #tpu.memory_space<vmem>>, vector<108x128xf32>
    %47 = arith.maximumf %45, %46 : vector<108x128xf32>
    %48 = arith.truncf %47 : vector<108x128xf32> to vector<108x128xbf16>
    %c1_27 = arith.constant 1 : index
    %49 = memref.load %arg1[%c1_27] : memref<4xf32, #tpu.memory_space<smem>>
    %c0_28 = arith.constant 0 : index
    %c0_29 = arith.constant 0 : index
    %50 = vector.load %arg9[%c0_28, %c0_29] : memref<128x128xbf16, #tpu.memory_space<vmem>>, vector<128x128xbf16>
    %cst_30 = arith.constant dense<0.000000e+00> : vector<108x128xf32>
    %51 = tpu.matmul %48, %50, %cst_30 {dimension_numbers = #tpu.dot_dimension_numbers<[1], [0], [0], [1], [0, 0, 1, 1], [], []>} : vector<108x128xbf16>, vector<128x128xbf16>, vector<108x128xf32> -> vector<108x128xf32>
    %c0_31 = arith.constant 0 : index
    %c0_32 = arith.constant 0 : index
    %52 = vector.load %arg10[%c0_31, %c0_32] : memref<1x128xf32, #tpu.memory_space<vmem>>, vector<1x128xf32>
    %53 = vector.broadcast %52 : vector<1x128xf32> to vector<108x128xf32>
    %54 = arith.addf %51, %53 : vector<108x128xf32>
    %cst_33 = arith.constant 0.000000e+00 : f32
    %55 = vector.broadcast %cst_33 : f32 to vector<108x128xf32>
    %56 = arith.cmpf oge, %54, %55 : vector<108x128xf32>
    %c0_34 = arith.constant 0 : index
    %c0_35 = arith.constant 0 : index
    %57 = vector.load %arg8[%c0_34, %c0_35] : memref<1x128xf32, #tpu.memory_space<vmem>>, vector<1x128xf32>
    %58 = vector.broadcast %57 : vector<1x128xf32> to vector<108x128xf32>
    %59 = arith.mulf %58, %54 : vector<108x128xf32>
    %60 = arith.select %56, %54, %59 : vector<108x128xi1>, vector<108x128xf32>
    %61 = arith.truncf %60 : vector<108x128xf32> to vector<108x128xbf16>
    %c0_36 = arith.constant 0 : index
    %c0_37 = arith.constant 0 : index
    %62 = vector.load %arg11[%c0_36, %c0_37] : memref<128x128xbf16, #tpu.memory_space<vmem>>, vector<128x128xbf16>
    %cst_38 = arith.constant dense<0.000000e+00> : vector<108x128xf32>
    %63 = tpu.matmul %61, %62, %cst_38 {dimension_numbers = #tpu.dot_dimension_numbers<[1], [0], [0], [1], [0, 0, 1, 1], [], []>} : vector<108x128xbf16>, vector<128x128xbf16>, vector<108x128xf32> -> vector<108x128xf32>
    %c0_39 = arith.constant 0 : index
    %c0_40 = arith.constant 0 : index
    %64 = vector.load %arg12[%c0_39, %c0_40] : memref<1x128xf32, #tpu.memory_space<vmem>>, vector<1x128xf32>
    %65 = vector.broadcast %64 : vector<1x128xf32> to vector<108x128xf32>
    %66 = arith.addf %63, %65 : vector<108x128xf32>
    %cst_41 = arith.constant 0.000000e+00 : f32
    %67 = vector.broadcast %cst_41 : f32 to vector<108x128xf32>
    %68 = arith.cmpf oge, %66, %67 : vector<108x128xf32>
    %69 = vector.broadcast %49 : f32 to vector<108x128xf32>
    %70 = arith.mulf %69, %66 : vector<108x128xf32>
    %71 = arith.select %68, %66, %70 : vector<108x128xi1>, vector<108x128xf32>
    %c0_42 = arith.constant 0 : index
    %c0_43 = arith.constant 0 : index
    %72 = vector.load %arg22[%c0_42, %c0_43] : memref<108x128xf32, #tpu.memory_space<vmem>>, vector<108x128xf32>
    tpu.vector_store %arg22[%c0_42, %c0_43], %71 {strides = array<i32>} : memref<108x128xf32, #tpu.memory_space<vmem>>, vector<108x128xf32>,
    %c0_44 = arith.constant 0 : index
    %c0_45 = arith.constant 0 : index
    %73 = tpu.strided_load %arg22[%c0_44, %c0_45] {strides = array<i32: 3, 1>} : memref<108x128xf32, #tpu.memory_space<vmem>>, vector<36x128xf32>
    %c1_46 = arith.constant 1 : index
    %c0_47 = arith.constant 0 : index
    %74 = tpu.strided_load %arg22[%c1_46, %c0_47] {strides = array<i32: 3, 1>} : memref<108x128xf32, #tpu.memory_space<vmem>>, vector<36x128xf32>
    %75 = arith.maximumf %73, %74 : vector<36x128xf32>
    %c2_48 = arith.constant 2 : index
    %c0_49 = arith.constant 0 : index
    %76 = tpu.strided_load %arg22[%c2_48, %c0_49] {strides = array<i32: 3, 1>} : memref<108x128xf32, #tpu.memory_space<vmem>>, vector<36x128xf32>
    %77 = arith.maximumf %75, %76 : vector<36x128xf32>
    %78 = arith.truncf %77 : vector<36x128xf32> to vector<36x128xbf16>
    %c2_50 = arith.constant 2 : index
    %79 = memref.load %arg1[%c2_50] : memref<4xf32, #tpu.memory_space<smem>>
    %c0_51 = arith.constant 0 : index
    %c0_52 = arith.constant 0 : index
    %80 = vector.load %arg14[%c0_51, %c0_52] : memref<128x128xbf16, #tpu.memory_space<vmem>>, vector<128x128xbf16>
    %cst_53 = arith.constant dense<0.000000e+00> : vector<36x128xf32>
    %81 = tpu.matmul %78, %80, %cst_53 {dimension_numbers = #tpu.dot_dimension_numbers<[1], [0], [0], [1], [0, 0, 1, 1], [], []>} : vector<36x128xbf16>, vector<128x128xbf16>, vector<36x128xf32> -> vector<36x128xf32>
    %c0_54 = arith.constant 0 : index
    %c0_55 = arith.constant 0 : index
    %82 = vector.load %arg15[%c0_54, %c0_55] : memref<1x128xf32, #tpu.memory_space<vmem>>, vector<1x128xf32>
    %83 = vector.broadcast %82 : vector<1x128xf32> to vector<36x128xf32>
    %84 = arith.addf %81, %83 : vector<36x128xf32>
    %cst_56 = arith.constant 0.000000e+00 : f32
    %85 = vector.broadcast %cst_56 : f32 to vector<36x128xf32>
    %86 = arith.cmpf oge, %84, %85 : vector<36x128xf32>
    %c0_57 = arith.constant 0 : index
    %c0_58 = arith.constant 0 : index
    %87 = vector.load %arg13[%c0_57, %c0_58] : memref<1x128xf32, #tpu.memory_space<vmem>>, vector<1x128xf32>
    %88 = vector.broadcast %87 : vector<1x128xf32> to vector<36x128xf32>
    %89 = arith.mulf %88, %84 : vector<36x128xf32>
    %90 = arith.select %86, %84, %89 : vector<36x128xi1>, vector<36x128xf32>
    %91 = arith.truncf %90 : vector<36x128xf32> to vector<36x128xbf16>
    %c0_59 = arith.constant 0 : index
    %c0_60 = arith.constant 0 : index
    %92 = vector.load %arg16[%c0_59, %c0_60] : memref<128x128xbf16, #tpu.memory_space<vmem>>, vector<128x128xbf16>
    %cst_61 = arith.constant dense<0.000000e+00> : vector<36x128xf32>
    %93 = tpu.matmul %91, %92, %cst_61 {dimension_numbers = #tpu.dot_dimension_numbers<[1], [0], [0], [1], [0, 0, 1, 1], [], []>} : vector<36x128xbf16>, vector<128x128xbf16>, vector<36x128xf32> -> vector<36x128xf32>
    %c0_62 = arith.constant 0 : index
    %c0_63 = arith.constant 0 : index
    %94 = vector.load %arg17[%c0_62, %c0_63] : memref<1x128xf32, #tpu.memory_space<vmem>>, vector<1x128xf32>
    %95 = vector.broadcast %94 : vector<1x128xf32> to vector<36x128xf32>
    %96 = arith.addf %93, %95 : vector<36x128xf32>
    %cst_64 = arith.constant 0.000000e+00 : f32
    %97 = vector.broadcast %cst_64 : f32 to vector<36x128xf32>
    %98 = arith.cmpf oge, %96, %97 : vector<36x128xf32>
    %99 = vector.broadcast %79 : f32 to vector<36x128xf32>
    %100 = arith.mulf %99, %96 : vector<36x128xf32>
    %101 = arith.select %98, %96, %100 : vector<36x128xi1>, vector<36x128xf32>
    %c0_65 = arith.constant 0 : index
    %c0_66 = arith.constant 0 : index
    %102 = vector.load %arg23[%c0_65, %c0_66] : memref<36x128xf32, #tpu.memory_space<vmem>>, vector<36x128xf32>
    tpu.vector_store %arg23[%c0_65, %c0_66], %101 {strides = array<i32>} : memref<36x128xf32, #tpu.memory_space<vmem>>, vector<36x128xf32>,
    %c0_67 = arith.constant 0 : index
    %c0_68 = arith.constant 0 : index
    %103 = tpu.strided_load %arg23[%c0_67, %c0_68] {strides = array<i32: 3, 1>} : memref<36x128xf32, #tpu.memory_space<vmem>>, vector<12x128xf32>
    %c1_69 = arith.constant 1 : index
    %c0_70 = arith.constant 0 : index
    %104 = tpu.strided_load %arg23[%c1_69, %c0_70] {strides = array<i32: 3, 1>} : memref<36x128xf32, #tpu.memory_space<vmem>>, vector<12x128xf32>
    %105 = arith.maximumf %103, %104 : vector<12x128xf32>
    %c2_71 = arith.constant 2 : index
    %c0_72 = arith.constant 0 : index
    %106 = tpu.strided_load %arg23[%c2_71, %c0_72] {strides = array<i32: 3, 1>} : memref<36x128xf32, #tpu.memory_space<vmem>>, vector<12x128xf32>
    %107 = arith.maximumf %105, %106 : vector<12x128xf32>
    %108 = arith.truncf %107 : vector<12x128xf32> to vector<12x128xbf16>
    %c0_73 = arith.constant 0 : index
    %c0_74 = arith.constant 0 : index
    %109 = vector.load %arg18[%c0_73, %c0_74] : memref<128x128xbf16, #tpu.memory_space<vmem>>, vector<128x128xbf16>
    %cst_75 = arith.constant dense<0.000000e+00> : vector<12x128xf32>
    %110 = tpu.matmul %108, %109, %cst_75 {dimension_numbers = #tpu.dot_dimension_numbers<[1], [0], [0], [1], [0, 0, 1, 1], [], []>} : vector<12x128xbf16>, vector<128x128xbf16>, vector<12x128xf32> -> vector<12x128xf32>
    %c0_76 = arith.constant 0 : index
    %c0_77 = arith.constant 0 : index
    %111 = vector.load %arg19[%c0_76, %c0_77] : memref<1x128xf32, #tpu.memory_space<vmem>>, vector<1x128xf32>
    %112 = vector.broadcast %111 : vector<1x128xf32> to vector<12x128xf32>
    %113 = arith.addf %110, %112 : vector<12x128xf32>
    %c0_78 = arith.constant 0 : index
    %c0_79 = arith.constant 0 : index
    %c0_80 = arith.constant 0 : index
    %114 = vector.load %arg20[%c0_78, %c0_79, %c0_80] : memref<1x12x128xf32, #tpu.memory_space<vmem>>, vector<1x12x128xf32>
    %115 = vector.shape_cast %114 : vector<1x12x128xf32> to vector<12x128xf32>
    %116 = vector.shape_cast %113 : vector<12x128xf32> to vector<1x12x128xf32>
    tpu.vector_store %arg20[%c0_78, %c0_79, %c0_80], %116 {strides = array<i32>} : memref<1x12x128xf32, #tpu.memory_space<vmem>>, vector<1x12x128xf32>,
    return
  }
  func.func @transform_0(%arg0: i32) -> i32 {
    %c0_i32 = arith.constant 0 : i32
    %c0_i32_0 = arith.constant 0 : i32
    return %c0_i32 : i32
  }
  func.func @transform_1(%arg0: i32) -> (i32, i32, i32) {
    %c0_i32 = arith.constant 0 : i32
    %c0_i32_0 = arith.constant 0 : i32
    %c0_i32_1 = arith.constant 0 : i32
    return %arg0, %c0_i32, %c0_i32_0 : i32, i32, i32
  }
  func.func @transform_2(%arg0: i32) -> (i32, i32) {
    %c0_i32 = arith.constant 0 : i32
    %c0_i32_0 = arith.constant 0 : i32
    %c0_i32_1 = arith.constant 0 : i32
    return %c0_i32, %c0_i32_0 : i32, i32
  }
  func.func @transform_3(%arg0: i32) -> (i32, i32) {
    %c0_i32 = arith.constant 0 : i32
    %c0_i32_0 = arith.constant 0 : i32
    %c0_i32_1 = arith.constant 0 : i32
    return %c0_i32, %c0_i32_0 : i32, i32
  }
  func.func @transform_4(%arg0: i32) -> (i32, i32) {
    %c0_i32 = arith.constant 0 : i32
    %c0_i32_0 = arith.constant 0 : i32
    %c0_i32_1 = arith.constant 0 : i32
    return %c0_i32, %c0_i32_0 : i32, i32
  }
  func.func @transform_5(%arg0: i32) -> (i32, i32) {
    %c0_i32 = arith.constant 0 : i32
    %c0_i32_0 = arith.constant 0 : i32
    %c0_i32_1 = arith.constant 0 : i32
    return %c0_i32, %c0_i32_0 : i32, i32
  }
  func.func @transform_6(%arg0: i32) -> (i32, i32) {
    %c0_i32 = arith.constant 0 : i32
    %c0_i32_0 = arith.constant 0 : i32
    %c0_i32_1 = arith.constant 0 : i32
    return %c0_i32, %c0_i32_0 : i32, i32
  }
  func.func @transform_7(%arg0: i32) -> (i32, i32) {
    %c0_i32 = arith.constant 0 : i32
    %c0_i32_0 = arith.constant 0 : i32
    %c0_i32_1 = arith.constant 0 : i32
    return %c0_i32, %c0_i32_0 : i32, i32
  }
  func.func @transform_8(%arg0: i32) -> (i32, i32) {
    %c0_i32 = arith.constant 0 : i32
    %c0_i32_0 = arith.constant 0 : i32
    %c0_i32_1 = arith.constant 0 : i32
    return %c0_i32, %c0_i32_0 : i32, i32
  }
  func.func @transform_9(%arg0: i32) -> (i32, i32) {
    %c0_i32 = arith.constant 0 : i32
    %c0_i32_0 = arith.constant 0 : i32
    %c0_i32_1 = arith.constant 0 : i32
    return %c0_i32, %c0_i32_0 : i32, i32
  }
  func.func @transform_10(%arg0: i32) -> (i32, i32) {
    %c0_i32 = arith.constant 0 : i32
    %c0_i32_0 = arith.constant 0 : i32
    %c0_i32_1 = arith.constant 0 : i32
    return %c0_i32, %c0_i32_0 : i32, i32
  }
  func.func @transform_11(%arg0: i32) -> (i32, i32) {
    %c0_i32 = arith.constant 0 : i32
    %c0_i32_0 = arith.constant 0 : i32
    %c0_i32_1 = arith.constant 0 : i32
    return %c0_i32, %c0_i32_0 : i32, i32
  }
  func.func @transform_12(%arg0: i32) -> (i32, i32) {
    %c0_i32 = arith.constant 0 : i32
    %c0_i32_0 = arith.constant 0 : i32
    %c0_i32_1 = arith.constant 0 : i32
    return %c0_i32, %c0_i32_0 : i32, i32
  }
  func.func @transform_13(%arg0: i32) -> (i32, i32) {
    %c0_i32 = arith.constant 0 : i32
    %c0_i32_0 = arith.constant 0 : i32
    %c0_i32_1 = arith.constant 0 : i32
    return %c0_i32, %c0_i32_0 : i32, i32
  }
  func.func @transform_14(%arg0: i32) -> (i32, i32) {
    %c0_i32 = arith.constant 0 : i32
    %c0_i32_0 = arith.constant 0 : i32
    %c0_i32_1 = arith.constant 0 : i32
    return %c0_i32, %c0_i32_0 : i32, i32
  }
  func.func @transform_15(%arg0: i32) -> (i32, i32) {
    %c0_i32 = arith.constant 0 : i32
    %c0_i32_0 = arith.constant 0 : i32
    %c0_i32_1 = arith.constant 0 : i32
    return %c0_i32, %c0_i32_0 : i32, i32
  }
  func.func @transform_16(%arg0: i32) -> (i32, i32) {
    %c0_i32 = arith.constant 0 : i32
    %c0_i32_0 = arith.constant 0 : i32
    %c0_i32_1 = arith.constant 0 : i32
    return %c0_i32, %c0_i32_0 : i32, i32
  }
  func.func @transform_17(%arg0: i32) -> (i32, i32) {
    %c0_i32 = arith.constant 0 : i32
    %c0_i32_0 = arith.constant 0 : i32
    %c0_i32_1 = arith.constant 0 : i32
    return %c0_i32, %c0_i32_0 : i32, i32
  }
  func.func @transform_18(%arg0: i32) -> (i32, i32) {
    %c0_i32 = arith.constant 0 : i32
    %c0_i32_0 = arith.constant 0 : i32
    %c0_i32_1 = arith.constant 0 : i32
    return %c0_i32, %c0_i32_0 : i32, i32
  }
  func.func @transform_19(%arg0: i32) -> (i32, i32, i32) {
    %c0_i32 = arith.constant 0 : i32
    %c0_i32_0 = arith.constant 0 : i32
    %c0_i32_1 = arith.constant 0 : i32
    return %arg0, %c0_i32, %c0_i32_0 : i32, i32, i32
  }
}

</mosaic_0001>

<bundles_post_ra>
// kernel: tpu_custom_call.1
= control target key start
LH: loop header
LB: loop body
LE: loop exit
PB: predicated region body
PF: predicated region fallthrough
CT: control target
= control target key end

     0   :  { %s5087_s0 = inlined_call_operand.vmem [shape: f32[4], index: 0, kind: input, shape index: {}]   ;;  %s5088_s1 = inlined_call_operand.vmem [shape: f32[1,324,16], index: 1, kind: input, shape index: {}]   ;;  %s5089_s2 = inlined_call_operand.hbm [shape: f32[1,128], index: 2, kind: input, shape index: {}]   ;;  %s5090_s3 = inlined_call_operand.hbm [shape: bf16[16,128], index: 3, kind: input, shape index: {}]   ;;  %s5091_s4 = inlined_call_operand.hbm [shape: f32[1,128], index: 4, kind: input, shape index: {}]   ;;  %s5092_s5 = inlined_call_operand.vmem [shape: bf16[128,128], index: 5, kind: input, shape index: {}]   ;;  %s5093_s6 = inlined_call_operand.hbm [shape: f32[1,128], index: 6, kind: input, shape index: {}]   ;;  %s5094_s7 = inlined_call_operand.hbm [shape: f32[1,128], index: 7, kind: input, shape index: {}]   ;;  %s5095_s8 = inlined_call_operand.vmem [shape: bf16[128,128], index: 8, kind: input, shape index: {}]   ;;  %s5096_s9 = inlined_call_operand.hbm [shape: f32[1,128], index: 9, kind: input, shape index: {}]   ;;  %s5097_s10 = inlined_call_operand.vmem [shape: bf16[128,128], index: 10, kind: input, shape index: {}]   ;;  %s5098_s11 = inlined_call_operand.hbm [shape: f32[1,128], index: 11, kind: input, shape index: {}]   ;;  %s5099_s12 = inlined_call_operand.hbm [shape: f32[1,128], index: 12, kind: input, shape index: {}]   ;;  %s5100_s13 = inlined_call_operand.vmem [shape: bf16[128,128], index: 13, kind: input, shape index: {}]   ;;  %s5101_s14 = inlined_call_operand.hbm [shape: f32[1,128], index: 14, kind: input, shape index: {}]   ;;  %s5102_s15 = inlined_call_operand.vmem [shape: bf16[128,128], index: 15, kind: input, shape index: {}]   ;;  %s5103_s16 = inlined_call_operand.vmem [shape: f32[1,128], index: 16, kind: input, shape index: {}]   ;;  %s5104_s17 = inlined_call_operand.vmem [shape: bf16[128,128], index: 17, kind: input, shape index: {}]   ;;  %s5105_s18 = inlined_call_operand.vmem [shape: f32[1,128], index: 18, kind: input, shape index: {}]   ;;  %s5106_s19 = inlined_call_operand.vmem [shape: f32[1,12,128], index: 19, kind: output, shape index: {}]  }
   0x1   :  { %5109 = sst [smem:[#allocation27_spill]] %s5087_s0 }
   0x2   :  { %5110 = sst [smem:[#allocation28_spill]] %s5088_s1 }
   0x3   :  { %5111 = sst [smem:[#allocation29_spill]] %s5089_s2 }
   0x4   :  { %5112 = sst [smem:[#allocation30_spill]] %s5090_s3 }
   0x5   :  { %5113 = sst [smem:[#allocation31_spill]] %s5106_s19 }
   0x6   :  { %24 = vsyncpa [#allocation7], 0 }
   0x7   :  { %25 = vsyncpa [#allocation6], 0 }
   0x8   :  { %26 = vsyncpa [#allocation10], 0 }
   0x9   :  { %27 = vsyncpa [#allocation13], 0 }
   0xa   :  { %28 = vsyncpa [#allocation16], 0  ;;  %s5114_s20 = sld [smem:[#allocation30_spill]] }
  0x10   :  { %s56_s21 = sshll.u32 %s5114_s20, 4  ;;  %s57_s21 = int_to_ptr.hbm [resolvable:$true] %s56_s21 }
  0x11   :  { %29 = vsyncpa [#allocation19], 0  ;;  %s3317_s1 = smov [#allocation9]   ;;  %s83_s24 = sshll.u32 %s5093_s6, 4  ;;  %s84_s24 = int_to_ptr.hbm [resolvable:$true] %s83_s24 }
  0x12   :  { %s58_s22 = sshll.u32 %s3317_s1, 4  ;;  %s3318_s25 = smov 64   ;;  %s59_s22 = int_to_ptr.vmem [resolvable:$true] %s58_s22 }
  0x13   :  { %s3319_s3 = smov 4   ;;  %s3320_s26 = smov [#allocation12]  }
  0x14   :  { %64 = dma.hbm_to_vmem [thread:$0]  %s57_s21, 128, %s59_s22, [#allocation10], %s3318_s25, %s3318_s25, %s3319_s3  }
  0x15   :  { %s85_s27 = sshll.u32 %s3320_s26, 4  ;;  %s107_s0 = sshll.u32 %s5096_s9, 4  ;;  %s86_s27 = int_to_ptr.vmem [resolvable:$true] %s85_s27  ;;  %s108_s0 = int_to_ptr.hbm [resolvable:$true] %s107_s0 }
  0x16   :  { %88 = dma.hbm_to_vmem [thread:$0]  %s84_s24, 16, %s86_s27, [#allocation13]  }
  0x17   :  { %s131_s1 = sshll.u32 %s5099_s12, 4  ;;  %s3321_s19 = smov [#allocation15]   ;;  %s132_s1 = int_to_ptr.hbm [resolvable:$true] %s131_s1 }
  0x18   :  { %s109_s2 = sshll.u32 %s3321_s19, 4  ;;  %s3322_s6 = smov [#allocation18]   ;;  %s110_s2 = int_to_ptr.vmem [resolvable:$true] %s109_s2 }
  0x19   :  { %112 = dma.hbm_to_vmem [thread:$0]  %s108_s0, 16, %s110_s2, [#allocation16]  }
  0x1a   :  { %s133_s21 = sshll.u32 %s3322_s6, 4  ;;  %s5115_s25 = sld [smem:[#allocation27_spill]]  ;;  %s134_s21 = int_to_ptr.vmem [resolvable:$true] %s133_s21 }
  0x1b   :  { %136 = dma.hbm_to_vmem [thread:$0]  %s132_s1, 16, %s134_s21, [#allocation19]  }
  0x1c   :  { %s5116_s26 = sld [smem:[#allocation29_spill]]  ;;  %s3323_s28 = smov [#allocation5]  }
  0x1d   :  { %s3324_s12 = smov [#allocation8]   ;;  %s70_s30 = sshll.u32 %s5091_s4, 4  ;;  %s71_s30 = int_to_ptr.hbm [resolvable:$true] %s70_s30 }
  0x1e   :  { %s48_s19 = sshll.u32 %s3324_s12, 4  ;;  %s94_s1 = sshll.u32 %s5094_s7, 4  ;;  %s49_s19 = int_to_ptr.vmem [resolvable:$true] %s48_s19  ;;  %s95_s1 = int_to_ptr.hbm [resolvable:$true] %s94_s1 }
  0x1f   :  { %s3325_s6 = smov [#allocation11]   ;;  %s3326_s22 = smov [#allocation14]  }
  0x20   :  { %s35_s3 = sshll.u32 %s5115_s25, 4  ;;  %s72_s21 = sshll.u32 %s3325_s6, 4  ;;  %s36_s3 = int_to_ptr.vmem [resolvable:$true] %s35_s3  ;;  %s73_s21 = int_to_ptr.vmem [resolvable:$true] %s72_s21 }
  0x21   :  { %38 = dma.vmem_to_smem %s36_s3, 16, %s3323_s28, [#allocation7]  }
  0x22   :  { %s46_s27 = sshll.u32 %s5116_s26, 4  ;;  %s96_s23 = sshll.u32 %s3326_s22, 4  ;;  %s47_s27 = int_to_ptr.hbm [resolvable:$true] %s46_s27  ;;  %s97_s23 = int_to_ptr.vmem [resolvable:$true] %s96_s23 }
  0x23   :  { %51 = dma.hbm_to_vmem [thread:$0]  %s47_s27, 16, %s49_s19, [#allocation6]  }
  0x24   :  { %75 = dma.hbm_to_vmem [thread:$0]  %s71_s30, 16, %s73_s21, [#allocation10]  }
  0x25   :  { %s120_s9 = sshll.u32 %s5098_s11, 4  ;;  %s144_s26 = sshll.u32 %s5101_s14, 4  ;;  %s121_s9 = int_to_ptr.hbm [resolvable:$true] %s120_s9  ;;  %s145_s26 = int_to_ptr.hbm [resolvable:$true] %s144_s26 }
  0x26   :  { %99 = dma.hbm_to_vmem [thread:$0]  %s95_s1, 16, %s97_s23, [#allocation13]  }
  0x27   :  { %s3327_s27 = smov [#allocation17]   ;;  %s3328_s28 = smov [#allocation20]  }
  0x28   :  { %s122_s7 = sshll.u32 %s3327_s27, 4  ;;  %s146_s12 = sshll.u32 %s3328_s28, 4  ;;  %s123_s7 = int_to_ptr.vmem [resolvable:$true] %s122_s7  ;;  %s147_s12 = int_to_ptr.vmem [resolvable:$true] %s146_s12 }
  0x29   :  { %125 = dma.hbm_to_vmem [thread:$0]  %s121_s9, 16, %s123_s7, [#allocation16]  }
  0x2a   :  { %149 = dma.hbm_to_vmem [thread:$0]  %s145_s26, 16, %s147_s12, [#allocation19]  }
  0x2b   :  { %3305 = dma.done.wait [#allocation7], 16  }
  0x2c   :  { %3306 = vsyncadd [#allocation7], 4294967280 }
  0x2d   :  { %3307 = dma.done.wait [#allocation6], 16  }
  0x2e   :  { %3308 = vsyncadd [#allocation6], 4294967280 }
  0x2f   :  { %3309 = dma.done.wait [#allocation10], 144  }
  0x30   :  { %3310 = vsyncadd [#allocation10], 4294967152 }
  0x31   :  { %3311 = dma.done.wait [#allocation13], 32  }
  0x32   :  { %3312 = vsyncadd [#allocation13], 4294967264 }
  0x33   :  { %3313 = dma.done.wait [#allocation16], 32  }
  0x34   :  { %3314 = vsyncadd [#allocation16], 4294967264 }
  0x35   :  { %3315 = dma.done.wait [#allocation19], 32  }
  0x36   :  { %3316 = vsyncadd [#allocation19], 4294967264 }
  0x37   :  { %198 = sfence }
  0x38   :  { %s5117_s19 = sld [smem:[#allocation28_spill]]  ;;  %vm241_vm0 = vcmask 130048   ;;  %v3329_v14 = vmov 16.0  }
  0x39   :  { %2987 = vrcp.f32 %v3329_v14  ;;  %s4086_s23 = sld [smem:[#allocation5]] }
  0x3a   :  { %s5172_s9 = sld [smem:[#allocation31_spill]] }
  0x3e   :  { %v202_v0 = vld [vmem:[%s5117_s19 + $0x10] sm:$0xff]  ;;  %v200_v1 = vld [vmem:[%s5117_s19] sm:$0xff]  ;;  %v203_v5 = vld [vmem:[%s5117_s19 + $0x18] sm:$0xff] }
  0x3f   :  { %v248_v2 = vsel %vm241_vm0, %v202_v0, 0.0  ;;  %v242_v3 = vsel %vm241_vm0, %v200_v1, 0.0  ;;  %v204_v4 = vld [vmem:[%s5117_s19 + $0x20] sm:$0xff]  ;;  %v201_v6 = vld [vmem:[%s5117_s19 + $0x8] sm:$0xff]  ;;  %v251_v9 = vsel %vm241_vm0, %v203_v5, 0.0  ;;  %v206_v12 = vld [vmem:[%s5117_s19 + $0x30] sm:$0xff]  ;;  %v2988_v15 = vpop.eup %2987 }
  0x40   :  { %249 = vadd.xlane.f32.xlu1 %v248_v2  ;;  %243 = vadd.xlane.f32.xlu0 %v242_v3  ;;  %v254_v7 = vsel %vm241_vm0, %v204_v4, 0.0  ;;  %v205_v8 = vld [vmem:[%s5117_s19 + $0x28] sm:$0xff]  ;;  %v245_v10 = vsel %vm241_vm0, %v201_v6, 0.0  ;;  %v260_v13 = vsel %vm241_vm0, %v206_v12, 0.0  ;;  %v367_v16 = vmul.f32 16.0, %v2988_v15  ;;  %v3503_v34 = vld [vmem:[%s5117_s19 + $0x38] sm:$0xff] }
  0x41   :  { %255 = vadd.xlane.f32.xlu2 %v254_v7  ;;  %v257_v11 = vsel %vm241_vm0, %v205_v8, 0.0  ;;  %vm371_vm1 = vweird.f32 %v2988_v15  ;;  %v263_v40 = vsel %vm241_vm0, %v3503_v34, 0.0  ;;  %v3527_v47 = vld [vmem:[%s5117_s19 + $0x40] sm:$0xff]  ;;  %v3543_v56 = vld [vmem:[%s5117_s19 + $0x58] sm:$0xff]  ;;  %v3548_v57 = vld [vmem:[%s5117_s19 + $0x48] sm:$0xff] }
  0x42   :  { %v368_v17 = vsub.f32 1.0, %v367_v16  ;;  %v266_v51 = vsel %vm241_vm0, %v3527_v47, 0.0  ;;  %v275_v59 = vsel %vm241_vm0, %v3543_v56, 0.0  ;;  %v269_v61 = vsel %vm241_vm0, %v3548_v57, 0.0  ;;  %v3562_v63 = vld [vmem:[%s5117_s19 + $0x60] sm:$0xff] }
  0x44   :  { %v369_v18 = vmul.f32 %v2988_v15, %v368_v17 }
  0x46   :  { %v370_v19 = vadd.f32 %v2988_v15, %v369_v18 }
  0x48   :  { %252 = vadd.xlane.f32.xlu1 %v251_v9  ;;  %246 = vadd.xlane.f32.xlu0 %v245_v10  ;;  %v3488_v20 = vsel %vm371_vm1, %v2988_v15, %v370_v19 }
  0x49   :  { %258 = vadd.xlane.f32.xlu2 %v257_v11 }
  0x51   :  { %261 = vadd.xlane.f32.xlu2 %v260_v13 }
  0xb3   :  { %v250_v21 = vpop.xlane.xlu1 %249  ;;  %v244_v22 = vpop.xlane.xlu0 %243 }
  0xb4   :  { %v373_v23 = vmul.f32 %v3488_v20, %v244_v22  ;;  %v256_v24 = vpop.xlane.xlu2 %255  ;;  %v375_v33 = vmul.f32 %v3488_v20, %v250_v21 }
  0xb5   :  { %v377_v32 = vmul.f32 %v3488_v20, %v256_v24 }
  0xb6   :  { %v3491_v25 = vsub.f32 %v200_v1, %v373_v23  ;;  %v3517_v42 = vsub.f32 %v202_v0, %v375_v33  ;;  %v3567_v0 = vld [vmem:[%s5117_s19 + $0x50] sm:$0xff]  ;;  %v278_v1 = vsel %vm241_vm0, %v3562_v63, 0.0 }
  0xb7   :  { %v3509_v38 = vsub.f32 %v204_v4, %v377_v32  ;;  %v272_v3 = vsel %vm241_vm0, %v3567_v0, 0.0  ;;  %v3577_v4 = vld [vmem:[%s5117_s19 + $0x68] sm:$0xff] }
  0xb8   :  { %v455_v26 = vmul.f32 %v3491_v25, %v3491_v25  ;;  %v457_v48 = vmul.f32 %v3517_v42, %v3517_v42 }
  0xb9   :  { %v459_v46 = vmul.f32 %v3509_v38, %v3509_v38 }
  0xba   :  { %v496_v27 = vsel %vm241_vm0, %v455_v26, 0.0  ;;  %v502_v52 = vsel %vm241_vm0, %v457_v48, 0.0 }
  0xbb   :  { %v253_v28 = vpop.xlane.xlu1 %252  ;;  %497 = vadd.xlane.f32.xlu0 %v496_v27  ;;  %v247_v29 = vpop.xlane.xlu0 %246  ;;  %v508_v50 = vsel %vm241_vm0, %v459_v46, 0.0 }
  0xbc   :  { %v376_v30 = vmul.f32 %v3488_v20, %v253_v28  ;;  %v374_v31 = vmul.f32 %v3488_v20, %v247_v29  ;;  %v259_v37 = vpop.xlane.xlu2 %258 }
  0xbd   :  { %v378_v45 = vmul.f32 %v3488_v20, %v259_v37 }
  0xbe   :  { %v3505_v35 = vsub.f32 %v203_v5, %v376_v30  ;;  %v3507_v36 = vsub.f32 %v201_v6, %v374_v31  ;;  %v281_v5 = vsel %vm241_vm0, %v3577_v4, 0.0  ;;  %v3584_v6 = vld [vmem:[%s5117_s19 + $0x70] sm:$0xff] }
  0xbf   :  { %v3531_v49 = vsub.f32 %v205_v8, %v378_v45  ;;  %v284_v7 = vsel %vm241_vm0, %v3584_v6, 0.0  ;;  %v2906_v8 = vld [vmem:[#allocation9] sm:$0xff] }
  0xc0   :  { %v458_v39 = vmul.f32 %v3505_v35, %v3505_v35  ;;  %v456_v41 = vmul.f32 %v3507_v36, %v3507_v36  ;;  %1256 = vmatpush.bf16.msra.mxu0 %v2906_v8  ;;  %2955 = vmatpush.bf16.msra.mxu2 %v2906_v8  ;;  %v3647_v8 = vld [vmem:[%s5117_s19 + $0x78] sm:$0xff] }
  0xc1   :  { %v460_v55 = vmul.f32 %v3531_v49, %v3531_v49 }
  0xc2   :  { %v505_v43 = vsel %vm241_vm0, %v458_v39, 0.0  ;;  %v499_v44 = vsel %vm241_vm0, %v456_v41, 0.0 }
  0xc3   :  { %506 = vadd.xlane.f32.xlu2 %v505_v43  ;;  %264 = vadd.xlane.f32.xlu0 %v263_v40  ;;  %v511_v60 = vsel %vm241_vm0, %v460_v55, 0.0 }
  0xc4   :  { %500 = vadd.xlane.f32.xlu1 %v499_v44  ;;  %v262_v53 = vpop.xlane.xlu2 %261 }
  0xc5   :  { %v379_v54 = vmul.f32 %v3488_v20, %v262_v53 }
  0xc7   :  { %v3550_v58 = vsub.f32 %v206_v12, %v379_v54 }
  0xc9   :  { %v461_v62 = vmul.f32 %v3550_v58, %v3550_v58 }
  0xcb   :  { %509 = vadd.xlane.f32.xlu2 %v508_v50  ;;  %267 = vadd.xlane.f32.xlu0 %v266_v51  ;;  %v514_v2 = vsel %vm241_vm0, %v461_v62, 0.0 }
  0xcc   :  { %503 = vadd.xlane.f32.xlu1 %v502_v52 }
  0xd3   :  { %276 = vadd.xlane.f32.xlu2 %v275_v59  ;;  %512 = vadd.xlane.f32.xlu0 %v511_v60 }
  0xd4   :  { %270 = vadd.xlane.f32.xlu1 %v269_v61 }
  0xdb   :  { %279 = vadd.xlane.f32.xlu2 %v278_v1  ;;  %515 = vadd.xlane.f32.xlu0 %v514_v2 }
  0xdc   :  { %273 = vadd.xlane.f32.xlu1 %v272_v3 }
  0xe3   :  { %282 = vadd.xlane.f32.xlu0 %v281_v5 }
  0xeb   :  { %285 = vadd.xlane.f32.xlu0 %v284_v7 }
 0x12e   :  { %v498_v9 = vpop.xlane.xlu0 %497 }
 0x12f   :  { %v619_v10 = vmul.f32 %v498_v9, %v3488_v20 }
 0x131   :  { %v660_v11 = vadd.f32 1e-05, %v619_v10 }
 0x133   :  { %2989 = vrsqrt.f32 %v660_v11  ;;  %vm707_vm3 = vweird.f32 %v660_v11 }
 0x136   :  { %v507_v12 = vpop.xlane.xlu2 %506  ;;  %v265_v13 = vpop.xlane.xlu0 %264 }
 0x137   :  { %v622_v14 = vmul.f32 %v507_v12, %v3488_v20  ;;  %v501_v15 = vpop.xlane.xlu1 %500  ;;  %v380_v16 = vmul.f32 %v3488_v20, %v265_v13 }
 0x138   :  { %v620_v17 = vmul.f32 %v501_v15, %v3488_v20 }
 0x139   :  { %v3592_v18 = vpop.eup %2989  ;;  %v3595_v19 = vsub.f32 %v3503_v34, %v380_v16  ;;  %v3598_v22 = vadd.f32 1e-05, %v622_v14  ;;  %v287_v14 = vsel %vm241_vm0, %v3647_v8, 0.0 }
 0x13a   :  { %v702_v21 = vmul.f32 %v3592_v18, %v660_v11  ;;  %v661_v23 = vadd.f32 1e-05, %v620_v17  ;;  %vm708_vm2 = vweird.f32 %v3592_v18 }
 0x13b   :  { %v462_v24 = vmul.f32 %v3595_v19, %v3595_v19  ;;  %vm3637_vm5 = vmor %vm707_vm3, %vm708_vm2  ;;  %vm737_vm8 = vweird.f32 %v3598_v22 }
 0x13c   :  { %v703_v26 = vmul.f32 %v3592_v18, %v702_v21  ;;  %2991 = vrsqrt.f32 %v661_v23  ;;  %vm717_vm6 = vweird.f32 %v661_v23 }
 0x13d   :  { %v517_v27 = vsel %vm241_vm0, %v462_v24, 0.0  ;;  %2993 = vrsqrt.f32 %v3598_v22 }
 0x13e   :  { %v704_v28 = vmul.f32 0.5, %v703_v26  ;;  %v510_v29 = vpop.xlane.xlu2 %509  ;;  %518 = vadd.xlane.f32.xlu1 %v517_v27  ;;  %v268_v30 = vpop.xlane.xlu0 %267 }
 0x13f   :  { %v504_v31 = vpop.xlane.xlu1 %503  ;;  %v381_v32 = vmul.f32 %v3488_v20, %v268_v30  ;;  %v623_v44 = vmul.f32 %v510_v29, %v3488_v20 }
 0x140   :  { %v621_v33 = vmul.f32 %v504_v31, %v3488_v20  ;;  %v705_v39 = vsub.f32 1.5, %v704_v28 }
 0x141   :  { %v3608_v34 = vsub.f32 %v3527_v47, %v381_v32  ;;  %v3625_v60 = vadd.f32 1e-05, %v623_v44 }
 0x142   :  { %v2992_v37 = vpop.eup %2991  ;;  %v3610_v40 = vadd.f32 1e-05, %v621_v33  ;;  %v706_v48 = vmul.f32 %v3592_v18, %v705_v39 }
 0x143   :  { %v712_v41 = vmul.f32 %v2992_v37, %v661_v23  ;;  %v3612_v43 = vpop.eup %2993  ;;  %v463_v45 = vmul.f32 %v3608_v34, %v3608_v34  ;;  %vm718_vm4 = vweird.f32 %v2992_v37  ;;  %vm747_vm1 = vweird.f32 %v3625_v60 }
 0x144   :  { %2995 = vrsqrt.f32 %v3610_v40  ;;  %v732_v52 = vmul.f32 %v3612_v43, %v3598_v22  ;;  %v710_v11 = vsel %vm3637_vm5, %v3592_v18, %v706_v48  ;;  %vm719_vm7 = vmor %vm717_vm6, %vm718_vm4  ;;  %vm738_vm9 = vweird.f32 %v3612_v43 }
 0x145   :  { %v713_v46 = vmul.f32 %v2992_v37, %v712_v41  ;;  %v520_v50 = vsel %vm241_vm0, %v463_v45, 0.0  ;;  %v1111_v23 = vmul.f32 %v710_v11, %v3491_v25  ;;  %v3678_v25 = vld [vmem:[%s5117_s19 + $0x80] sm:$0xff]  ;;  %vm3703_vm11 = vmor %vm737_vm8, %vm738_vm9  ;;  %vm727_vm12 = vweird.f32 %v3610_v40 }
 0x146   :  { %v277_v47 = vpop.xlane.xlu2 %276  ;;  %v513_v51 = vpop.xlane.xlu0 %512  ;;  %521 = vadd.xlane.f32.xlu1 %v520_v50  ;;  %v290_v45 = vsel %vm241_vm0, %v3678_v25, 0.0 }
 0x147   :  { %v714_v53 = vmul.f32 0.5, %v713_v46  ;;  %v384_v54 = vmul.f32 %v3488_v20, %v277_v47  ;;  %v271_v55 = vpop.xlane.xlu1 %270  ;;  %v624_v59 = vmul.f32 %v513_v51, %v3488_v20  ;;  %v2909_v51 = vld [vmem:[%s5092_s5 + $0x10] sm:$0xff] }
 0x148   :  { %v382_v61 = vmul.f32 %v3488_v20, %v271_v55 }
 0x149   :  { %v715_v62 = vsub.f32 1.5, %v714_v53  ;;  %v3629_v1 = vsub.f32 %v3543_v56, %v384_v54  ;;  %v3631_v2 = vadd.f32 1e-05, %v624_v59  ;;  %v733_v56 = vmul.f32 %v3612_v43, %v732_v52  ;;  %v3718_v59 = vld [vmem:[%s5117_s19 + $0x98] sm:$0xff] }
 0x14a   :  { %v3633_v3 = vpop.eup %2995  ;;  %v3642_v7 = vsub.f32 %v3548_v57, %v382_v61 }
 0x14b   :  { %v716_v9 = vmul.f32 %v2992_v37, %v715_v62  ;;  %v722_v10 = vmul.f32 %v3633_v3, %v3610_v40  ;;  %2997 = vrsqrt.f32 %v3631_v2  ;;  %v466_v57 = vmul.f32 %v3629_v1, %v3629_v1  ;;  %v3723_v40 = vld [vmem:[%s5117_s19 + $0x88] sm:$0xff] }
 0x14c   :  { %v464_v12 = vmul.f32 %v3642_v7, %v3642_v7  ;;  %2999 = vrsqrt.f32 %v3625_v60  ;;  %v734_v26 = vmul.f32 0.5, %v733_v56  ;;  %vm728_vm10 = vweird.f32 %v3633_v3 }
 0x14d   :  { %v723_v13 = vmul.f32 %v3633_v3, %v722_v10  ;;  %v720_v15 = vsel %vm719_vm7, %v2992_v37, %v716_v9  ;;  %v529_v17 = vsel %vm241_vm0, %v466_v57, 0.0  ;;  %vm729_vm13 = vmor %vm727_vm12, %vm728_vm10  ;;  %v299_v56 = vsel %vm241_vm0, %v3718_v59, 0.0 }
 0x14e   :  { %v280_v16 = vpop.xlane.xlu2 %279  ;;  %v523_v18 = vsel %vm241_vm0, %v464_v12, 0.0  ;;  %v3666_v21 = vpop.xlane.xlu0 %515  ;;  %v1112_v24 = vmul.f32 %v720_v15, %v3507_v36  ;;  %530 = vadd.xlane.f32.xlu0 %v529_v17  ;;  %288 = vadd.xlane.f32.xlu1 %v287_v14  ;;  %v735_v41 = vsub.f32 1.5, %v734_v26  ;;  %v293_v9 = vsel %vm241_vm0, %v3723_v40, 0.0 }
 0x14f   :  { %v724_v27 = vmul.f32 0.5, %v723_v13  ;;  %v385_v28 = vmul.f32 %v3488_v20, %v280_v16  ;;  %524 = vadd.xlane.f32.xlu2 %v523_v18  ;;  %v274_v29 = vpop.xlane.xlu1 %273  ;;  %vm757_vm14 = vweird.f32 %v3631_v2 }
 0x150   :  { %v383_v30 = vmul.f32 %v3488_v20, %v274_v29  ;;  %v1152_v31 = vpack.c.bf16 %v1112_v24, %v1111_v23  ;;  %v736_v50 = vmul.f32 %v3612_v43, %v735_v41 }
 0x151   :  { %v725_v32 = vsub.f32 1.5, %v724_v27  ;;  %v3673_v33 = vsub.f32 %v3562_v63, %v385_v28  ;;  %v3680_v36 = vpop.eup %2997  ;;  %v3771_v28 = vld [vmem:[%s5117_s19 + $0xa8] sm:$0xff] }
 0x152   :  { %v3683_v37 = vsub.f32 %v3567_v0, %v383_v30  ;;  %2691 = vmatmul.msk.bf16.vlgmr.msra.gmra.mxu0 %vm241_vm0, %v1152_v31  ;;  %v3686_v39 = vpop.eup %2999  ;;  %v752_v46 = vmul.f32 %v3680_v36, %v3631_v2  ;;  %vm758_vm15 = vweird.f32 %v3680_v36  ;;  %v305_v30 = vsel %vm241_vm0, %v3771_v28, 0.0 }
 0x153   :  { %v467_v44 = vmul.f32 %v3673_v33, %v3673_v33  ;;  %v726_v0 = vmul.f32 %v3633_v3, %v725_v32  ;;  %v742_v52 = vmul.f32 %v3686_v39, %v3625_v60  ;;  %vm748_vm2 = vweird.f32 %v3686_v39  ;;  %vm759_vm3 = vmor %vm757_vm14, %vm758_vm15 }
 0x154   :  { %v465_v63 = vmul.f32 %v3683_v37, %v3683_v37  ;;  %v753_v54 = vmul.f32 %v3680_v36, %v752_v46  ;;  %vm749_vm4 = vmor %vm747_vm1, %vm748_vm2 }
 0x155   :  { %v532_v48 = vsel %vm241_vm0, %v467_v44, 0.0  ;;  %v730_v61 = vsel %vm729_vm13, %v3633_v3, %v726_v0  ;;  %v743_v62 = vmul.f32 %v3686_v39, %v742_v52  ;;  %v2913_v44 = vld [vmem:[%s5092_s5 + $0x30] sm:$0xff]  ;;  %v2910_v0 = vld [vmem:[%s5092_s5 + $0x18] sm:$0xff] }
 0x156   :  { %v526_v47 = vsel %vm241_vm0, %v465_v63, 0.0  ;;  %v283_v22 = vpop.xlane.xlu0 %282  ;;  %533 = vadd.xlane.f32.xlu0 %v532_v48  ;;  %291 = vadd.xlane.f32.xlu1 %v290_v45  ;;  %v1113_v10 = vmul.f32 %v730_v61, %v3517_v42  ;;  %v754_v11 = vmul.f32 0.5, %v753_v54  ;;  %v3746_v42 = vld [vmem:[%s5117_s19 + $0xa0] sm:$0xff]  ;;  %v2912_v63 = vld [vmem:[%s5092_s5 + $0x28] sm:$0xff] }
 0x157   :  { %527 = vadd.xlane.f32.xlu2 %v526_v47  ;;  %v386_v53 = vmul.f32 %v3488_v20, %v283_v22  ;;  %v744_v13 = vmul.f32 0.5, %v743_v62  ;;  %v302_v18 = vsel %vm241_vm0, %v3746_v42, 0.0 }
 0x158   :  { %v755_v15 = vsub.f32 1.5, %v754_v11 }
 0x159   :  { %v3713_v55 = vsub.f32 %v3577_v4, %v386_v53  ;;  %v740_v4 = vsel %vm3703_vm11, %v3612_v43, %v736_v50  ;;  %v745_v17 = vsub.f32 1.5, %v744_v13  ;;  %v2908_v53 = vld [vmem:[%s5092_s5 + $0x8] sm:$0xff] }
 0x15a   :  { %v1114_v12 = vmul.f32 %v740_v4, %v3505_v35  ;;  %v3751_v35 = vld [vmem:[%s5117_s19 + $0x90] sm:$0xff]  ;;  %v756_v24 = vmul.f32 %v3680_v36, %v755_v15  ;;  %v2907_v4 = vld [vmem:[%s5092_s5] sm:$0xff] }
 0x15b   :  { %v468_v5 = vmul.f32 %v3713_v55, %v3713_v55  ;;  %v296_v23 = vsel %vm241_vm0, %v3751_v35, 0.0  ;;  %v746_v2 = vmul.f32 %v3686_v39, %v745_v17 }
 0x15c   :  { %v1153_v43 = vpack.c.bf16 %v1114_v12, %v1113_v10  ;;  %v760_v27 = vsel %vm759_vm3, %v3680_v36, %v756_v24  ;;  %v3782_v36 = vld [vmem:[%s5117_s19 + $0xb0] sm:$0xff] }
 0x15d   :  { %v535_v3 = vsel %vm241_vm0, %v468_v5, 0.0  ;;  %v750_v60 = vsel %vm749_vm4, %v3686_v39, %v746_v2  ;;  %v1116_v29 = vmul.f32 %v760_v27, %v3531_v49  ;;  %v308_v41 = vsel %vm241_vm0, %v3782_v36, 0.0 }
 0x15e   :  { %v286_v57 = vpop.xlane.xlu0 %285  ;;  %300 = vadd.xlane.f32.xlu0 %v299_v56  ;;  %536 = vadd.xlane.f32.xlu1 %v535_v3  ;;  %v1115_v31 = vmul.f32 %v750_v60, %v3509_v38  ;;  %v625_v49 = vmul.f32 %v3666_v21, %v3488_v20  ;;  %v2914_v38 = vld [vmem:[%s5092_s5 + $0x38] sm:$0xff]  ;;  %v2911_v21 = vld [vmem:[%s5092_s5 + $0x20] sm:$0xff] }
 0x15f   :  { %294 = vadd.xlane.f32.xlu2 %v293_v9  ;;  %v387_v14 = vmul.f32 %v3488_v20, %v286_v57  ;;  %1578 = vmatpush.bf16.msra.mxu1 %v2914_v38 }
 0x160   :  { %v1154_v32 = vpack.c.bf16 %v1116_v29, %v1115_v31  ;;  %2956 = vmatpush.bf16.msra.mxu3 %v2914_v38  ;;  %v666_v39 = vadd.f32 1e-05, %v625_v49 }
 0x161   :  { %v3741_v16 = vsub.f32 %v3584_v6, %v387_v14 }
 0x162   :  { %2692 = vmatmul.msk.bf16.gmra.mxu0 %vm241_vm0, %v1153_v43  ;;  %3001 = vrsqrt.f32 %v666_v39  ;;  %vm767_vm5 = vweird.f32 %v666_v39 }
 0x163   :  { %v469_v6 = vmul.f32 %v3741_v16, %v3741_v16  ;;  %1579 = vmatpush.bf16.msra.mxu1 %v2913_v44 }
 0x164   :  { %2957 = vmatpush.bf16.msra.mxu3 %v2913_v44 }
 0x165   :  { %v538_v26 = vsel %vm241_vm0, %v469_v6, 0.0 }
 0x166   :  { %303 = vadd.xlane.f32.xlu0 %v302_v18  ;;  %539 = vadd.xlane.f32.xlu1 %v538_v26 }
 0x167   :  { %297 = vadd.xlane.f32.xlu2 %v296_v23  ;;  %1580 = vmatpush.bf16.msra.mxu1 %v2912_v63 }
 0x168   :  { %2958 = vmatpush.bf16.msra.mxu3 %v2912_v63  ;;  %v3002_v45 = vpop.eup %3001 }
 0x169   :  { %v762_v46 = vmul.f32 %v3002_v45, %v666_v39  ;;  %vm768_vm6 = vweird.f32 %v3002_v45 }
 0x16a   :  { %vm3814_vm7 = vmor %vm767_vm5, %vm768_vm6 }
 0x16b   :  { %1581 = vmatpush.bf16.msra.mxu1 %v2911_v21  ;;  %v763_v22 = vmul.f32 %v3002_v45, %v762_v46 }
 0x16c   :  { %2959 = vmatpush.bf16.msra.mxu3 %v2911_v21 }
 0x16d   :  { %v764_v52 = vmul.f32 0.5, %v763_v22 }
 0x16e   :  { %306 = vadd.xlane.f32.xlu1 %v305_v30 }
 0x16f   :  { %1582 = vmatpush.bf16.msra.mxu1 %v2910_v0  ;;  %v765_v5 = vsub.f32 1.5, %v764_v52 }
 0x170   :  { %2960 = vmatpush.bf16.msra.mxu3 %v2910_v0 }
 0x171   :  { %v766_v11 = vmul.f32 %v3002_v45, %v765_v5 }
 0x172   :  { %2693 = vmatmul.msk.bf16.gmra.mxu0 %vm241_vm0, %v1154_v32 }
 0x173   :  { %1583 = vmatpush.bf16.msra.mxu1 %v2909_v51  ;;  %v770_v18 = vsel %vm3814_vm7, %v3002_v45, %v766_v11  ;;  %v3874_v11 = vld [vmem:[#allocation8] ss:$0 sm:$0xff] }
 0x174   :  { %2961 = vmatpush.bf16.msra.mxu3 %v2909_v51  ;;  %v1117_v30 = vmul.f32 %v770_v18, %v3550_v58 }
 0x176   :  { %309 = vadd.xlane.f32.xlu1 %v308_v41 }
 0x177   :  { %1584 = vmatpush.bf16.msra.mxu1 %v2908_v53 }
 0x178   :  { %2962 = vmatpush.bf16.msra.mxu3 %v2908_v53 }
 0x17b   :  { %1585 = vmatpush.bf16.msra.mxu1 %v2907_v4 }
 0x17c   :  { %2963 = vmatpush.bf16.msra.mxu3 %v2907_v4 }
 0x1b1   :  { %v519_v48 = vpop.xlane.xlu1 %518 }
 0x1b2   :  { %v626_v47 = vmul.f32 %v519_v48, %v3488_v20 }
 0x1b4   :  { %v667_v50 = vadd.f32 1e-05, %v626_v47 }
 0x1b6   :  { %3003 = vrsqrt.f32 %v667_v50  ;;  %vm777_vm8 = vweird.f32 %v667_v50 }
 0x1b9   :  { %v522_v54 = vpop.xlane.xlu1 %521 }
 0x1ba   :  { %v627_v61 = vmul.f32 %v522_v54, %v3488_v20 }
 0x1bc   :  { %v3004_v62 = vpop.eup %3003  ;;  %v668_v9 = vadd.f32 1e-05, %v627_v61 }
 0x1bd   :  { %v772_v56 = vmul.f32 %v3004_v62, %v667_v50  ;;  %vm778_vm9 = vweird.f32 %v3004_v62  ;;  %v3855_v50 = vld [vmem:[#allocation11] ss:$0 sm:$0xff] }
 0x1be   :  { %3005 = vrsqrt.f32 %v668_v9  ;;  %vm779_vm10 = vmor %vm777_vm8, %vm778_vm9  ;;  %vm787_vm11 = vweird.f32 %v668_v9 }
 0x1bf   :  { %v773_v10 = vmul.f32 %v3004_v62, %v772_v56 }
 0x1c1   :  { %v774_v57 = vmul.f32 0.5, %v773_v10  ;;  %v531_v13 = vpop.xlane.xlu0 %530  ;;  %v289_v15 = vpop.xlane.xlu1 %288 }
 0x1c2   :  { %v525_v12 = vpop.xlane.xlu2 %524  ;;  %v630_v17 = vmul.f32 %v531_v13, %v3488_v20  ;;  %v388_v6 = vmul.f32 %v3488_v20, %v289_v15 }
 0x1c3   :  { %v775_v14 = vsub.f32 1.5, %v774_v57  ;;  %v628_v43 = vmul.f32 %v525_v12, %v3488_v20 }
 0x1c4   :  { %v3823_v23 = vpop.eup %3005  ;;  %v3827_v2 = vadd.f32 1e-05, %v630_v17  ;;  %v3831_v60 = vsub.f32 %v3647_v8, %v388_v6 }
 0x1c5   :  { %v776_v24 = vmul.f32 %v3004_v62, %v775_v14  ;;  %v3825_v26 = vadd.f32 1e-05, %v628_v43  ;;  %v782_v27 = vmul.f32 %v3823_v23, %v668_v9  ;;  %vm788_vm12 = vweird.f32 %v3823_v23 }
 0x1c6   :  { %v470_v32 = vmul.f32 %v3831_v60, %v3831_v60  ;;  %vm3858_vm13 = vmor %vm787_vm11, %vm788_vm12  ;;  %vm817_vm4 = vweird.f32 %v3827_v2 }
 0x1c7   :  { %3007 = vrsqrt.f32 %v3825_v26  ;;  %v780_v29 = vsel %vm779_vm10, %v3004_v62, %v776_v24  ;;  %v783_v31 = vmul.f32 %v3823_v23, %v782_v27  ;;  %v3869_v62 = vld [vmem:[%s5117_s19 + $0xb8] sm:$0xff]  ;;  %vm797_vm15 = vweird.f32 %v3825_v26 }
 0x1c8   :  { %3009 = vrsqrt.f32 %v3827_v2  ;;  %v1118_v41 = vmul.f32 %v780_v29, %v3595_v19  ;;  %v541_v39 = vsel %vm241_vm0, %v470_v32, 0.0  ;;  %v311_v15 = vsel %vm241_vm0, %v3869_v62, 0.0 }
 0x1c9   :  { %v784_v49 = vmul.f32 0.5, %v783_v31  ;;  %v534_v8 = vpop.xlane.xlu0 %533  ;;  %542 = vadd.xlane.f32.xlu2 %v541_v39  ;;  %v292_v21 = vpop.xlane.xlu1 %291 }
 0x1ca   :  { %v528_v38 = vpop.xlane.xlu2 %527  ;;  %v1155_v44 = vpack.c.bf16 %v1118_v41, %v1117_v30  ;;  %v389_v45 = vmul.f32 %v3488_v20, %v292_v21  ;;  %v631_v22 = vmul.f32 %v534_v8, %v3488_v20 }
 0x1cb   :  { %v629_v63 = vmul.f32 %v528_v38, %v3488_v20  ;;  %v785_v58 = vsub.f32 1.5, %v784_v49 }
 0x1cc   :  { %2694 = vmatmul.msk.bf16.gmra.mxu0 %vm241_vm0, %v1155_v44  ;;  %v3851_v47 = vsub.f32 %v3678_v25, %v389_v45  ;;  %v3871_v4 = vadd.f32 1e-05, %v631_v22 }
 0x1cd   :  { %v3008_v0 = vpop.eup %3007  ;;  %v3844_v46 = vadd.f32 1e-05, %v629_v63  ;;  %v786_v52 = vmul.f32 %v3823_v23, %v785_v58 }
 0x1ce   :  { %v3846_v19 = vpop.eup %3009  ;;  %v792_v48 = vmul.f32 %v3008_v0, %v3825_v26  ;;  %v471_v25 = vmul.f32 %v3851_v47, %v3851_v47  ;;  %vm798_vm14 = vweird.f32 %v3008_v0 }
 0x1cf   :  { %3011 = vrsqrt.f32 %v3844_v46  ;;  %v1258_v51 = vpop.f32.mrf.mxu0  ;;  %v812_v61 = vmul.f32 %v3846_v19, %v3827_v2  ;;  %v790_v17 = vsel %vm3858_vm13, %v3823_v23, %v786_v52  ;;  %vm799_vm1 = vmor %vm797_vm15, %vm798_vm14  ;;  %vm818_vm5 = vweird.f32 %v3846_v19 }
 0x1d0   :  { %v793_v53 = vmul.f32 %v3008_v0, %v792_v48  ;;  %v1259_v10 = vadd.f32 %v3855_v50, %v1258_v51  ;;  %v544_v57 = vsel %vm241_vm0, %v471_v25, 0.0  ;;  %3013 = vrsqrt.f32 %v3871_v4  ;;  %vm3948_vm7 = vmor %vm817_vm4, %vm818_vm5 }
 0x1d1   :  { %v301_v9 = vpop.xlane.xlu0 %300  ;;  %v537_v12 = vpop.xlane.xlu1 %536  ;;  %545 = vadd.xlane.f32.xlu2 %v544_v57  ;;  %v813_v18 = vmul.f32 %v3846_v19, %v812_v61  ;;  %v1119_v41 = vmul.f32 %v790_v17, %v3608_v34  ;;  %vm807_vm8 = vweird.f32 %v3844_v46  ;;  %vm827_vm14 = vweird.f32 %v3871_v4 }
 0x1d2   :  { %v794_v5 = vmul.f32 0.5, %v793_v53  ;;  %v295_v56 = vpop.xlane.xlu2 %294  ;;  %v392_v13 = vmul.f32 %v3488_v20, %v301_v9  ;;  %v632_v43 = vmul.f32 %v537_v12, %v3488_v20  ;;  %v1407_v23 = vmul.f32 %v3874_v11, %v1259_v10 }
 0x1d3   :  { %v390_v3 = vmul.f32 %v3488_v20, %v295_v56  ;;  %vm1362_vm2 = vcmp.ge.f32.partialorder %v1259_v10, 0.0  ;;  %v814_v49 = vmul.f32 0.5, %v813_v18 }
 0x1d4   :  { %v795_v14 = vsub.f32 1.5, %v794_v5  ;;  %v3892_v27 = vsub.f32 %v3718_v59, %v392_v13  ;;  %v3897_v31 = vadd.f32 1e-05, %v632_v43  ;;  %v1448_v53 = vsel %vm1362_vm2, %v1259_v10, %v1407_v23 }
 0x1d5   :  { %v3885_v6 = vpop.eup %3011  ;;  %v3889_v24 = vsub.f32 %v3723_v40, %v390_v3  ;;  %v815_v9 = vsub.f32 1.5, %v814_v49  ;;  %v3932_v3 = vld [vmem:[%s5117_s19 + $0xc0] sm:$0xff] }
 0x1d6   :  { %v796_v29 = vmul.f32 %v3008_v0, %v795_v14  ;;  %v802_v30 = vmul.f32 %v3885_v6, %v3844_v46  ;;  %3015 = vrsqrt.f32 %v3897_v31  ;;  %v474_v39 = vmul.f32 %v3892_v27, %v3892_v27  ;;  %v3918_v61 = vpop.eup %3013  ;;  %v3965_v46 = vld [vmem:[%s5117_s19 + $0xc8] sm:$0xff] }
 0x1d7   :  { %v1260_v32 = vpop.f32.mrf.mxu0  ;;  %v472_v40 = vmul.f32 %v3889_v24, %v3889_v24  ;;  %vm808_vm6 = vweird.f32 %v3885_v6  ;;  %v314_v2 = vsel %vm241_vm0, %v3932_v3, 0.0  ;;  %v816_v14 = vmul.f32 %v3846_v19, %v815_v9  ;;  %v4008_v9 = vld [vmem:[%s5117_s19 + $0xe0] sm:$0xff] }
 0x1d8   :  { %v803_v59 = vmul.f32 %v3885_v6, %v802_v30  ;;  %v1261_v26 = vadd.f32 %v3855_v50, %v1260_v32  ;;  %v800_v8 = vsel %vm799_vm1, %v3008_v0, %v796_v29  ;;  %v553_v22 = vsel %vm241_vm0, %v474_v39, 0.0  ;;  %vm3954_vm9 = vmor %vm807_vm8, %vm808_vm6 }
 0x1d9   :  { %v547_v38 = vsel %vm241_vm0, %v472_v40, 0.0  ;;  %v304_v21 = vpop.xlane.xlu0 %303  ;;  %v1120_v58 = vmul.f32 %v800_v8, %v3642_v7  ;;  %v3913_v48 = vpop.xlane.xlu1 %539  ;;  %312 = vadd.xlane.f32.xlu2 %v311_v15  ;;  %554 = vadd.xlane.f32.xlu1 %v553_v22  ;;  %v822_v18 = vmul.f32 %v3918_v61, %v3871_v4  ;;  %vm837_vm12 = vweird.f32 %v3897_v31 }
 0x1da   :  { %v804_v44 = vmul.f32 0.5, %v803_v59  ;;  %v1408_v63 = vmul.f32 %v3874_v11, %v1261_v26  ;;  %548 = vadd.xlane.f32.xlu0 %v547_v38  ;;  %v298_v34 = vpop.xlane.xlu2 %297  ;;  %vm1363_vm3 = vcmp.ge.f32.partialorder %v1261_v26, 0.0  ;;  %v393_v51 = vmul.f32 %v3488_v20, %v304_v21  ;;  %v3977_v59 = vld [vmem:[%s5117_s19 + $0xd8] sm:$0xff] }
 0x1db   :  { %v391_v45 = vmul.f32 %v3488_v20, %v298_v34  ;;  %v1156_v0 = vpack.c.bf16 %v1120_v58, %v1119_v41  ;;  %v823_v49 = vmul.f32 %v3918_v61, %v822_v18  ;;  %v323_v34 = vsel %vm241_vm0, %v3977_v59, 0.0 }
 0x1dc   :  { %v805_v52 = vsub.f32 1.5, %v804_v44  ;;  %v1449_v54 = vsel %vm1363_vm3, %v1261_v26, %v1408_v63  ;;  %v3924_v25 = vsub.f32 %v3746_v42, %v393_v51  ;;  %v3926_v56 = vpop.eup %3015  ;;  %v820_v26 = vsel %vm3948_vm7, %v3846_v19, %v816_v14  ;;  %v4028_v14 = vld [vmem:[%s5117_s19 + $0xe8] sm:$0xff] }
 0x1dd   :  { %v3921_v7 = vsub.f32 %v3751_v35, %v391_v45  ;;  %v1489_v5 = vpack.c.bf16 %v1449_v54, %v1448_v53  ;;  %2695 = vmatmul.msk.bf16.gmra.mxu0 %vm241_vm0, %v1156_v0  ;;  %v832_v12 = vmul.f32 %v3926_v56, %v3897_v31  ;;  %v1122_v19 = vmul.f32 %v820_v26, %v3629_v1  ;;  %v3999_v1 = vld [vmem:[%s5117_s19 + $0xd0] sm:$0xff] }
 0x1de   :  { %v806_v10 = vmul.f32 %v3885_v6, %v805_v52  ;;  %v475_v57 = vmul.f32 %v3924_v25, %v3924_v25  ;;  %vm838_vm13 = vweird.f32 %v3926_v56  ;;  %vm828_vm15 = vweird.f32 %v3918_v61 }
 0x1df   :  { %v1263_v35 = vpop.f32.mrf.mxu0  ;;  %1586 = vmatmul.bf16.vlgmr.msra.gmra.mxu1 %v1489_v5  ;;  %v473_v42 = vmul.f32 %v3921_v7, %v3921_v7  ;;  %v833_v40 = vmul.f32 %v3926_v56, %v832_v12  ;;  %v326_v12 = vsel %vm241_vm0, %v4008_v9, 0.0  ;;  %vm839_vm1 = vmor %vm837_vm12, %vm838_vm13 }
 0x1e0   :  { %v556_v15 = vsel %vm241_vm0, %v475_v57, 0.0  ;;  %v1264_v30 = vadd.f32 %v3855_v50, %v1263_v35  ;;  %v810_v32 = vsel %vm3954_vm9, %v3885_v6, %v806_v10  ;;  %v317_v6 = vsel %vm241_vm0, %v3965_v46, 0.0  ;;  %vm829_vm2 = vmor %vm827_vm14, %vm828_vm15 }
 0x1e1   :  { %v550_v13 = vsel %vm241_vm0, %v473_v42, 0.0  ;;  %v307_v29 = vpop.xlane.xlu1 %306  ;;  %315 = vadd.xlane.f32.xlu2 %v314_v2  ;;  %557 = vadd.xlane.f32.xlu1 %v556_v15  ;;  %v1121_v39 = vmul.f32 %v810_v32, %v3683_v37  ;;  %v834_v63 = vmul.f32 0.5, %v833_v40  ;;  %v824_v37 = vmul.f32 0.5, %v823_v49 }
 0x1e2   :  { %551 = vadd.xlane.f32.xlu0 %v550_v13  ;;  %v394_v23 = vmul.f32 %v3488_v20, %v307_v29  ;;  %vm1364_vm10 = vcmp.ge.f32.partialorder %v1264_v30, 0.0  ;;  %v320_v10 = vsel %vm241_vm0, %v3999_v1, 0.0 }
 0x1e3   :  { %v1157_v22 = vpack.c.bf16 %v1122_v19, %v1121_v39  ;;  %v835_v53 = vsub.f32 1.5, %v834_v63  ;;  %v825_v35 = vsub.f32 1.5, %v824_v37 }
 0x1e4   :  { %v3972_v41 = vsub.f32 %v3771_v28, %v394_v23  ;;  %v1409_v28 = vmul.f32 %v3874_v11, %v1264_v30 }
 0x1e5   :  { %v836_v57 = vmul.f32 %v3926_v56, %v835_v53  ;;  %v826_v13 = vmul.f32 %v3918_v61, %v825_v35 }
 0x1e6   :  { %v476_v44 = vmul.f32 %v3972_v41, %v3972_v41  ;;  %v1450_v52 = vsel %vm1364_vm10, %v1264_v30, %v1409_v28  ;;  %v329_v30 = vsel %vm241_vm0, %v4028_v14, 0.0 }
 0x1e7   :  { %v1265_v38 = vpop.f32.mrf.mxu0  ;;  %v840_v4 = vsel %vm839_vm1, %v3926_v56, %v836_v57  ;;  %v830_v15 = vsel %vm829_vm2, %v3918_v61, %v826_v13 }
 0x1e8   :  { %v1266_v8 = vadd.f32 %v3855_v50, %v1265_v38  ;;  %v559_v58 = vsel %vm241_vm0, %v476_v44, 0.0  ;;  %v1124_v29 = vmul.f32 %v840_v4, %v3713_v55  ;;  %v1123_v23 = vmul.f32 %v830_v15, %v3673_v33  ;;  %v4042_v55 = vld [vmem:[%s5117_s19 + $0xf0] sm:$0xff] }
 0x1e9   :  { %v310_v45 = vpop.xlane.xlu1 %309  ;;  %560 = vadd.xlane.f32.xlu2 %v559_v58  ;;  %324 = vadd.xlane.f32.xlu1 %v323_v34  ;;  %v332_v49 = vsel %vm241_vm0, %v4042_v55, 0.0  ;;  %v633_v33 = vmul.f32 %v3913_v48, %v3488_v20 }
 0x1ea   :  { %v1410_v21 = vmul.f32 %v3874_v11, %v1266_v8  ;;  %318 = vadd.xlane.f32.xlu0 %v317_v6  ;;  %vm1365_vm11 = vcmp.ge.f32.partialorder %v1266_v8, 0.0  ;;  %v395_v51 = vmul.f32 %v3488_v20, %v310_v45  ;;  %v1158_v32 = vpack.c.bf16 %v1124_v29, %v1123_v23 }
 0x1eb   :  { %v674_v38 = vadd.f32 1e-05, %v633_v33 }
 0x1ec   :  { %v1451_v0 = vsel %vm1365_vm11, %v1266_v8, %v1410_v21  ;;  %v4002_v5 = vsub.f32 %v3782_v36, %v395_v51 }
 0x1ed   :  { %v1490_v54 = vpack.c.bf16 %v1451_v0, %v1450_v52  ;;  %2696 = vmatmul.msk.bf16.gmra.mxu0 %vm241_vm0, %v1157_v22  ;;  %3017 = vrsqrt.f32 %v674_v38  ;;  %vm847_vm5 = vweird.f32 %v674_v38 }
 0x1ee   :  { %v477_v36 = vmul.f32 %v4002_v5, %v4002_v5 }
 0x1ef   :  { %v1268_v42 = vpop.f32.mrf.mxu0  ;;  %1591 = vmatmul.bf16.gmra.mxu1 %v1490_v54 }
 0x1f0   :  { %v562_v31 = vsel %vm241_vm0, %v477_v36, 0.0  ;;  %v1269_v2 = vadd.f32 %v3855_v50, %v1268_v42 }
 0x1f1   :  { %563 = vadd.xlane.f32.xlu2 %v562_v31  ;;  %327 = vadd.xlane.f32.xlu1 %v326_v12 }
 0x1f2   :  { %321 = vadd.xlane.f32.xlu0 %v320_v10  ;;  %v1411_v17 = vmul.f32 %v3874_v11, %v1269_v2  ;;  %vm1366_vm3 = vcmp.ge.f32.partialorder %v1269_v2, 0.0 }
 0x1f3   :  { %v3018_v6 = vpop.eup %3017 }
 0x1f4   :  { %v1452_v40 = vsel %vm1366_vm3, %v1269_v2, %v1411_v17  ;;  %v842_v39 = vmul.f32 %v3018_v6, %v674_v38  ;;  %vm848_vm6 = vweird.f32 %v3018_v6  ;;  %v4126_v2 = vld [vmem:[%s5117_s19 + $0xf8] sm:$0xff] }
 0x1f5   :  { %vm4053_vm7 = vmor %vm847_vm5, %vm848_vm6 }
 0x1f6   :  { %v843_v44 = vmul.f32 %v3018_v6, %v842_v39 }
 0x1f7   :  { %v1270_v43 = vpop.f32.mrf.mxu0 }
 0x1f8   :  { %v1271_v18 = vadd.f32 %v3855_v50, %v1270_v43  ;;  %v844_v34 = vmul.f32 0.5, %v843_v44 }
 0x1f9   :  { %330 = vadd.xlane.f32.xlu2 %v329_v30 }
 0x1fa   :  { %v1412_v56 = vmul.f32 %v3874_v11, %v1271_v18  ;;  %vm1367_vm4 = vcmp.ge.f32.partialorder %v1271_v18, 0.0  ;;  %v845_v37 = vsub.f32 1.5, %v844_v34 }
 0x1fc   :  { %v1453_v26 = vsel %vm1367_vm4, %v1271_v18, %v1412_v56  ;;  %v846_v52 = vmul.f32 %v3018_v6, %v845_v37  ;;  %v4102_v37 = vld [vmem:[#allocation12] ss:$0 sm:$0xff] }
 0x1fd   :  { %v1491_v61 = vpack.c.bf16 %v1453_v26, %v1452_v40  ;;  %2697 = vmatmul.msk.bf16.gmra.mxu0 %vm241_vm0, %v1158_v32 }
 0x1fe   :  { %v850_v43 = vsel %vm4053_vm7, %v3018_v6, %v846_v52 }
 0x1ff   :  { %1596 = vmatmul.bf16.gmra.mxu1 %v1491_v61 }
 0x201   :  { %333 = vadd.xlane.f32.xlu2 %v332_v49 }
 0x23c   :  { %v543_v28 = vpop.xlane.xlu2 %542 }
 0x23d   :  { %v634_v8 = vmul.f32 %v543_v28, %v3488_v20 }
 0x23f   :  { %v675_v63 = vadd.f32 1e-05, %v634_v8 }
 0x241   :  { %3019 = vrsqrt.f32 %v675_v63  ;;  %vm857_vm8 = vweird.f32 %v675_v63 }
 0x244   :  { %v546_v19 = vpop.xlane.xlu2 %545 }
 0x245   :  { %v635_v21 = vmul.f32 %v546_v19, %v3488_v20 }
 0x247   :  { %v3020_v58 = vpop.eup %3019  ;;  %v4050_v51 = vadd.f32 1e-05, %v635_v21 }
 0x248   :  { %v852_v22 = vmul.f32 %v3020_v58, %v675_v63  ;;  %vm858_vm9 = vweird.f32 %v3020_v58 }
 0x249   :  { %v1273_v45 = vpop.f32.mrf.mxu0  ;;  %3021 = vrsqrt.f32 %v4050_v51  ;;  %vm4063_vm10 = vmor %vm857_vm8, %vm858_vm9  ;;  %vm867_vm13 = vweird.f32 %v4050_v51 }
 0x24a   :  { %v853_v48 = vmul.f32 %v3020_v58, %v852_v22  ;;  %v1274_v42 = vadd.f32 %v3855_v50, %v1273_v45 }
 0x24c   :  { %v854_v54 = vmul.f32 0.5, %v853_v48  ;;  %v313_v10 = vpop.xlane.xlu2 %312  ;;  %v555_v36 = vpop.xlane.xlu1 %554  ;;  %v1413_v56 = vmul.f32 %v3874_v11, %v1274_v42  ;;  %vm1368_vm11 = vcmp.ge.f32.partialorder %v1274_v42, 0.0 }
 0x24d   :  { %v549_v0 = vpop.xlane.xlu0 %548  ;;  %v396_v12 = vmul.f32 %v3488_v20, %v313_v10  ;;  %v638_v31 = vmul.f32 %v555_v36, %v3488_v20 }
 0x24e   :  { %v636_v35 = vmul.f32 %v549_v0, %v3488_v20  ;;  %v855_v57 = vsub.f32 1.5, %v854_v54  ;;  %v1454_v44 = vsel %vm1368_vm11, %v1274_v42, %v1413_v56  ;;  %v4112_v54 = vstv %s4086_s23 }
 0x24f   :  { %v4069_v15 = vpop.eup %3021  ;;  %v4072_v18 = vsub.f32 %v3869_v62, %v396_v12  ;;  %v4074_v29 = vadd.f32 1e-05, %v638_v31  ;;  %v1125_v62 = vmul.f32 %v850_v43, %v3741_v16 }
 0x250   :  { %v4061_v13 = vadd.f32 1e-05, %v636_v35  ;;  %v856_v17 = vmul.f32 %v3020_v58, %v855_v57  ;;  %v862_v30 = vmul.f32 %v4069_v15, %v4050_v51  ;;  %vm868_vm14 = vweird.f32 %v4069_v15 }
 0x251   :  { %v1275_v4 = vpop.f32.mrf.mxu0  ;;  %v478_v32 = vmul.f32 %v4072_v18, %v4072_v18  ;;  %vm4143_vm1 = vmor %vm867_vm13, %vm868_vm14  ;;  %vm897_vm8 = vweird.f32 %v4074_v29 }
 0x252   :  { %3023 = vrsqrt.f32 %v4061_v13  ;;  %v1276_v23 = vadd.f32 %v3855_v50, %v1275_v4  ;;  %v860_v40 = vsel %vm4063_vm10, %v3020_v58, %v856_v17  ;;  %v863_v26 = vmul.f32 %v4069_v15, %v862_v30 }
 0x253   :  { %v1126_v33 = vmul.f32 %v860_v40, %v3831_v60  ;;  %3025 = vrsqrt.f32 %v4074_v29  ;;  %v565_v38 = vsel %vm241_vm0, %v478_v32, 0.0  ;;  %vm877_vm3 = vweird.f32 %v4061_v13 }
 0x254   :  { %v1414_v61 = vmul.f32 %v3874_v11, %v1276_v23  ;;  %vm1369_vm12 = vcmp.ge.f32.partialorder %v1276_v23, 0.0  ;;  %v864_v39 = vmul.f32 0.5, %v863_v26  ;;  %566 = vadd.xlane.f32.xlu0 %v565_v38  ;;  %v316_v16 = vpop.xlane.xlu2 %315  ;;  %v558_v28 = vpop.xlane.xlu1 %557  ;;  %v335_v38 = vsel %vm241_vm0, %v4126_v2, 0.0 }
 0x255   :  { %v552_v49 = vpop.xlane.xlu0 %551  ;;  %v1159_v8 = vpack.c.bf16 %v1126_v33, %v1125_v62  ;;  %v397_v19 = vmul.f32 %v3488_v20, %v316_v16  ;;  %v639_v57 = vmul.f32 %v558_v28, %v3488_v20 }
 0x256   :  { %v637_v6 = vmul.f32 %v552_v49, %v3488_v20  ;;  %v1455_v63 = vsel %vm1369_vm12, %v1276_v23, %v1414_v61  ;;  %v865_v45 = vsub.f32 1.5, %v864_v39 }
 0x257   :  { %v1492_v21 = vpack.c.bf16 %v1455_v63, %v1454_v44  ;;  %2698 = vmatmul.msk.bf16.gmra.mxu0 %vm241_vm0, %v1159_v8  ;;  %v4105_v22 = vsub.f32 %v3932_v3, %v397_v19  ;;  %v4162_v28 = vadd.f32 1e-05, %v639_v57 }
 0x258   :  { %v4094_v34 = vpop.eup %3023  ;;  %v4097_v60 = vadd.f32 1e-05, %v637_v6  ;;  %v866_v36 = vmul.f32 %v4069_v15, %v865_v45 }
 0x259   :  { %v872_v58 = vmul.f32 %v4094_v34, %v4061_v13  ;;  %1601 = vmatmul.bf16.gmra.mxu1 %v1492_v21  ;;  %v4109_v0 = vpop.eup %3025  ;;  %v479_v35 = vmul.f32 %v4105_v22, %v4105_v22  ;;  %vm878_vm2 = vweird.f32 %v4094_v34 }
 0x25a   :  { %3027 = vrsqrt.f32 %v4097_v60  ;;  %v1278_v52 = vpop.f32.mrf.mxu0  ;;  %v892_v4 = vmul.f32 %v4109_v0, %v4074_v29  ;;  %vm4174_vm4 = vmor %vm877_vm3, %vm878_vm2  ;;  %vm898_vm9 = vweird.f32 %v4109_v0  ;;  %vm887_vm13 = vweird.f32 %v4097_v60 }
 0x25b   :  { %v873_v48 = vmul.f32 %v4094_v34, %v872_v58  ;;  %v568_v12 = vsel %vm241_vm0, %v479_v35, 0.0  ;;  %v1279_v32 = vadd.f32 %v3855_v50, %v1278_v52  ;;  %v870_v58 = vsel %vm4143_vm1, %v4069_v15, %v866_v36  ;;  %vm4239_vm12 = vmor %vm897_vm8, %vm898_vm9 }
 0x25c   :  { %v1587_v53 = vpop.f32.mrf.mxu1  ;;  %569 = vadd.xlane.f32.xlu0 %v568_v12  ;;  %v561_v30 = vpop.xlane.xlu2 %560  ;;  %v893_v16 = vmul.f32 %v4109_v0, %v892_v4  ;;  %v1127_v12 = vmul.f32 %v870_v58, %v3851_v47 }
 0x25d   :  { %v874_v3 = vmul.f32 0.5, %v873_v48  ;;  %v1588_v42 = vadd.f32 %v4102_v37, %v1587_v53  ;;  %v319_v10 = vpop.xlane.xlu0 %318  ;;  %v325_v56 = vpop.xlane.xlu1 %324  ;;  %v640_v40 = vmul.f32 %v561_v30, %v3488_v20  ;;  %v1415_v63 = vmul.f32 %v3874_v11, %v1279_v32  ;;  %v4204_v30 = vld [vmem:[%s5117_s19 + $0x110] sm:$0xff] }
 0x25e   :  { %v398_v31 = vmul.f32 %v3488_v20, %v319_v10  ;;  %v400_v62 = vmul.f32 %v3488_v20, %v325_v56  ;;  %vm1370_vm6 = vcmp.ge.f32.partialorder %v1279_v32, 0.0  ;;  %v894_v4 = vmul.f32 0.5, %v893_v16 }
 0x25f   :  { %v875_v43 = vsub.f32 1.5, %v874_v3  ;;  %vm1691_vm15 = vcmp.ge.f32.partialorder %v1588_v42, 0.0  ;;  %v1733_v17 = vmul.f32 %v4112_v54, %v1588_v42  ;;  %v4153_v6 = vadd.f32 1e-05, %v640_v40 }
 0x260   :  { %v4131_v23 = vpop.eup %3027  ;;  %v4137_v26 = vsub.f32 %v3965_v46, %v398_v31  ;;  %v4156_v39 = vsub.f32 %v3977_v59, %v400_v62  ;;  %v1456_v56 = vsel %vm1370_vm6, %v1279_v32, %v1415_v63  ;;  %v895_v16 = vsub.f32 1.5, %v894_v4 }
 0x261   :  { %v876_v49 = vmul.f32 %v4094_v34, %v875_v43  ;;  %v882_v33 = vmul.f32 %v4131_v23, %v4097_v60  ;;  %v1774_v46 = vsel %vm1691_vm15, %v1588_v42, %v1733_v17  ;;  %3029 = vrsqrt.f32 %v4153_v6  ;;  %v4199_v17 = vld [vmem:[%s5117_s19 + $0x100] sm:$0xff] }
 0x262   :  { %v480_v51 = vmul.f32 %v4137_v26, %v4137_v26  ;;  %1815 = vst [vmem:[#allocation2] sm:$0xff] %v1774_v46  ;;  %v1280_v44 = vpop.f32.mrf.mxu0  ;;  %v482_v59 = vmul.f32 %v4156_v39, %v4156_v39  ;;  %3031 = vrsqrt.f32 %v4162_v28  ;;  %vm888_vm10 = vweird.f32 %v4131_v23 }
 0x263   :  { %v883_v8 = vmul.f32 %v4131_v23, %v882_v33  ;;  %v1281_v19 = vadd.f32 %v3855_v50, %v1280_v44  ;;  %v880_v42 = vsel %vm4174_vm4, %v4094_v34, %v876_v49  ;;  %v338_v33 = vsel %vm241_vm0, %v4199_v17, 0.0  ;;  %vm4253_vm14 = vmor %vm887_vm13, %vm888_vm10 }
 0x264   :  { %v1589_v21 = vpop.f32.mrf.mxu1  ;;  %v571_v52 = vsel %vm241_vm0, %v480_v51, 0.0  ;;  %v577_v3 = vsel %vm241_vm0, %v482_v59, 0.0  ;;  %336 = vadd.xlane.f32.xlu0 %v335_v38  ;;  %v4189_v36 = vpop.xlane.xlu2 %563  ;;  %v1128_v31 = vmul.f32 %v880_v42, %v3889_v24  ;;  %v344_v38 = vsel %vm241_vm0, %v4204_v30, 0.0 }
 0x265   :  { %v884_v45 = vmul.f32 0.5, %v883_v8  ;;  %v1590_v48 = vadd.f32 %v4102_v37, %v1589_v21  ;;  %v322_v53 = vpop.xlane.xlu0 %321  ;;  %v1416_v35 = vmul.f32 %v3874_v11, %v1281_v19  ;;  %572 = vadd.xlane.f32.xlu1 %v571_v52  ;;  %578 = vadd.xlane.f32.xlu2 %v577_v3  ;;  %vm1371_vm7 = vcmp.ge.f32.partialorder %v1281_v19, 0.0  ;;  %v328_v32 = vpop.xlane.xlu1 %327  ;;  %v4249_v3 = vld [vmem:[%s5117_s19 + $0x118] sm:$0xff] }
 0x266   :  { %v399_v15 = vmul.f32 %v3488_v20, %v322_v53  ;;  %v401_v59 = vmul.f32 %v3488_v20, %v328_v32  ;;  %vm917_vm3 = vweird.f32 %v4153_v6 }
 0x267   :  { %vm1692_vm5 = vcmp.ge.f32.partialorder %v1590_v48, 0.0  ;;  %v1734_v10 = vmul.f32 %v4112_v54, %v1590_v48  ;;  %v885_v34 = vsub.f32 1.5, %v884_v45  ;;  %v1457_v47 = vsel %vm1371_vm7, %v1281_v19, %v1416_v35  ;;  %v4208_v40 = vpop.eup %3029  ;;  %v4232_v45 = vld [vmem:[%s5117_s19 + $0x108] sm:$0xff] }
 0x268   :  { %v4192_v57 = vsub.f32 %v3999_v1, %v399_v15  ;;  %v1160_v1 = vpack.c.bf16 %v1128_v31, %v1127_v12  ;;  %v1493_v61 = vpack.c.bf16 %v1457_v47, %v1456_v56  ;;  %v4216_v51 = vpop.eup %3031  ;;  %v912_v63 = vmul.f32 %v4208_v40, %v4153_v6 }
 0x269   :  { %v1775_v43 = vsel %vm1692_vm5, %v1590_v48, %v1734_v10  ;;  %v886_v44 = vmul.f32 %v4131_v23, %v885_v34  ;;  %v896_v48 = vmul.f32 %v4109_v0, %v895_v16  ;;  %v902_v53 = vmul.f32 %v4216_v51, %v4162_v28 }
 0x26a   :  { %1816 = vst [vmem:[#allocation2 + $0x8] sm:$0xff] %v1775_v43  ;;  %v481_v24 = vmul.f32 %v4192_v57, %v4192_v57  ;;  %v1283_v62 = vpop.f32.mrf.mxu0  ;;  %2699 = vmatmul.msk.bf16.gmra.mxu0 %vm241_vm0, %v1160_v1  ;;  %1606 = vmatmul.bf16.gmra.mxu1 %v1493_v61  ;;  %v913_v42 = vmul.f32 %v4208_v40, %v912_v63  ;;  %v341_v12 = vsel %vm241_vm0, %v4232_v45, 0.0  ;;  %v4291_v63 = vld [vmem:[%s5117_s19 + $0x120] sm:$0xff]  ;;  %vm918_vm4 = vweird.f32 %v4208_v40 }
 0x26b   :  { %v1284_v58 = vadd.f32 %v3855_v50, %v1283_v62  ;;  %v4262_v60 = vsub.f32 %v4008_v9, %v401_v59  ;;  %v890_v31 = vsel %vm4253_vm14, %v4131_v23, %v886_v44  ;;  %v903_v9 = vmul.f32 %v4216_v51, %v902_v53  ;;  %vm4310_vm8 = vmor %vm917_vm3, %vm918_vm4 }
 0x26c   :  { %v1592_v49 = vpop.f32.mrf.mxu1  ;;  %v574_v46 = vsel %vm241_vm0, %v481_v24, 0.0  ;;  %339 = vadd.xlane.f32.xlu0 %v338_v33  ;;  %v331_v21 = vpop.xlane.xlu2 %330  ;;  %v900_v47 = vsel %vm4239_vm12, %v4109_v0, %v896_v48  ;;  %v1129_v62 = vmul.f32 %v890_v31, %v3921_v7  ;;  %v914_v61 = vmul.f32 0.5, %v913_v42 }
 0x26d   :  { %v1593_v8 = vadd.f32 %v4102_v37, %v1592_v49  ;;  %575 = vadd.xlane.f32.xlu1 %v574_v46  ;;  %345 = vadd.xlane.f32.xlu2 %v344_v38  ;;  %v402_v13 = vmul.f32 %v3488_v20, %v331_v21  ;;  %v1417_v4 = vmul.f32 %v3874_v11, %v1284_v58  ;;  %vm1372_vm15 = vcmp.ge.f32.partialorder %v1284_v58, 0.0 }
 0x26e   :  { %v483_v38 = vmul.f32 %v4262_v60, %v4262_v60  ;;  %v1130_v46 = vmul.f32 %v900_v47, %v3892_v27  ;;  %v915_v59 = vsub.f32 1.5, %v914_v61  ;;  %vm907_vm5 = vweird.f32 %v4162_v28 }
 0x26f   :  { %vm1693_vm11 = vcmp.ge.f32.partialorder %v1593_v8, 0.0  ;;  %v1735_v19 = vmul.f32 %v4112_v54, %v1593_v8  ;;  %v4258_v29 = vsub.f32 %v4028_v14, %v402_v13  ;;  %v347_v14 = vsel %vm241_vm0, %v4249_v3, 0.0 }
 0x270   :  { %v1458_v32 = vsel %vm1372_vm15, %v1284_v58, %v1417_v4  ;;  %v1161_v21 = vpack.c.bf16 %v1130_v46, %v1129_v62  ;;  %v580_v48 = vsel %vm241_vm0, %v483_v38, 0.0  ;;  %v350_v58 = vsel %vm241_vm0, %v4291_v63, 0.0  ;;  %v4352_v46 = vld [vmem:[%s5117_s19 + $0x130] sm:$0xff] }
 0x271   :  { %v1776_v35 = vsel %vm1693_vm11, %v1593_v8, %v1735_v19  ;;  %v484_v1 = vmul.f32 %v4258_v29, %v4258_v29  ;;  %v904_v8 = vmul.f32 0.5, %v903_v9  ;;  %vm908_vm6 = vweird.f32 %v4216_v51 }
 0x272   :  { %1817 = vst [vmem:[#allocation2 + $0x10] sm:$0xff] %v1776_v35  ;;  %v1285_v10 = vpop.f32.mrf.mxu0  ;;  %v916_v15 = vmul.f32 %v4208_v40, %v915_v59  ;;  %vm4328_vm9 = vmor %vm907_vm5, %vm908_vm6 }
 0x273   :  { %v1286_v34 = vadd.f32 %v3855_v50, %v1285_v10  ;;  %v583_v24 = vsel %vm241_vm0, %v484_v1, 0.0  ;;  %v905_v53 = vsub.f32 1.5, %v904_v8 }
 0x274   :  { %v1594_v43 = vpop.f32.mrf.mxu1  ;;  %348 = vadd.xlane.f32.xlu0 %v347_v14  ;;  %v334_v33 = vpop.xlane.xlu2 %333  ;;  %v920_v9 = vsel %vm4310_vm8, %v4208_v40, %v916_v15 }
 0x275   :  { %v1595_v56 = vadd.f32 %v4102_v37, %v1594_v43  ;;  %v1418_v23 = vmul.f32 %v3874_v11, %v1286_v34  ;;  %342 = vadd.xlane.f32.xlu1 %v341_v12  ;;  %vm1373_vm1 = vcmp.ge.f32.partialorder %v1286_v34, 0.0  ;;  %584 = vadd.xlane.f32.xlu2 %v583_v24  ;;  %v403_v0 = vmul.f32 %v3488_v20, %v334_v33  ;;  %v4318_v12 = vld [vmem:[%s5117_s19 + $0x128] sm:$0xff] }
 0x276   :  { %v906_v31 = vmul.f32 %v4216_v51, %v905_v53  ;;  %v353_v1 = vsel %vm241_vm0, %v4318_v12, 0.0  ;;  %v1132_v40 = vmul.f32 %v920_v9, %v3972_v41  ;;  %v356_v41 = vsel %vm241_vm0, %v4352_v46, 0.0 }
 0x277   :  { %vm1694_vm2 = vcmp.ge.f32.partialorder %v1595_v56, 0.0  ;;  %v1736_v49 = vmul.f32 %v4112_v54, %v1595_v56  ;;  %v1459_v16 = vsel %vm1373_vm1, %v1286_v34, %v1418_v23  ;;  %v4294_v19 = vsub.f32 %v4042_v55, %v403_v0  ;;  %v4324_v34 = vld [vmem:[%s5117_s19 + $0x138] sm:$0xff] }
 0x278   :  { %v1494_v7 = vpack.c.bf16 %v1459_v16, %v1458_v32  ;;  %v359_v28 = vsel %vm241_vm0, %v4324_v34, 0.0  ;;  %v910_v62 = vsel %vm4328_vm9, %v4216_v51, %v906_v31 }
 0x279   :  { %v1777_v44 = vsel %vm1694_vm2, %v1595_v56, %v1736_v49  ;;  %v485_v52 = vmul.f32 %v4294_v19, %v4294_v19  ;;  %v1131_v33 = vmul.f32 %v910_v62, %v3924_v25  ;;  %v641_v25 = vmul.f32 %v4189_v36, %v3488_v20 }
 0x27a   :  { %1818 = vst [vmem:[#allocation2 + $0x18] sm:$0xff] %v1777_v44  ;;  %v1288_v13 = vpop.f32.mrf.mxu0  ;;  %2700 = vmatmul.msk.bf16.gmra.mxu0 %vm241_vm0, %v1161_v21  ;;  %1611 = vmatmul.bf16.gmra.mxu1 %v1494_v7 }
 0x27b   :  { %v586_v35 = vsel %vm241_vm0, %v485_v52, 0.0  ;;  %v1289_v10 = vadd.f32 %v3855_v50, %v1288_v13  ;;  %v1162_v16 = vpack.c.bf16 %v1132_v40, %v1131_v33  ;;  %v682_v8 = vadd.f32 1e-05, %v641_v25  ;;  %v4396_v25 = vld [vmem:[#allocation11] ss:$0 sm:$0xff] }
 0x27c   :  { %v1597_v27 = vpop.f32.mrf.mxu1  ;;  %351 = vadd.xlane.f32.xlu0 %v350_v58 }
 0x27d   :  { %v1598_v55 = vadd.f32 %v4102_v37, %v1597_v27  ;;  %581 = vadd.xlane.f32.xlu1 %v580_v48  ;;  %587 = vadd.xlane.f32.xlu2 %v586_v35  ;;  %v1419_v56 = vmul.f32 %v3874_v11, %v1289_v10  ;;  %vm1374_vm10 = vcmp.ge.f32.partialorder %v1289_v10, 0.0  ;;  %3033 = vrsqrt.f32 %v682_v8 }
 0x27e   :  { %vm927_vm13 = vweird.f32 %v682_v8 }
 0x27f   :  { %vm1695_vm7 = vcmp.ge.f32.partialorder %v1598_v55, 0.0  ;;  %v1737_v42 = vmul.f32 %v4112_v54, %v1598_v55  ;;  %v1460_v38 = vsel %vm1374_vm10, %v1289_v10, %v1419_v56 }
 0x281   :  { %v1778_v4 = vsel %vm1695_vm7, %v1598_v55, %v1737_v42 }
 0x282   :  { %1819 = vst [vmem:[#allocation2 + $0x20] sm:$0xff] %v1778_v4  ;;  %v1290_v14 = vpop.f32.mrf.mxu0 }
 0x283   :  { %v1291_v47 = vadd.f32 %v3855_v50, %v1290_v14  ;;  %v3034_v44 = vpop.eup %3033 }
 0x284   :  { %v1599_v23 = vpop.f32.mrf.mxu1  ;;  %v922_v7 = vmul.f32 %v3034_v44, %v682_v8  ;;  %vm928_vm14 = vweird.f32 %v3034_v44 }
 0x285   :  { %v1600_v24 = vadd.f32 %v4102_v37, %v1599_v23  ;;  %v1420_v61 = vmul.f32 %v3874_v11, %v1291_v47  ;;  %354 = vadd.xlane.f32.xlu1 %v353_v1  ;;  %vm1375_vm11 = vcmp.ge.f32.partialorder %v1291_v47, 0.0  ;;  %360 = vadd.xlane.f32.xlu2 %v359_v28  ;;  %vm4365_vm15 = vmor %vm927_vm13, %vm928_vm14 }
 0x286   :  { %v923_v13 = vmul.f32 %v3034_v44, %v922_v7 }
 0x287   :  { %vm1696_vm12 = vcmp.ge.f32.partialorder %v1600_v24, 0.0  ;;  %v1738_v49 = vmul.f32 %v4112_v54, %v1600_v24  ;;  %v1461_v0 = vsel %vm1375_vm11, %v1291_v47, %v1420_v61 }
 0x288   :  { %v1495_v32 = vpack.c.bf16 %v1461_v0, %v1460_v38  ;;  %v924_v27 = vmul.f32 0.5, %v923_v13 }
 0x289   :  { %v1779_v51 = vsel %vm1696_vm12, %v1600_v24, %v1738_v49 }
 0x28a   :  { %1820 = vst [vmem:[#allocation2 + $0x28] sm:$0xff] %v1779_v51  ;;  %2701 = vmatmul.msk.bf16.gmra.mxu0 %vm241_vm0, %v1162_v16  ;;  %1616 = vmatmul.bf16.gmra.mxu1 %v1495_v32  ;;  %v925_v53 = vsub.f32 1.5, %v924_v27 }
 0x28c   :  { %v926_v6 = vmul.f32 %v3034_v44, %v925_v53 }
 0x28d   :  { %357 = vadd.xlane.f32.xlu1 %v356_v41 }
 0x28e   :  { %v930_v49 = vsel %vm4365_vm15, %v3034_v44, %v926_v6  ;;  %vm362_vm15 = vcmask 125952  }
 0x28f   :  { %v1133_v7 = vmul.f32 %v930_v49, %v4002_v5 }
 0x2c7   :  { %v567_v21 = vpop.xlane.xlu0 %566 }
 0x2c8   :  { %v642_v59 = vmul.f32 %v567_v21, %v3488_v20 }
 0x2ca   :  { %v683_v48 = vadd.f32 1e-05, %v642_v59 }
 0x2cc   :  { %3035 = vrsqrt.f32 %v683_v48  ;;  %vm937_vm1 = vweird.f32 %v683_v48 }
 0x2cf   :  { %v570_v58 = vpop.xlane.xlu0 %569 }
 0x2d0   :  { %v643_v52 = vmul.f32 %v570_v58, %v3488_v20 }
 0x2d2   :  { %v3036_v55 = vpop.eup %3035  ;;  %v4361_v35 = vadd.f32 1e-05, %v643_v52 }
 0x2d3   :  { %v932_v36 = vmul.f32 %v3036_v55, %v683_v48  ;;  %vm938_vm2 = vweird.f32 %v3036_v55 }
 0x2d4   :  { %v1293_v15 = vpop.f32.mrf.mxu0  ;;  %3037 = vrsqrt.f32 %v4361_v35  ;;  %vm4382_vm4 = vmor %vm937_vm1, %vm938_vm2  ;;  %vm947_vm8 = vweird.f32 %v4361_v35 }
 0x2d5   :  { %v933_v10 = vmul.f32 %v3036_v55, %v932_v36  ;;  %v1294_v23 = vadd.f32 %v3855_v50, %v1293_v15 }
 0x2d6   :  { %v1602_v42 = vpop.f32.mrf.mxu1 }
 0x2d7   :  { %v1603_v31 = vadd.f32 %v4102_v37, %v1602_v42  ;;  %v934_v14 = vmul.f32 0.5, %v933_v10  ;;  %v337_v47 = vpop.xlane.xlu0 %336  ;;  %v1421_v41 = vmul.f32 %v3874_v11, %v1294_v23  ;;  %vm1376_vm5 = vcmp.ge.f32.partialorder %v1294_v23, 0.0 }
 0x2d8   :  { %v573_v43 = vpop.xlane.xlu1 %572  ;;  %v579_v9 = vpop.xlane.xlu2 %578  ;;  %v404_v24 = vmul.f32 %v3488_v20, %v337_v47 }
 0x2d9   :  { %vm1697_vm3 = vcmp.ge.f32.partialorder %v1603_v31, 0.0  ;;  %v1739_v1 = vmul.f32 %v4112_v54, %v1603_v31  ;;  %v644_v56 = vmul.f32 %v573_v43, %v3488_v20  ;;  %v646_v28 = vmul.f32 %v579_v9, %v3488_v20 }
 0x2da   :  { %v935_v62 = vsub.f32 1.5, %v934_v14  ;;  %v4378_v33 = vpop.eup %3037  ;;  %v4389_v0 = vsub.f32 %v4126_v2, %v404_v24 }
 0x2db   :  { %v1780_v61 = vsel %vm1697_vm3, %v1603_v31, %v1739_v1  ;;  %v4374_v40 = vadd.f32 1e-05, %v644_v56  ;;  %v4386_v50 = vadd.f32 1e-05, %v646_v28  ;;  %v942_v32 = vmul.f32 %v4378_v33, %v4361_v35 }
 0x2dc   :  { %1821 = vst [vmem:[#allocation2 + $0x30] sm:$0xff] %v1780_v61  ;;  %v936_v51 = vmul.f32 %v3036_v55, %v935_v62  ;;  %v1295_v16 = vpop.f32.mrf.mxu0  ;;  %v486_v59 = vmul.f32 %v4389_v0, %v4389_v0  ;;  %v1462_v28 = vsel %vm1376_vm5, %v1294_v23, %v1421_v41  ;;  %vm948_vm9 = vweird.f32 %v4378_v33 }
 0x2dd   :  { %3039 = vrsqrt.f32 %v4374_v40  ;;  %v1296_v8 = vadd.f32 %v4396_v25, %v1295_v16  ;;  %v943_v2 = vmul.f32 %v4378_v33, %v942_v32  ;;  %vm4443_vm10 = vmor %vm947_vm8, %vm948_vm9  ;;  %vm957_vm12 = vweird.f32 %v4374_v40 }
 0x2de   :  { %3041 = vrsqrt.f32 %v4386_v50  ;;  %v1604_v44 = vpop.f32.mrf.mxu1  ;;  %v940_v13 = vsel %vm4382_vm4, %v3036_v55, %v936_v51  ;;  %v589_v6 = vsel %vm241_vm0, %v486_v59, 0.0  ;;  %vm977_vm4 = vweird.f32 %v4386_v50 }
 0x2df   :  { %v1605_v21 = vadd.f32 %v4102_v37, %v1604_v44  ;;  %v1422_v48 = vmul.f32 %v3874_v11, %v1296_v8  ;;  %v1134_v58 = vmul.f32 %v940_v13, %v4072_v18  ;;  %vm1377_vm6 = vcmp.ge.f32.partialorder %v1296_v8, 0.0  ;;  %v340_v15 = vpop.xlane.xlu0 %339  ;;  %590 = vadd.xlane.f32.xlu0 %v589_v6 }
 0x2e0   :  { %v576_v27 = vpop.xlane.xlu1 %575  ;;  %v944_v52 = vmul.f32 0.5, %v943_v2  ;;  %v346_v53 = vpop.xlane.xlu2 %345  ;;  %v405_v55 = vmul.f32 %v3488_v20, %v340_v15 }
 0x2e1   :  { %vm1698_vm7 = vcmp.ge.f32.partialorder %v1605_v21, 0.0  ;;  %v1740_v5 = vmul.f32 %v4112_v54, %v1605_v21  ;;  %v645_v36 = vmul.f32 %v576_v27, %v3488_v20  ;;  %v407_v42 = vmul.f32 %v3488_v20, %v346_v53 }
 0x2e2   :  { %v1163_v11 = vpack.c.bf16 %v1134_v58, %v1133_v7  ;;  %v1463_v4 = vsel %vm1377_vm6, %v1296_v8, %v1422_v48  ;;  %v945_v14 = vsub.f32 1.5, %v944_v52  ;;  %v4425_v56 = vsub.f32 %v4199_v17, %v405_v55 }
 0x2e3   :  { %v4413_v10 = vpop.eup %3039  ;;  %v1781_v18 = vsel %vm1698_vm7, %v1605_v21, %v1740_v5  ;;  %v4415_v31 = vadd.f32 1e-05, %v645_v36  ;;  %v4422_v9 = vsub.f32 %v4204_v30, %v407_v42  ;;  %v1496_v30 = vpack.c.bf16 %v1463_v4, %v1462_v28 }
 0x2e4   :  { %v4417_v43 = vpop.eup %3041  ;;  %v952_v1 = vmul.f32 %v4413_v10, %v4374_v40  ;;  %1822 = vst [vmem:[#allocation2 + $0x38] sm:$0xff] %v1781_v18  ;;  %2702 = vmatmul.msk.bf16.gmra.mxu0 %vm241_vm0, %v1163_v11  ;;  %v487_v62 = vmul.f32 %v4425_v56, %v4425_v56  ;;  %v946_v61 = vmul.f32 %v4378_v33, %v945_v14  ;;  %vm958_vm11 = vweird.f32 %v4413_v10 }
 0x2e5   :  { %v972_v47 = vmul.f32 %v4417_v43, %v4386_v50  ;;  %3043 = vrsqrt.f32 %v4415_v31  ;;  %v489_v17 = vmul.f32 %v4422_v9, %v4422_v9  ;;  %1621 = vmatmul.bf16.gmra.mxu1 %v1496_v30  ;;  %vm4466_vm14 = vmor %vm957_vm12, %vm958_vm11  ;;  %vm978_vm5 = vweird.f32 %v4417_v43 }
 0x2e6   :  { %v953_v24 = vmul.f32 %v4413_v10, %v952_v1  ;;  %v592_v7 = vsel %vm241_vm0, %v487_v62, 0.0  ;;  %v950_v58 = vsel %vm4443_vm10, %v4378_v33, %v946_v61  ;;  %v4493_v61 = vld [vmem:[#allocation8] ss:$0 sm:$0xff]  ;;  %vm4526_vm7 = vmor %vm977_vm4, %vm978_vm5  ;;  %vm967_vm8 = vweird.f32 %v4415_v31 }
 0x2e7   :  { %v1298_v38 = vpop.f32.mrf.mxu0  ;;  %v598_v51 = vsel %vm241_vm0, %v489_v17, 0.0  ;;  %v973_v16 = vmul.f32 %v4417_v43, %v972_v47  ;;  %v1607_v41 = vpop.f32.mrf.mxu1  ;;  %593 = vadd.xlane.f32.xlu0 %v592_v7  ;;  %v1135_v17 = vmul.f32 %v950_v58, %v4105_v22  ;;  %v4505_v22 = vld [vmem:[%s5117_s19 + $0x140] sm:$0xf] }
 0x2e8   :  { %v954_v49 = vmul.f32 0.5, %v953_v24  ;;  %v343_v32 = vpop.xlane.xlu1 %342  ;;  %599 = vadd.xlane.f32.xlu2 %v598_v51  ;;  %v585_v8 = vpop.xlane.xlu2 %584  ;;  %v1608_v21 = vadd.f32 %v4102_v37, %v1607_v41  ;;  %v1299_v6 = vadd.f32 %v4396_v25, %v1298_v38 }
 0x2e9   :  { %v406_v44 = vmul.f32 %v3488_v20, %v343_v32  ;;  %v648_v35 = vmul.f32 %v585_v8, %v3488_v20  ;;  %v349_v59 = vpop.xlane.xlu0 %348  ;;  %v974_v53 = vmul.f32 0.5, %v973_v16 }
 0x2ea   :  { %v955_v2 = vsub.f32 1.5, %v954_v49  ;;  %v408_v27 = vmul.f32 %v3488_v20, %v349_v59  ;;  %vm1699_vm13 = vcmp.ge.f32.partialorder %v1608_v21, 0.0  ;;  %v1423_v49 = vmul.f32 %v4493_v61, %v1299_v6 }
 0x2eb   :  { %v4453_v13 = vpop.eup %3043  ;;  %v4457_v48 = vsub.f32 %v4232_v45, %v406_v44  ;;  %v1741_v45 = vmul.f32 %v4112_v54, %v1608_v21  ;;  %v4471_v40 = vadd.f32 1e-05, %v648_v35  ;;  %v975_v62 = vsub.f32 1.5, %v974_v53 }
 0x2ec   :  { %v956_v52 = vmul.f32 %v4413_v10, %v955_v2  ;;  %v962_v5 = vmul.f32 %v4453_v13, %v4415_v31  ;;  %v4474_v15 = vsub.f32 %v4249_v3, %v408_v27  ;;  %vm1378_vm2 = vcmp.ge.f32.partialorder %v1299_v6, 0.0 }
 0x2ed   :  { %v488_v55 = vmul.f32 %v4457_v48, %v4457_v48  ;;  %v1782_v11 = vsel %vm1699_vm13, %v1608_v21, %v1741_v45  ;;  %3045 = vrsqrt.f32 %v4471_v40  ;;  %v363_v21 = vsel %vm362_vm15, %v4505_v22, 0.0 }
 0x2ee   :  { %v960_v33 = vsel %vm4466_vm14, %v4413_v10, %v956_v52  ;;  %v963_v42 = vmul.f32 %v4453_v13, %v962_v5  ;;  %1823 = vst [vmem:[#allocation2 + $0x40] sm:$0xff] %v1782_v11  ;;  %v490_v1 = vmul.f32 %v4474_v15, %v4474_v15  ;;  %v1464_v59 = vsel %vm1378_vm2, %v1299_v6, %v1423_v49 }
 0x2ef   :  { %v1300_v4 = vpop.f32.mrf.mxu0  ;;  %v595_v14 = vsel %vm241_vm0, %v488_v55, 0.0  ;;  %v1136_v10 = vmul.f32 %v960_v33, %v4137_v26  ;;  %v1609_v28 = vpop.f32.mrf.mxu1  ;;  %v976_v58 = vmul.f32 %v4417_v43, %v975_v62  ;;  %vm968_vm6 = vweird.f32 %v4453_v13 }
 0x2f0   :  { %v964_v18 = vmul.f32 0.5, %v963_v42  ;;  %v582_v3 = vpop.xlane.xlu1 %581  ;;  %v1301_v47 = vadd.f32 %v4396_v25, %v1300_v4  ;;  %v4489_v24 = vpop.xlane.xlu2 %587  ;;  %596 = vadd.xlane.f32.xlu1 %v595_v14  ;;  %v1610_v38 = vadd.f32 %v4102_v37, %v1609_v28  ;;  %v601_v26 = vsel %vm241_vm0, %v490_v1, 0.0  ;;  %vm969_vm9 = vmor %vm967_vm8, %vm968_vm6 }
 0x2f1   :  { %v647_v30 = vmul.f32 %v582_v3, %v3488_v20  ;;  %v352_v51 = vpop.xlane.xlu0 %351  ;;  %602 = vadd.xlane.f32.xlu0 %v601_v26  ;;  %v1164_v41 = vpack.c.bf16 %v1136_v10, %v1135_v17  ;;  %v980_v31 = vsel %vm4526_vm7, %v4417_v43, %v976_v58  ;;  %vm997_vm2 = vweird.f32 %v4471_v40 }
 0x2f2   :  { %v1424_v32 = vmul.f32 %v4493_v61, %v1301_v47  ;;  %v409_v16 = vmul.f32 %v3488_v20, %v352_v51  ;;  %v965_v8 = vsub.f32 1.5, %v964_v18  ;;  %vm1700_vm1 = vcmp.ge.f32.partialorder %v1610_v38, 0.0 }
 0x2f3   :  { %v4499_v23 = vadd.f32 1e-05, %v647_v30  ;;  %v1742_v44 = vmul.f32 %v4112_v54, %v1610_v38  ;;  %vm1379_vm3 = vcmp.ge.f32.partialorder %v1301_v47, 0.0  ;;  %v4517_v35 = vpop.eup %3045  ;;  %v1138_v51 = vmul.f32 %v980_v31, %v4156_v39 }
 0x2f4   :  { %v4510_v7 = vsub.f32 %v4291_v63, %v409_v16  ;;  %2703 = vmatmul.msk.bf16.gmra.mxu0 %vm241_vm0, %v1164_v41  ;;  %v1465_v27 = vsel %vm1379_vm3, %v1301_v47, %v1424_v32  ;;  %v966_v52 = vmul.f32 %v4453_v13, %v965_v8  ;;  %v992_v11 = vmul.f32 %v4517_v35, %v4471_v40 }
 0x2f5   :  { %3047 = vrsqrt.f32 %v4499_v23  ;;  %v1783_v2 = vsel %vm1700_vm1, %v1610_v38, %v1742_v44  ;;  %v1497_v53 = vpack.c.bf16 %v1465_v27, %v1464_v59  ;;  %vm987_vm14 = vweird.f32 %v4499_v23 }
 0x2f6   :  { %1824 = vst [vmem:[#allocation2 + $0x48] sm:$0xff] %v1783_v2  ;;  %v491_v63 = vmul.f32 %v4510_v7, %v4510_v7  ;;  %v970_v3 = vsel %vm969_vm9, %v4453_v13, %v966_v52  ;;  %v993_v30 = vmul.f32 %v4517_v35, %v992_v11  ;;  %vm998_vm3 = vweird.f32 %v4517_v35 }
 0x2f7   :  { %v1303_v5 = vpop.f32.mrf.mxu0  ;;  %v1612_v33 = vpop.f32.mrf.mxu1  ;;  %1626 = vmatmul.bf16.gmra.mxu1 %v1497_v53  ;;  %v1137_v49 = vmul.f32 %v970_v3, %v4192_v57  ;;  %vm999_vm5 = vmor %vm997_vm2, %vm998_vm3 }
 0x2f8   :  { %v355_v36 = vpop.xlane.xlu1 %354  ;;  %v361_v42 = vpop.xlane.xlu2 %360  ;;  %364 = vadd.xlane.f32.xlu1 %v363_v21  ;;  %v604_v55 = vsel %vm241_vm0, %v491_v63, 0.0  ;;  %v1613_v18 = vadd.f32 %v4102_v37, %v1612_v33  ;;  %v1304_v10 = vadd.f32 %v4396_v25, %v1303_v5  ;;  %v994_v2 = vmul.f32 0.5, %v993_v30 }
 0x2f9   :  { %v410_v6 = vmul.f32 %v3488_v20, %v355_v36  ;;  %v412_v50 = vmul.f32 %v3488_v20, %v361_v42  ;;  %605 = vadd.xlane.f32.xlu2 %v604_v55  ;;  %v1165_v39 = vpack.c.bf16 %v1138_v51, %v1137_v49 }
 0x2fa   :  { %vm1701_vm10 = vcmp.ge.f32.partialorder %v1613_v18, 0.0  ;;  %v1743_v47 = vmul.f32 %v4112_v54, %v1613_v18  ;;  %v1425_v32 = vmul.f32 %v4493_v61, %v1304_v10  ;;  %vm1380_vm11 = vcmp.ge.f32.partialorder %v1304_v10, 0.0 }
 0x2fb   :  { %v4537_v4 = vpop.eup %3047  ;;  %v4542_v14 = vsub.f32 %v4318_v12, %v410_v6  ;;  %v4553_v28 = vsub.f32 %v4324_v34, %v412_v50  ;;  %v995_v53 = vsub.f32 1.5, %v994_v2 }
 0x2fc   :  { %v982_v1 = vmul.f32 %v4537_v4, %v4499_v23  ;;  %v1784_v17 = vsel %vm1701_vm10, %v1613_v18, %v1743_v47  ;;  %v1466_v58 = vsel %vm1380_vm11, %v1304_v10, %v1425_v32  ;;  %vm988_vm1 = vweird.f32 %v4537_v4 }
 0x2fd   :  { %v492_v12 = vmul.f32 %v4542_v14, %v4542_v14  ;;  %v494_v62 = vmul.f32 %v4553_v28, %v4553_v28  ;;  %1825 = vst [vmem:[#allocation2 + $0x50] sm:$0xff] %v1784_v17  ;;  %vm989_vm4 = vmor %vm987_vm14, %vm988_vm1  ;;  %v996_v55 = vmul.f32 %v4517_v35, %v995_v53 }
 0x2fe   :  { %v983_v43 = vmul.f32 %v4537_v4, %v982_v1 }
 0x2ff   :  { %v607_v13 = vsel %vm241_vm0, %v492_v12, 0.0  ;;  %v1305_v26 = vpop.f32.mrf.mxu0  ;;  %v1614_v41 = vpop.f32.mrf.mxu1  ;;  %v613_v44 = vsel %vm241_vm0, %v494_v62, 0.0  ;;  %v1000_v31 = vsel %vm999_vm5, %v4517_v35, %v996_v55 }
 0x300   :  { %v984_v38 = vmul.f32 0.5, %v983_v43  ;;  %v358_v34 = vpop.xlane.xlu1 %357  ;;  %608 = vadd.xlane.f32.xlu0 %v607_v13  ;;  %v1306_v16 = vadd.f32 %v4396_v25, %v1305_v26  ;;  %v1615_v21 = vadd.f32 %v4102_v37, %v1614_v41  ;;  %v1140_v30 = vmul.f32 %v1000_v31, %v4258_v29 }
 0x301   :  { %v411_v8 = vmul.f32 %v3488_v20, %v358_v34  ;;  %614 = vadd.xlane.f32.xlu2 %v613_v44  ;;  %v649_v29 = vmul.f32 %v4489_v24, %v3488_v20 }
 0x302   :  { %v1426_v57 = vmul.f32 %v4493_v61, %v1306_v16  ;;  %vm1381_vm12 = vcmp.ge.f32.partialorder %v1306_v16, 0.0  ;;  %v985_v27 = vsub.f32 1.5, %v984_v38  ;;  %vm1702_vm13 = vcmp.ge.f32.partialorder %v1615_v21, 0.0 }
 0x303   :  { %v4571_v59 = vsub.f32 %v4352_v46, %v411_v8  ;;  %v1744_v63 = vmul.f32 %v4112_v54, %v1615_v21 }
 0x304   :  { %2704 = vmatmul.msk.bf16.gmra.mxu0 %vm241_vm0, %v1165_v39  ;;  %v1467_v52 = vsel %vm1381_vm12, %v1306_v16, %v1426_v57  ;;  %v986_v33 = vmul.f32 %v4537_v4, %v985_v27 }
 0x305   :  { %v493_v5 = vmul.f32 %v4571_v59, %v4571_v59  ;;  %v1785_v46 = vsel %vm1702_vm13, %v1615_v21, %v1744_v63  ;;  %v1498_v36 = vpack.c.bf16 %v1467_v52, %v1466_v58 }
 0x306   :  { %1826 = vst [vmem:[#allocation2 + $0x58] sm:$0xff] %v1785_v46  ;;  %v990_v18 = vsel %vm989_vm4, %v4537_v4, %v986_v33 }
 0x307   :  { %v610_v45 = vsel %vm241_vm0, %v493_v5, 0.0  ;;  %v1308_v42 = vpop.f32.mrf.mxu0  ;;  %v1617_v6 = vpop.f32.mrf.mxu1  ;;  %1631 = vmatmul.bf16.gmra.mxu1 %v1498_v36  ;;  %v1139_v23 = vmul.f32 %v990_v18, %v4262_v60 }
 0x308   :  { %611 = vadd.xlane.f32.xlu1 %v610_v45  ;;  %v1618_v11 = vadd.f32 %v4102_v37, %v1617_v6  ;;  %v1309_v50 = vadd.f32 %v4396_v25, %v1308_v42  ;;  %v4615_v42 = vld [vmem:[#allocation12] ss:$0 sm:$0xff] }
 0x309   :  { %v1166_v17 = vpack.c.bf16 %v1140_v30, %v1139_v23 }
 0x30a   :  { %vm1703_vm6 = vcmp.ge.f32.partialorder %v1618_v11, 0.0  ;;  %v1745_v40 = vmul.f32 %v4112_v54, %v1618_v11  ;;  %v1427_v10 = vmul.f32 %v4493_v61, %v1309_v50  ;;  %vm1382_vm7 = vcmp.ge.f32.partialorder %v1309_v50, 0.0 }
 0x30c   :  { %v1786_v3 = vsel %vm1703_vm6, %v1618_v11, %v1745_v40  ;;  %v1468_v60 = vsel %vm1382_vm7, %v1309_v50, %v1427_v10 }
 0x30d   :  { %1827 = vst [vmem:[#allocation2 + $0x60] sm:$0xff] %v1786_v3 }
 0x30f   :  { %v1310_v1 = vpop.f32.mrf.mxu0  ;;  %v1619_v12 = vpop.f32.mrf.mxu1 }
 0x310   :  { %v1311_v47 = vadd.f32 %v4396_v25, %v1310_v1  ;;  %v1620_v4 = vadd.f32 %v4102_v37, %v1619_v12  ;;  %v690_v37 = vadd.f32 1e-05, %v649_v29 }
 0x312   :  { %v1428_v43 = vmul.f32 %v4493_v61, %v1311_v47  ;;  %vm1383_vm8 = vcmp.ge.f32.partialorder %v1311_v47, 0.0  ;;  %vm1704_vm9 = vcmp.ge.f32.partialorder %v1620_v4, 0.0  ;;  %v1746_v35 = vmul.f32 %v4112_v54, %v1620_v4 }
 0x313   :  { %3049 = vrsqrt.f32 %v690_v37  ;;  %vm1007_vm10 = vweird.f32 %v690_v37 }
 0x314   :  { %2705 = vmatmul.msk.bf16.gmra.mxu0 %vm241_vm0, %v1166_v17  ;;  %v1469_v13 = vsel %vm1383_vm8, %v1311_v47, %v1428_v43  ;;  %v1787_v62 = vsel %vm1704_vm9, %v1620_v4, %v1746_v35 }
 0x315   :  { %v1499_v49 = vpack.c.bf16 %v1469_v13, %v1468_v60  ;;  %1828 = vst [vmem:[#allocation2 + $0x68] sm:$0xff] %v1787_v62 }
 0x317   :  { %1636 = vmatmul.bf16.gmra.mxu1 %v1499_v49 }
 0x319   :  { %v3050_v38 = vpop.eup %3049 }
 0x31a   :  { %v1002_v26 = vmul.f32 %v3050_v38, %v690_v37  ;;  %vm1008_vm11 = vweird.f32 %v3050_v38 }
 0x31b   :  { %vm4610_vm12 = vmor %vm1007_vm10, %vm1008_vm11 }
 0x31c   :  { %v1003_v51 = vmul.f32 %v3050_v38, %v1002_v26 }
 0x31e   :  { %v1004_v41 = vmul.f32 0.5, %v1003_v51 }
 0x320   :  { %v1005_v21 = vsub.f32 1.5, %v1004_v41 }
 0x322   :  { %v1006_v52 = vmul.f32 %v3050_v38, %v1005_v21 }
 0x324   :  { %v1010_v18 = vsel %vm4610_vm12, %v3050_v38, %v1006_v52 }
 0x325   :  { %v1141_v17 = vmul.f32 %v1010_v18, %v4294_v19 }
 0x352   :  { %v591_v34 = vpop.xlane.xlu0 %590 }
 0x353   :  { %v650_v32 = vmul.f32 %v591_v34, %v3488_v20 }
 0x355   :  { %v691_v16 = vadd.f32 1e-05, %v650_v32 }
 0x357   :  { %3051 = vrsqrt.f32 %v691_v16  ;;  %vm1017_vm13 = vweird.f32 %v691_v16 }
 0x35a   :  { %v594_v2 = vpop.xlane.xlu0 %593 }
 0x35b   :  { %v600_v8 = vpop.xlane.xlu2 %599  ;;  %v651_v24 = vmul.f32 %v594_v2, %v3488_v20 }
 0x35c   :  { %v653_v44 = vmul.f32 %v600_v8, %v3488_v20 }
 0x35d   :  { %v3052_v39 = vpop.eup %3051  ;;  %v4607_v27 = vadd.f32 1e-05, %v651_v24 }
 0x35e   :  { %v4603_v57 = vadd.f32 1e-05, %v653_v44  ;;  %v1012_v58 = vmul.f32 %v3052_v39, %v691_v16  ;;  %vm1018_vm14 = vweird.f32 %v3052_v39 }
 0x35f   :  { %vm4630_vm2 = vmor %vm1017_vm13, %vm1018_vm14  ;;  %vm1027_vm7 = vweird.f32 %v4607_v27 }
 0x360   :  { %3053 = vrsqrt.f32 %v4603_v57  ;;  %v1013_v53 = vmul.f32 %v3052_v39, %v1012_v58  ;;  %vm1047_vm6 = vweird.f32 %v4603_v57 }
 0x361   :  { %v1313_v63 = vpop.f32.mrf.mxu0  ;;  %3055 = vrsqrt.f32 %v4607_v27 }
 0x362   :  { %v1622_v36 = vpop.f32.mrf.mxu1  ;;  %v1014_v33 = vmul.f32 0.5, %v1013_v53  ;;  %v1314_v23 = vadd.f32 %v4396_v25, %v1313_v63 }
 0x363   :  { %v597_v46 = vpop.xlane.xlu1 %596  ;;  %v1623_v6 = vadd.f32 %v4615_v42, %v1622_v36 }
 0x364   :  { %v652_v45 = vmul.f32 %v597_v46, %v3488_v20  ;;  %v603_v55 = vpop.xlane.xlu0 %602  ;;  %v1015_v31 = vsub.f32 1.5, %v1014_v33  ;;  %v1429_v29 = vmul.f32 %v4493_v61, %v1314_v23  ;;  %vm1384_vm3 = vcmp.ge.f32.partialorder %v1314_v23, 0.0 }
 0x365   :  { %v654_v50 = vmul.f32 %v603_v55, %v3488_v20  ;;  %vm1705_vm1 = vcmp.ge.f32.partialorder %v1623_v6, 0.0  ;;  %v1747_v47 = vmul.f32 %v4112_v54, %v1623_v6 }
 0x366   :  { %v4618_v11 = vpop.eup %3053  ;;  %v4622_v40 = vadd.f32 1e-05, %v652_v45  ;;  %v1016_v4 = vmul.f32 %v3052_v39, %v1015_v31 }
 0x367   :  { %v1042_v3 = vmul.f32 %v4618_v11, %v4603_v57  ;;  %v4628_v1 = vpop.eup %3055  ;;  %v4636_v12 = vadd.f32 1e-05, %v654_v50  ;;  %v1788_v60 = vsel %vm1705_vm1, %v1623_v6, %v1747_v47  ;;  %vm1048_vm9 = vweird.f32 %v4618_v11 }
 0x368   :  { %3057 = vrsqrt.f32 %v4622_v40  ;;  %v1022_v43 = vmul.f32 %v4628_v1, %v4607_v27  ;;  %v1020_v62 = vsel %vm4630_vm2, %v3052_v39, %v1016_v4  ;;  %1829 = vst [vmem:[#allocation2 + $0x70] sm:$0xff] %v1788_v60  ;;  %vm1028_vm8 = vweird.f32 %v4628_v1  ;;  %vm4701_vm14 = vmor %vm1047_vm6, %vm1048_vm9 }
 0x369   :  { %v1315_v30 = vpop.f32.mrf.mxu0  ;;  %v1043_v35 = vmul.f32 %v4618_v11, %v1042_v3  ;;  %3059 = vrsqrt.f32 %v4636_v12  ;;  %v1142_v51 = vmul.f32 %v1020_v62, %v4389_v0  ;;  %v1470_v0 = vsel %vm1384_vm3, %v1314_v23, %v1429_v29  ;;  %vm4686_vm12 = vmor %vm1027_vm7, %vm1028_vm8 }
 0x36a   :  { %v1316_v13 = vadd.f32 %v4396_v25, %v1315_v30  ;;  %v1023_v49 = vmul.f32 %v4628_v1, %v1022_v43  ;;  %v1624_v19 = vpop.f32.mrf.mxu1  ;;  %vm1057_vm11 = vweird.f32 %v4636_v12 }
 0x36b   :  { %v365_v37 = vpop.xlane.xlu1 %364  ;;  %v1625_v16 = vadd.f32 %v4615_v42, %v1624_v19  ;;  %v1044_v44 = vmul.f32 0.5, %v1043_v35  ;;  %v1167_v2 = vpack.c.bf16 %v1142_v51, %v1141_v17 }
 0x36c   :  { %v1430_v38 = vmul.f32 %v4493_v61, %v1316_v13  ;;  %v413_v26 = vmul.f32 %v3488_v20, %v365_v37  ;;  %v606_v34 = vpop.xlane.xlu2 %605  ;;  %vm1385_vm4 = vcmp.ge.f32.partialorder %v1316_v13, 0.0  ;;  %v1024_v32 = vmul.f32 0.5, %v1023_v49 }
 0x36d   :  { %v655_v41 = vmul.f32 %v606_v34, %v3488_v20  ;;  %vm1706_vm5 = vcmp.ge.f32.partialorder %v1625_v16, 0.0  ;;  %v1748_v52 = vmul.f32 %v4112_v54, %v1625_v16  ;;  %2706 = vmatmul.msk.bf16.gmra.mxu0 %vm241_vm0, %v1167_v2  ;;  %v1045_v45 = vsub.f32 1.5, %v1044_v44 }
 0x36e   :  { %v4653_v8 = vpop.eup %3057  ;;  %v1471_v21 = vsel %vm1385_vm4, %v1316_v13, %v1430_v38  ;;  %v1025_v24 = vsub.f32 1.5, %v1024_v32  ;;  %v4658_v63 = vsub.f32 %v4505_v22, %v413_v26 }
 0x36f   :  { %v1032_v39 = vmul.f32 %v4653_v8, %v4622_v40  ;;  %v4661_v58 = vpop.eup %3059  ;;  %v4664_v5 = vadd.f32 1e-05, %v655_v41  ;;  %v1500_v53 = vpack.c.bf16 %v1471_v21, %v1470_v0  ;;  %v1789_v33 = vsel %vm1706_vm5, %v1625_v16, %v1748_v52 }
 0x370   :  { %v1052_v22 = vmul.f32 %v4661_v58, %v4636_v12  ;;  %1830 = vst [vmem:[#allocation2 + $0x78] sm:$0xff] %v1789_v33  ;;  %v495_v50 = vmul.f32 %v4658_v63, %v4658_v63  ;;  %v1026_v31 = vmul.f32 %v4628_v1, %v1025_v24  ;;  %vm1038_vm10 = vweird.f32 %v4653_v8 }
 0x371   :  { %v1033_v46 = vmul.f32 %v4653_v8, %v1032_v39  ;;  %v1318_v36 = vpop.f32.mrf.mxu0  ;;  %3061 = vrsqrt.f32 %v4664_v5  ;;  %1641 = vmatmul.bf16.gmra.mxu1 %v1500_v53  ;;  %v1046_v17 = vmul.f32 %v4618_v11, %v1045_v45  ;;  %vm1058_vm13 = vweird.f32 %v4661_v58 }
 0x372   :  { %v1053_v18 = vmul.f32 %v4661_v58, %v1052_v22  ;;  %v1319_v4 = vadd.f32 %v4396_v25, %v1318_v36  ;;  %v616_v43 = vsel %vm362_vm15, %v495_v50, 0.0  ;;  %vm1037_vm15 = vweird.f32 %v4622_v40  ;;  %vm4728_vm2 = vmor %vm1057_vm11, %vm1058_vm13 }
 0x373   :  { %v609_v6 = vpop.xlane.xlu0 %608  ;;  %v1034_v55 = vmul.f32 0.5, %v1033_v46  ;;  %617 = vadd.xlane.f32.xlu0 %v616_v43  ;;  %v1030_v38 = vsel %vm4686_vm12, %v4628_v1, %v1026_v31  ;;  %vm4715_vm1 = vmor %vm1037_vm15, %vm1038_vm10  ;;  %v1050_v41 = vsel %vm4701_vm14, %v4618_v11, %v1046_v17  ;;  %vm1067_vm6 = vweird.f32 %v4664_v5 }
 0x374   :  { %v615_v3 = vpop.xlane.xlu2 %614  ;;  %v656_v23 = vmul.f32 %v609_v6, %v3488_v20  ;;  %v1054_v30 = vmul.f32 0.5, %v1053_v18  ;;  %v1627_v35 = vpop.f32.mrf.mxu1  ;;  %vm1386_vm3 = vcmp.ge.f32.partialorder %v1319_v4, 0.0  ;;  %v1431_v21 = vmul.f32 %v4493_v61, %v1319_v4 }
 0x375   :  { %v1035_v47 = vsub.f32 1.5, %v1034_v55  ;;  %v658_v60 = vmul.f32 %v615_v3, %v3488_v20  ;;  %v1628_v29 = vadd.f32 %v4615_v42, %v1627_v35  ;;  %v1143_v39 = vmul.f32 %v1030_v38, %v4425_v56 }
 0x376   :  { %v4695_v13 = vadd.f32 1e-05, %v656_v23  ;;  %v1055_v49 = vsub.f32 1.5, %v1054_v30  ;;  %v1145_v36 = vmul.f32 %v1050_v41, %v4422_v9  ;;  %v1472_v31 = vsel %vm1386_vm3, %v1319_v4, %v1431_v21 }
 0x377   :  { %v1036_v62 = vmul.f32 %v4653_v8, %v1035_v47  ;;  %v4708_v37 = vpop.eup %3061  ;;  %vm1707_vm4 = vcmp.ge.f32.partialorder %v1628_v29, 0.0  ;;  %v1749_v51 = vmul.f32 %v4112_v54, %v1628_v29  ;;  %v4735_v32 = vadd.f32 1e-05, %v658_v60 }
 0x378   :  { %3063 = vrsqrt.f32 %v4695_v13  ;;  %v1056_v19 = vmul.f32 %v4661_v58, %v1055_v49  ;;  %v1062_v26 = vmul.f32 %v4708_v37, %v4664_v5  ;;  %vm1068_vm7 = vweird.f32 %v4708_v37 }
 0x379   :  { %v1040_v40 = vsel %vm4715_vm1, %v4653_v8, %v1036_v62  ;;  %v1320_v34 = vpop.f32.mrf.mxu0  ;;  %v1790_v24 = vsel %vm1707_vm4, %v1628_v29, %v1749_v51  ;;  %3065 = vrsqrt.f32 %v4735_v32  ;;  %vm1077_vm9 = vweird.f32 %v4695_v13  ;;  %vm4770_vm11 = vmor %vm1067_vm6, %vm1068_vm7 }
 0x37a   :  { %v1063_v12 = vmul.f32 %v4708_v37, %v1062_v26  ;;  %v1321_v8 = vadd.f32 %v4396_v25, %v1320_v34  ;;  %v1144_v2 = vmul.f32 %v1040_v40, %v4457_v48  ;;  %v1060_v0 = vsel %vm4728_vm2, %v4661_v58, %v1056_v19  ;;  %1831 = vst [vmem:[#allocation2 + $0x80] sm:$0xff] %v1790_v24 }
 0x37b   :  { %v612_v16 = vpop.xlane.xlu1 %611  ;;  %v1146_v56 = vmul.f32 %v1060_v0, %v4474_v15  ;;  %vm1097_vm4 = vweird.f32 %v4735_v32 }
 0x37c   :  { %v657_v44 = vmul.f32 %v612_v16, %v3488_v20  ;;  %v1064_v52 = vmul.f32 0.5, %v1063_v12  ;;  %vm1387_vm5 = vcmp.ge.f32.partialorder %v1321_v8, 0.0  ;;  %v1432_v11 = vmul.f32 %v4493_v61, %v1321_v8  ;;  %v1629_v48 = vpop.f32.mrf.mxu1 }
 0x37d   :  { %v1168_v22 = vpack.c.bf16 %v1144_v2, %v1143_v39  ;;  %v1630_v58 = vadd.f32 %v4615_v42, %v1629_v48  ;;  %v1169_v33 = vpack.c.bf16 %v1146_v56, %v1145_v36 }
 0x37e   :  { %v4750_v53 = vadd.f32 1e-05, %v657_v44  ;;  %v3064_v46 = vpop.eup %3063  ;;  %v1473_v6 = vsel %vm1387_vm5, %v1321_v8, %v1432_v11  ;;  %v1065_v55 = vsub.f32 1.5, %v1064_v52 }
 0x37f   :  { %v1072_v45 = vmul.f32 %v3064_v46, %v4695_v13  ;;  %2707 = vmatmul.msk.bf16.gmra.mxu0 %vm241_vm0, %v1168_v22  ;;  %vm1708_vm8 = vcmp.ge.f32.partialorder %v1630_v58, 0.0  ;;  %v1750_v9 = vmul.f32 %v4112_v54, %v1630_v58  ;;  %2708 = vmatmul.msk.bf16.vlgmr.msra.gmra.mxu2 %vm241_vm0, %v1169_v33  ;;  %v1501_v15 = vpack.c.bf16 %v1473_v6, %v1472_v31  ;;  %v4765_v23 = vpop.eup %3065 }
 0x380   :  { %3067 = vrsqrt.f32 %v4750_v53  ;;  %vm1078_vm10 = vweird.f32 %v3064_v46  ;;  %v1066_v47 = vmul.f32 %v4708_v37, %v1065_v55  ;;  %v1092_v35 = vmul.f32 %v4765_v23, %v4735_v32 }
 0x381   :  { %v1073_v18 = vmul.f32 %v3064_v46, %v1072_v45  ;;  %v1323_v50 = vpop.f32.mrf.mxu0  ;;  %v1791_v10 = vsel %vm1708_vm8, %v1630_v58, %v1750_v9  ;;  %1646 = vmatmul.bf16.gmra.mxu1 %v1501_v15  ;;  %vm1079_vm12 = vmor %vm1077_vm9, %vm1078_vm10  ;;  %vm1087_vm2 = vweird.f32 %v4750_v53  ;;  %vm1098_vm5 = vweird.f32 %v4765_v23 }
 0x382   :  { %1832 = vst [vmem:[#allocation2 + $0x88] sm:$0xff] %v1791_v10  ;;  %v1324_v27 = vadd.f32 %v4396_v25, %v1323_v50  ;;  %v1070_v29 = vsel %vm4770_vm11, %v4708_v37, %v1066_v47  ;;  %v1093_v1 = vmul.f32 %v4765_v23, %v1092_v35  ;;  %vm1099_vm7 = vmor %vm1097_vm4, %vm1098_vm5  ;;  %v2918_v35 = vld [vmem:[%s5095_s8 + $0x18] sm:$0xff] }
 0x383   :  { %v1074_v3 = vmul.f32 0.5, %v1073_v18  ;;  %v1147_v16 = vmul.f32 %v1070_v29, %v4510_v7 }
 0x384   :  { %v1632_v17 = vpop.f32.mrf.mxu1  ;;  %vm1388_vm14 = vcmp.ge.f32.partialorder %v1324_v27, 0.0  ;;  %v1433_v26 = vmul.f32 %v4493_v61, %v1324_v27  ;;  %v1094_v44 = vmul.f32 0.5, %v1093_v1 }
 0x385   :  { %v1075_v4 = vsub.f32 1.5, %v1074_v3  ;;  %v1633_v5 = vadd.f32 %v4615_v42, %v1632_v17  ;;  %v2919_v17 = vld [vmem:[%s5095_s8 + $0x20] sm:$0xff] }
 0x386   :  { %v4774_v43 = vpop.eup %3067  ;;  %v1095_v52 = vsub.f32 1.5, %v1094_v44 }
 0x387   :  { %v1076_v60 = vmul.f32 %v3064_v46, %v1075_v4  ;;  %v1082_v13 = vmul.f32 %v4774_v43, %v4750_v53  ;;  %vm1709_vm13 = vcmp.ge.f32.partialorder %v1633_v5, 0.0  ;;  %v1751_v57 = vmul.f32 %v4112_v54, %v1633_v5 }
 0x388   :  { %vm1088_vm3 = vweird.f32 %v4774_v43  ;;  %v1096_v22 = vmul.f32 %v4765_v23, %v1095_v52 }
 0x389   :  { %v1083_v62 = vmul.f32 %v4774_v43, %v1082_v13  ;;  %v1325_v49 = vpop.f32.mrf.mxu0  ;;  %v1080_v38 = vsel %vm1079_vm12, %v3064_v46, %v1076_v60  ;;  %v1792_v34 = vsel %vm1709_vm13, %v1633_v5, %v1751_v57  ;;  %vm4801_vm6 = vmor %vm1087_vm2, %vm1088_vm3 }
 0x38a   :  { %v1326_v40 = vadd.f32 %v4396_v25, %v1325_v49  ;;  %v1148_v19 = vmul.f32 %v1080_v38, %v4542_v14  ;;  %1833 = vst [vmem:[#allocation2 + $0x90] sm:$0xff] %v1792_v34  ;;  %v1474_v14 = vsel %vm1388_vm14, %v1324_v27, %v1433_v26  ;;  %v1100_v55 = vsel %vm1099_vm7, %v4765_v23, %v1096_v22  ;;  %v2916_v38 = vld [vmem:[%s5095_s8 + $0x8] sm:$0xff] }
 0x38b   :  { %v1084_v37 = vmul.f32 0.5, %v1083_v62  ;;  %v1150_v9 = vmul.f32 %v1100_v55, %v4553_v28  ;;  %v2921_v28 = vld [vmem:[%s5095_s8 + $0x30] sm:$0xff]  ;;  %v1886_v55 = vld [vmem:[#allocation2 + $0x19] ss:$3 sm:$0xff] }
 0x38c   :  { %vm1389_vm15 = vcmp.ge.f32.partialorder %v1326_v40, 0.0  ;;  %v1434_v51 = vmul.f32 %v4493_v61, %v1326_v40  ;;  %v1634_v41 = vpop.f32.mrf.mxu1  ;;  %v1170_v12 = vpack.c.bf16 %v1148_v19, %v1147_v16  ;;  %v2917_v62 = vld [vmem:[%s5095_s8 + $0x10] sm:$0xff] }
 0x38d   :  { %v1635_v2 = vadd.f32 %v4615_v42, %v1634_v41  ;;  %v1085_v24 = vsub.f32 1.5, %v1084_v37  ;;  %v2915_v37 = vld [vmem:[%s5095_s8] sm:$0xff] }
 0x38e   :  { %v1475_v8 = vsel %vm1389_vm15, %v1326_v40, %v1434_v51  ;;  %v4847_v51 = vld [vmem:[#allocation11] ss:$0 sm:$0xff] }
 0x38f   :  { %v1502_v21 = vpack.c.bf16 %v1475_v8, %v1474_v14  ;;  %vm1710_vm1 = vcmp.ge.f32.partialorder %v1635_v2, 0.0  ;;  %v1752_v39 = vmul.f32 %v4112_v54, %v1635_v2  ;;  %2709 = vmatmul.msk.bf16.gmra.mxu2 %vm241_vm0, %v1170_v12  ;;  %v1086_v11 = vmul.f32 %v4774_v43, %v1085_v24 }
 0x391   :  { %v1328_v0 = vpop.f32.mrf.mxu0  ;;  %v1793_v7 = vsel %vm1710_vm1, %v1635_v2, %v1752_v39  ;;  %1651 = vmatmul.bf16.gmra.mxu1 %v1502_v21  ;;  %v1090_v45 = vsel %vm4801_vm6, %v4774_v43, %v1086_v11  ;;  %v2920_v43 = vld [vmem:[%s5095_s8 + $0x28] sm:$0xff] }
 0x392   :  { %1834 = vst [vmem:[#allocation2 + $0x98] sm:$0xff] %v1793_v7  ;;  %v1329_v53 = vadd.f32 %v4396_v25, %v1328_v0  ;;  %v1149_v50 = vmul.f32 %v1090_v45, %v4571_v59  ;;  %v2922_v59 = vld [vmem:[%s5095_s8 + $0x38] sm:$0xff] }
 0x393   :  { %2043 = vmatpush.bf16.msrb.mxu2 %v2922_v59 }
 0x394   :  { %v1637_v48 = vpop.f32.mrf.mxu1  ;;  %v1435_v33 = vmul.f32 %v4493_v61, %v1329_v53  ;;  %vm1390_vm9 = vcmp.ge.f32.partialorder %v1329_v53, 0.0  ;;  %v1171_v47 = vpack.c.bf16 %v1150_v9, %v1149_v50  ;;  %v1884_v9 = vld [vmem:[#allocation2 + $0x1] ss:$3 sm:$0xff] }
 0x395   :  { %v1638_v36 = vadd.f32 %v4615_v42, %v1637_v48 }
 0x396   :  { %v1476_v10 = vsel %vm1390_vm9, %v1329_v53, %v1435_v33 }
 0x397   :  { %vm1711_vm8 = vcmp.ge.f32.partialorder %v1638_v36, 0.0  ;;  %v1753_v56 = vmul.f32 %v4112_v54, %v1638_v36  ;;  %2044 = vmatpush.bf16.msrb.mxu2 %v2921_v28  ;;  %v1928_v28 = vld [vmem:[#allocation2 + $0x1a] ss:$3 sm:$0xff] }
 0x399   :  { %v1330_v32 = vpop.f32.mrf.mxu0  ;;  %v1794_v6 = vsel %vm1711_vm8, %v1638_v36, %v1753_v56 }
 0x39a   :  { %v1331_v58 = vadd.f32 %v4396_v25, %v1330_v32  ;;  %1835 = vst [vmem:[#allocation2 + $0xa0] sm:$0xff] %v1794_v6 }
 0x39b   :  { %2045 = vmatpush.bf16.msrb.mxu2 %v2920_v43 }
 0x39c   :  { %vm1391_vm10 = vcmp.ge.f32.partialorder %v1331_v58, 0.0  ;;  %v1436_v18 = vmul.f32 %v4493_v61, %v1331_v58  ;;  %v1639_v31 = vpop.f32.mrf.mxu1 }
 0x39d   :  { %v1640_v3 = vadd.f32 %v4615_v42, %v1639_v31  ;;  %v1856_v31 = vld [vmem:[#allocation2] ss:$3 sm:$0xff] }
 0x39e   :  { %v1477_v15 = vsel %vm1391_vm10, %v1331_v58, %v1436_v18 }
 0x39f   :  { %v1503_v30 = vpack.c.bf16 %v1477_v15, %v1476_v10  ;;  %vm1712_vm11 = vcmp.ge.f32.partialorder %v1640_v3, 0.0  ;;  %v1754_v4 = vmul.f32 %v4112_v54, %v1640_v3  ;;  %2710 = vmatmul.msk.bf16.gmra.mxu2 %vm241_vm0, %v1171_v47 }
 0x3a0   :  { %2046 = vmatpush.bf16.msrb.mxu2 %v2919_v17 }
 0x3a1   :  { %v1795_v23 = vsel %vm1712_vm11, %v1640_v3, %v1754_v4  ;;  %1656 = vmatmul.bf16.gmra.mxu1 %v1503_v30 }
 0x3a2   :  { %1836 = vst [vmem:[#allocation2 + $0xa8] sm:$0xff] %v1795_v23  ;;  %v1911_v23 = vmax.f32 %v1856_v31, %v1884_v9 }
 0x3a4   :  { %2047 = vmatpush.bf16.msrb.mxu2 %v2918_v35  ;;  %v1926_v35 = vld [vmem:[#allocation2 + $0x2] ss:$3 sm:$0xff] }
 0x3a8   :  { %2048 = vmatpush.bf16.msrb.mxu2 %v2917_v62 }
 0x3ac   :  { %2049 = vmatpush.bf16.msrb.mxu2 %v2916_v38 }
 0x3b0   :  { %2050 = vmatpush.bf16.msrb.mxu2 %v2915_v37  ;;  %v1888_v37 = vld [vmem:[#allocation2 + $0x31] ss:$3 sm:$0xff] }
 0x3e6   :  { %v618_v60 = vpop.xlane.xlu0 %617 }
 0x3e7   :  { %v659_v13 = vmul.f32 %v618_v60, %v3488_v20 }
 0x3e9   :  { %v700_v27 = vadd.f32 1e-05, %v659_v13  ;;  %v1953_v13 = vmax.f32 %v1911_v23, %v1926_v35 }
 0x3ea   :  { %v1333_v5 = vpop.f32.mrf.mxu0 }
 0x3eb   :  { %3069 = vrsqrt.f32 %v700_v27  ;;  %v1334_v57 = vadd.f32 %v4396_v25, %v1333_v5  ;;  %vm1107_vm2 = vweird.f32 %v700_v27 }
 0x3ed   :  { %v1437_v34 = vmul.f32 %v4493_v61, %v1334_v57  ;;  %vm1392_vm13 = vcmp.ge.f32.partialorder %v1334_v57, 0.0 }
 0x3ee   :  { %v1642_v49 = vpop.f32.mrf.mxu1 }
 0x3ef   :  { %v1643_v29 = vadd.f32 %v4615_v42, %v1642_v49  ;;  %v1478_v14 = vsel %vm1392_vm13, %v1334_v57, %v1437_v34 }
 0x3f1   :  { %vm1713_vm12 = vcmp.ge.f32.partialorder %v1643_v29, 0.0  ;;  %v1755_v20 = vmul.f32 %v4112_v54, %v1643_v29  ;;  %v3070_v40 = vpop.eup %3069 }
 0x3f2   :  { %v1102_v1 = vmul.f32 %v3070_v40, %v700_v27  ;;  %v1335_v26 = vpop.f32.mrf.mxu0  ;;  %vm1108_vm1 = vweird.f32 %v3070_v40 }
 0x3f3   :  { %v1796_v19 = vsel %vm1713_vm12, %v1643_v29, %v1755_v20  ;;  %v1336_v16 = vadd.f32 %v4847_v51, %v1335_v26  ;;  %vm1109_vm3 = vmor %vm1107_vm2, %vm1108_vm1 }
 0x3f4   :  { %1837 = vst [vmem:[#allocation2 + $0xb0] sm:$0xff] %v1796_v19  ;;  %v1103_v25 = vmul.f32 %v3070_v40, %v1102_v1  ;;  %v1862_v19 = vld [vmem:[#allocation2 + $0x48] ss:$3 sm:$0xff]  ;;  %v1890_v1 = vld [vmem:[#allocation2 + $0x49] ss:$3 sm:$0xff] }
 0x3f5   :  { %vm1393_vm14 = vcmp.ge.f32.partialorder %v1336_v16, 0.0  ;;  %v1438_v12 = vmul.f32 %v4493_v61, %v1336_v16 }
 0x3f6   :  { %v1644_v41 = vpop.f32.mrf.mxu1  ;;  %v1104_v44 = vmul.f32 0.5, %v1103_v25 }
 0x3f7   :  { %v1645_v8 = vadd.f32 %v4615_v42, %v1644_v41  ;;  %v1479_v21 = vsel %vm1393_vm14, %v1336_v16, %v1438_v12  ;;  %v1860_v16 = vld [vmem:[#allocation2 + $0x30] ss:$3 sm:$0xff]  ;;  %v1914_v12 = vmax.f32 %v1862_v19, %v1890_v1 }
 0x3f8   :  { %v1105_v24 = vsub.f32 1.5, %v1104_v44  ;;  %v1504_v39 = vpack.c.bf16 %v1479_v21, %v1478_v14 }
 0x3f9   :  { %vm1714_vm15 = vcmp.ge.f32.partialorder %v1645_v8, 0.0  ;;  %v1756_v2 = vmul.f32 %v4112_v54, %v1645_v8 }
 0x3fa   :  { %1661 = vmatmul.bf16.gmra.mxu1 %v1504_v39  ;;  %v1106_v7 = vmul.f32 %v3070_v40, %v1105_v24  ;;  %v1930_v39 = vld [vmem:[#allocation2 + $0x32] ss:$3 sm:$0xff] }
 0x3fb   :  { %v1797_v0 = vsel %vm1714_vm15, %v1645_v8, %v1756_v2  ;;  %v1913_v2 = vmax.f32 %v1860_v16, %v1888_v37 }
 0x3fc   :  { %1838 = vst [vmem:[#allocation2 + $0xb8] sm:$0xff] %v1797_v0  ;;  %v1338_v52 = vpop.f32.mrf.mxu0  ;;  %v1110_v11 = vsel %vm1109_vm3, %v3070_v40, %v1106_v7 }
 0x3fd   :  { %v1151_v46 = vmul.f32 %v1110_v11, %v4658_v63  ;;  %v1339_v22 = vadd.f32 %v4847_v51, %v1338_v52  ;;  %v1858_v63 = vld [vmem:[#allocation2 + $0x18] ss:$3 sm:$0xff]  ;;  %v1955_v52 = vmax.f32 %v1913_v2, %v1930_v39 }
 0x3fe   :  { %v1647_v48 = vpop.f32.mrf.mxu1  ;;  %v1912_v47 = vmax.f32 %v1858_v63, %v1886_v55  ;;  %v1864_v55 = vld [vmem:[#allocation2 + $0x60] ss:$3 sm:$0xff]  ;;  %v2930_v39 = vld [vmem:[%s5097_s10 + $0x38] sm:$0xff] }
 0x3ff   :  { %v1648_v53 = vadd.f32 %v4615_v42, %v1647_v48  ;;  %v1172_v36 = vpack.c.bf16 %v1151_v46, %v1151_v46  ;;  %v1439_v58 = vmul.f32 %v4493_v61, %v1339_v22  ;;  %vm1394_vm5 = vcmp.ge.f32.partialorder %v1339_v22, 0.0  ;;  %2208 = vmatpush.bf16.msrb.mxu3 %v2930_v39 }
 0x400   :  { %v1954_v17 = vmax.f32 %v1912_v47, %v1928_v28 }
 0x401   :  { %vm1715_vm4 = vcmp.ge.f32.partialorder %v1648_v53, 0.0  ;;  %v1757_v56 = vmul.f32 %v4112_v54, %v1648_v53  ;;  %2711 = vmatmul.msk.bf16.gmra.mxu2 %vm241_vm0, %v1172_v36  ;;  %v1480_v3 = vsel %vm1394_vm5, %v1339_v22, %v1439_v58  ;;  %v4877_v22 = vld [vmem:[#allocation8] ss:$0 sm:$0xff]  ;;  %v1866_v58 = vld [vmem:[#allocation2 + $0x78] ss:$3 sm:$0xff] }
 0x402   :  { %v1343_v32 = vpop.f32.mrf.mxu2  ;;  %v1967_v49 = vpack.c.bf16 %v1954_v17, %v1953_v13 }
 0x403   :  { %v1798_v33 = vsel %vm1715_vm4, %v1648_v53, %v1757_v56  ;;  %v1344_v5 = vadd.f32 %v4847_v51, %v1343_v32  ;;  %v1940_v19 = vld [vmem:[#allocation2 + $0xaa] ss:$3 sm:$0xff] }
 0x404   :  { %v1340_v45 = vpop.f32.mrf.mxu0  ;;  %1839 = vst [vmem:[#allocation2 + $0xc0] sm:$0xff] %v1798_v33  ;;  %v1894_v33 = vld [vmem:[#allocation2 + $0x79] ss:$3 sm:$0xff] }
 0x405   :  { %v1341_v6 = vadd.f32 %v4847_v51, %v1340_v45  ;;  %v1441_v20 = vmul.f32 %v4493_v61, %v1344_v5  ;;  %vm1396_vm9 = vcmp.ge.f32.partialorder %v1344_v5, 0.0  ;;  %v1916_v9 = vmax.f32 %v1866_v58, %v1894_v33 }
 0x406   :  { %v1649_v50 = vpop.f32.mrf.mxu1 }
 0x407   :  { %v1440_v18 = vmul.f32 %v4493_v61, %v1341_v6  ;;  %vm1395_vm6 = vcmp.ge.f32.partialorder %v1341_v6, 0.0  ;;  %v1650_v15 = vadd.f32 %v4615_v42, %v1649_v50  ;;  %v1482_v41 = vsel %vm1396_vm9, %v1344_v5, %v1441_v20  ;;  %v1898_v5 = vld [vmem:[#allocation2 + $0xa9] ss:$3 sm:$0xff] }
 0x409   :  { %v1481_v10 = vsel %vm1395_vm6, %v1341_v6, %v1440_v18  ;;  %vm1716_vm0 = vcmp.ge.f32.partialorder %v1650_v15, 0.0  ;;  %v1758_v4 = vmul.f32 %v4112_v54, %v1650_v15  ;;  %v1892_v18 = vld [vmem:[#allocation2 + $0x61] ss:$3 sm:$0xff] }
 0x40a   :  { %v1505_v30 = vpack.c.bf16 %v1481_v10, %v1480_v3  ;;  %v1345_v59 = vpop.f32.mrf.mxu2  ;;  %v1915_v10 = vmax.f32 %v1864_v55, %v1892_v18 }
 0x40b   :  { %v1799_v43 = vsel %vm1716_vm0, %v1650_v15, %v1758_v4  ;;  %v1346_v60 = vadd.f32 %v4847_v51, %v1345_v59  ;;  %v1934_v59 = vld [vmem:[#allocation2 + $0x62] ss:$3 sm:$0xff] }
 0x40c   :  { %1666 = vmatmul.bf16.vlgmr.msra.gmra.mxu3 %v1505_v30  ;;  %1840 = vst [vmem:[#allocation2 + $0xc8] sm:$0xff] %v1799_v43  ;;  %v1936_v30 = vld [vmem:[#allocation2 + $0x7a] ss:$3 sm:$0xff]  ;;  %v1957_v43 = vmax.f32 %v1915_v10, %v1934_v59 }
 0x40d   :  { %v1442_v29 = vmul.f32 %v4493_v61, %v1346_v60  ;;  %vm1397_vm8 = vcmp.ge.f32.partialorder %v1346_v60, 0.0  ;;  %v1932_v61 = vld [vmem:[#allocation2 + $0x4a] ss:$3 sm:$0xff]  ;;  %v1958_v23 = vmax.f32 %v1916_v9, %v1936_v30 }
 0x40e   :  { %v1652_v27 = vpop.f32.mrf.mxu1  ;;  %v1956_v24 = vmax.f32 %v1914_v12, %v1932_v61 }
 0x40f   :  { %v1653_v62 = vadd.f32 %v4615_v42, %v1652_v27  ;;  %v1483_v26 = vsel %vm1397_vm8, %v1346_v60, %v1442_v29  ;;  %v1969_v35 = vpack.c.bf16 %v1958_v23, %v1957_v43  ;;  %v1870_v27 = vld [vmem:[#allocation2 + $0xa8] ss:$3 sm:$0xff]  ;;  %v4920_v23 = vld [vmem:[#allocation15] ss:$0 sm:$0xff] }
 0x410   :  { %v1506_v8 = vpack.c.bf16 %v1483_v26, %v1482_v41  ;;  %v1968_v48 = vpack.c.bf16 %v1956_v24, %v1955_v52  ;;  %v1896_v29 = vld [vmem:[#allocation2 + $0x91] ss:$3 sm:$0xff]  ;;  %v1938_v26 = vld [vmem:[#allocation2 + $0x92] ss:$3 sm:$0xff]  ;;  %v2928_v52 = vld [vmem:[%s5097_s10 + $0x28] sm:$0xff] }
 0x411   :  { %vm1717_vm7 = vcmp.ge.f32.partialorder %v1653_v62, 0.0  ;;  %v1759_v38 = vmul.f32 %v4112_v54, %v1653_v62  ;;  %2051 = vmatmul.bf16.vlgmr.msrb.gmra.mxu2 %v1967_v49  ;;  %v1868_v49 = vld [vmem:[#allocation2 + $0x90] ss:$3 sm:$0xff]  ;;  %v4925_v43 = vld [vmem:[#allocation14] ss:$0 sm:$0xff] }
 0x412   :  { %v1348_v57 = vpop.f32.mrf.mxu2 }
 0x413   :  { %v1800_v40 = vsel %vm1717_vm7, %v1653_v62, %v1759_v38  ;;  %v1349_v11 = vadd.f32 %v4847_v51, %v1348_v57  ;;  %v1918_v57 = vmax.f32 %v1870_v27, %v1898_v5 }
 0x414   :  { %1841 = vst [vmem:[#allocation2 + $0xd0] sm:$0xff] %v1800_v40  ;;  %v1917_v40 = vmax.f32 %v1868_v49, %v1896_v29 }
 0x415   :  { %v1443_v32 = vmul.f32 %v4877_v22, %v1349_v11  ;;  %vm1398_vm13 = vcmp.ge.f32.partialorder %v1349_v11, 0.0  ;;  %v1960_v1 = vmax.f32 %v1918_v57, %v1940_v19 }
 0x416   :  { %v1654_v34 = vpop.f32.mrf.mxu1 }
 0x417   :  { %v1655_v25 = vadd.f32 %v4615_v42, %v1654_v34  ;;  %v1484_v31 = vsel %vm1398_vm13, %v1349_v11, %v1443_v32  ;;  %v1959_v34 = vmax.f32 %v1917_v40, %v1938_v26 }
 0x419   :  { %vm1718_vm10 = vcmp.ge.f32.partialorder %v1655_v25, 0.0  ;;  %v1760_v44 = vmul.f32 %v4112_v54, %v1655_v25  ;;  %v1970_v16 = vpack.c.bf16 %v1960_v1, %v1959_v34 }
 0x41a   :  { %v1350_v14 = vpop.f32.mrf.mxu2 }
 0x41b   :  { %v1801_v21 = vsel %vm1718_vm10, %v1655_v25, %v1760_v44  ;;  %v1351_v0 = vadd.f32 %v4847_v51, %v1350_v14  ;;  %v1872_v41 = vld [vmem:[#allocation2 + $0xc0] ss:$3 sm:$0xff]  ;;  %v1900_v12 = vld [vmem:[#allocation2 + $0xc1] ss:$3 sm:$0xff]  ;;  %v1942_v61 = vld [vmem:[#allocation2 + $0xc2] ss:$3 sm:$0xff] }
 0x41c   :  { %1671 = vmatmul.bf16.gmra.mxu3 %v1506_v8  ;;  %1842 = vst [vmem:[#allocation2 + $0xd8] sm:$0xff] %v1801_v21  ;;  %v1919_v44 = vmax.f32 %v1872_v41, %v1900_v12 }
 0x41d   :  { %v1444_v53 = vmul.f32 %v4877_v22, %v1351_v0  ;;  %vm1399_vm12 = vcmp.ge.f32.partialorder %v1351_v0, 0.0 }
 0x41e   :  { %v1657_v7 = vpop.f32.mrf.mxu1  ;;  %v1961_v21 = vmax.f32 %v1919_v44, %v1942_v61 }
 0x41f   :  { %v1658_v46 = vadd.f32 %v4615_v42, %v1657_v7  ;;  %v1485_v6 = vsel %vm1399_vm12, %v1351_v0, %v1444_v53  ;;  %v2929_v0 = vld [vmem:[%s5097_s10 + $0x30] sm:$0xff]  ;;  %v2927_v7 = vld [vmem:[%s5097_s10 + $0x20] sm:$0xff] }
 0x420   :  { %v1507_v15 = vpack.c.bf16 %v1485_v6, %v1484_v31  ;;  %2209 = vmatpush.bf16.msrb.mxu3 %v2929_v0  ;;  %v2923_v6 = vld [vmem:[%s5097_s10] sm:$0xff] }
 0x421   :  { %vm1719_vm11 = vcmp.ge.f32.partialorder %v1658_v46, 0.0  ;;  %v1761_v36 = vmul.f32 %v4112_v54, %v1658_v46  ;;  %2056 = vmatmul.bf16.gmra.mxu2 %v1968_v48 }
 0x422   :  { %v1353_v56 = vpop.f32.mrf.mxu2 }
 0x423   :  { %v1802_v45 = vsel %vm1719_vm11, %v1658_v46, %v1761_v36  ;;  %v1354_v17 = vadd.f32 %v4847_v51, %v1353_v56  ;;  %v2926_v46 = vld [vmem:[%s5097_s10 + $0x18] sm:$0xff]  ;;  %v2925_v36 = vld [vmem:[%s5097_s10 + $0x10] sm:$0xff] }
 0x424   :  { %1843 = vst [vmem:[#allocation2 + $0xe0] sm:$0xff] %v1802_v45  ;;  %2210 = vmatpush.bf16.msrb.mxu3 %v2928_v52  ;;  %v2924_v45 = vld [vmem:[%s5097_s10 + $0x8] sm:$0xff]  ;;  %s2744_s10 = sld [smem:[#allocation5 + $0x1]] }
 0x425   :  { %v1445_v13 = vmul.f32 %v4877_v22, %v1354_v17  ;;  %vm1400_vm1 = vcmp.ge.f32.partialorder %v1354_v17, 0.0 }
 0x426   :  { %v1659_v63 = vpop.f32.mrf.mxu1 }
 0x427   :  { %v1660_v50 = vadd.f32 %v4615_v42, %v1659_v63  ;;  %v1486_v38 = vsel %vm1400_vm1, %v1354_v17, %v1445_v13 }
 0x428   :  { %2211 = vmatpush.bf16.msrb.mxu3 %v2927_v7 }
 0x429   :  { %vm1720_vm14 = vcmp.ge.f32.partialorder %v1660_v50, 0.0  ;;  %v1762_v3 = vmul.f32 %v4112_v54, %v1660_v50 }
 0x42a   :  { %v1355_v47 = vpop.f32.mrf.mxu2 }
 0x42b   :  { %v1803_v4 = vsel %vm1720_vm14, %v1660_v50, %v1762_v3  ;;  %v1356_v28 = vadd.f32 %v4847_v51, %v1355_v47 }
 0x42c   :  { %1676 = vmatmul.bf16.gmra.mxu3 %v1507_v15  ;;  %1844 = vst [vmem:[#allocation2 + $0xe8] sm:$0xff] %v1803_v4 }
 0x42d   :  { %v1446_v60 = vmul.f32 %v4877_v22, %v1356_v28  ;;  %vm1401_vm15 = vcmp.ge.f32.partialorder %v1356_v28, 0.0  ;;  %2212 = vmatpush.bf16.msrb.mxu3 %v2926_v46 }
 0x42f   :  { %v1487_v62 = vsel %vm1401_vm15, %v1356_v28, %v1446_v60 }
 0x430   :  { %v1508_v20 = vpack.c.bf16 %v1487_v62, %v1486_v38 }
 0x431   :  { %2061 = vmatmul.bf16.gmra.mxu2 %v1969_v35  ;;  %2213 = vmatpush.bf16.msrb.mxu3 %v2925_v36 }
 0x433   :  { %v1874_v37 = vld [vmem:[#allocation2 + $0xd8] ss:$3 sm:$0xff]  ;;  %v1902_v25 = vld [vmem:[#allocation2 + $0xd9] ss:$3 sm:$0xff]  ;;  %v1944_v2 = vld [vmem:[#allocation2 + $0xda] ss:$3 sm:$0xff] }
 0x434   :  { %v1920_v8 = vmax.f32 %v1874_v37, %v1902_v25 }
 0x435   :  { %2214 = vmatpush.bf16.msrb.mxu3 %v2924_v45  ;;  %v3076_v45 = vld [vmem:[#allocation12] ss:$0 sm:$0xff] }
 0x436   :  { %v1962_v14 = vmax.f32 %v1920_v8, %v1944_v2 }
 0x438   :  { %v1971_v24 = vpack.c.bf16 %v1962_v14, %v1961_v21 }
 0x439   :  { %2215 = vmatpush.bf16.msrb.mxu3 %v2923_v6 }
 0x43c   :  { %1681 = vmatmul.bf16.gmra.mxu3 %v1508_v20 }
 0x441   :  { %2066 = vmatmul.bf16.gmra.mxu2 %v1970_v16 }
 0x451   :  { %2071 = vmatmul.bf16.gmra.mxu2 %v1971_v24 }
 0x477   :  { %v1662_v11 = vpop.f32.mrf.mxu1 }
 0x478   :  { %v1663_v48 = vadd.f32 %v4615_v42, %v1662_v11 }
 0x47a   :  { %vm1721_vm2 = vcmp.ge.f32.partialorder %v1663_v48, 0.0  ;;  %v1763_v53 = vmul.f32 %v4112_v54, %v1663_v48 }
 0x47c   :  { %v1804_v56 = vsel %vm1721_vm2, %v1663_v48, %v1763_v53 }
 0x47d   :  { %1845 = vst [vmem:[#allocation2 + $0xf0] sm:$0xff] %v1804_v56 }
 0x47f   :  { %v1664_v32 = vpop.f32.mrf.mxu1 }
 0x480   :  { %v1665_v58 = vadd.f32 %v4615_v42, %v1664_v32 }
 0x482   :  { %vm1722_vm3 = vcmp.ge.f32.partialorder %v1665_v58, 0.0  ;;  %v1764_v33 = vmul.f32 %v4112_v54, %v1665_v58 }
 0x484   :  { %v1805_v63 = vsel %vm1722_vm3, %v1665_v58, %v1764_v33  ;;  %v1358_v55 = vpop.f32.mrf.mxu2 }
 0x485   :  { %1846 = vst [vmem:[#allocation2 + $0xf8] sm:$0xff] %v1805_v63  ;;  %v1359_v18 = vadd.f32 %v4847_v51, %v1358_v55 }
 0x487   :  { %v1447_v50 = vmul.f32 %v4877_v22, %v1359_v18  ;;  %vm1402_vm4 = vcmp.ge.f32.partialorder %v1359_v18, 0.0 }
 0x489   :  { %v1488_v31 = vsel %vm1402_vm4, %v1359_v18, %v1447_v50 }
 0x48a   :  { %v1509_v9 = vpack.c.bf16 %v1488_v31, %v1488_v31 }
 0x48c   :  { %v1360_v15 = vpop.f32.mrf.mxu2  ;;  %1686 = vmatmul.bf16.gmra.mxu3 %v1509_v9 }
 0x48f   :  { %v1667_v3 = vpop.f32.mrf.mxu3 }
 0x490   :  { %v1668_v10 = vadd.f32 %v4615_v42, %v1667_v3 }
 0x492   :  { %vm1723_vm5 = vcmp.ge.f32.partialorder %v1668_v10, 0.0  ;;  %v1765_v47 = vmul.f32 %v4112_v54, %v1668_v10 }
 0x494   :  { %v1806_v30 = vsel %vm1723_vm5, %v1668_v10, %v1765_v47  ;;  %v2052_v4 = vpop.f32.mrf.mxu2 }
 0x495   :  { %1847 = vst [vmem:[#allocation2 + $0x100] sm:$0xff] %v1806_v30  ;;  %v2053_v28 = vadd.f32 %v4920_v23, %v2052_v4 }
 0x497   :  { %v1669_v51 = vpop.f32.mrf.mxu3  ;;  %v2105_v60 = vmul.f32 %v4925_v43, %v2053_v28  ;;  %vm2087_vm0 = vcmp.ge.f32.partialorder %v2053_v28, 0.0 }
 0x498   :  { %v1670_v59 = vadd.f32 %v4615_v42, %v1669_v51 }
 0x499   :  { %v2119_v29 = vsel %vm2087_vm0, %v2053_v28, %v2105_v60 }
 0x49a   :  { %vm1724_vm6 = vcmp.ge.f32.partialorder %v1670_v59, 0.0  ;;  %v1766_v22 = vmul.f32 %v4112_v54, %v1670_v59 }
 0x49c   :  { %v1807_v17 = vsel %vm1724_vm6, %v1670_v59, %v1766_v22  ;;  %v2054_v35 = vpop.f32.mrf.mxu2  ;;  %v1876_v44 = vld [vmem:[#allocation2 + $0xf0] ss:$3 sm:$0xff]  ;;  %v1904_v2 = vld [vmem:[#allocation2 + $0xf1] ss:$3 sm:$0xff] }
 0x49d   :  { %1848 = vst [vmem:[#allocation2 + $0x108] sm:$0xff] %v1807_v17  ;;  %v2055_v13 = vadd.f32 %v4920_v23, %v2054_v35  ;;  %v1921_v39 = vmax.f32 %v1876_v44, %v1904_v2 }
 0x49f   :  { %v1672_v27 = vpop.f32.mrf.mxu3  ;;  %vm2088_vm7 = vcmp.ge.f32.partialorder %v2055_v13, 0.0  ;;  %v2106_v62 = vmul.f32 %v4925_v43, %v2055_v13 }
 0x4a0   :  { %v1673_v5 = vadd.f32 %v4615_v42, %v1672_v27 }
 0x4a1   :  { %v2120_v38 = vsel %vm2088_vm7, %v2055_v13, %v2106_v62 }
 0x4a2   :  { %vm1725_vm8 = vcmp.ge.f32.partialorder %v1673_v5, 0.0  ;;  %v1767_v49 = vmul.f32 %v4112_v54, %v1673_v5  ;;  %v2133_v20 = vpack.c.bf16 %v2120_v38, %v2119_v29 }
 0x4a4   :  { %v1808_v57 = vsel %vm1725_vm8, %v1673_v5, %v1767_v49  ;;  %v2057_v40 = vpop.f32.mrf.mxu2  ;;  %2216 = vmatmul.bf16.vlgmr.msrb.gmra.mxu3 %v2133_v20 }
 0x4a5   :  { %1849 = vst [vmem:[#allocation2 + $0x110] sm:$0xff] %v1808_v57  ;;  %v2058_v34 = vadd.f32 %v4920_v23, %v2057_v40 }
 0x4a7   :  { %v1674_v19 = vpop.f32.mrf.mxu3  ;;  %v2107_v25 = vmul.f32 %v4925_v43, %v2058_v34  ;;  %vm2089_vm10 = vcmp.ge.f32.partialorder %v2058_v34, 0.0 }
 0x4a8   :  { %v1675_v1 = vadd.f32 %v4615_v42, %v1674_v19 }
 0x4a9   :  { %v2121_v21 = vsel %vm2089_vm10, %v2058_v34, %v2107_v25 }
 0x4aa   :  { %vm1726_vm9 = vcmp.ge.f32.partialorder %v1675_v1, 0.0  ;;  %v1768_v26 = vmul.f32 %v4112_v54, %v1675_v1 }
 0x4ac   :  { %v1809_v16 = vsel %vm1726_vm9, %v1675_v1, %v1768_v26  ;;  %v2059_v37 = vpop.f32.mrf.mxu2 }
 0x4ad   :  { %1850 = vst [vmem:[#allocation2 + $0x118] sm:$0xff] %v1809_v16  ;;  %v2060_v41 = vadd.f32 %v4920_v23, %v2059_v37 }
 0x4af   :  { %v1677_v12 = vpop.f32.mrf.mxu3  ;;  %v2108_v14 = vmul.f32 %v4925_v43, %v2060_v41  ;;  %vm2090_vm11 = vcmp.ge.f32.partialorder %v2060_v41, 0.0 }
 0x4b0   :  { %v1678_v8 = vadd.f32 %v4615_v42, %v1677_v12  ;;  %v1946_v42 = vld [vmem:[#allocation2 + $0xf2] ss:$3 sm:$0xff] }
 0x4b1   :  { %v2122_v24 = vsel %vm2090_vm11, %v2060_v41, %v2108_v14  ;;  %v1963_v56 = vmax.f32 %v1921_v39, %v1946_v42 }
 0x4b2   :  { %vm1727_vm12 = vcmp.ge.f32.partialorder %v1678_v8, 0.0  ;;  %v1769_v61 = vmul.f32 %v4112_v54, %v1678_v8  ;;  %v2134_v52 = vpack.c.bf16 %v2122_v24, %v2121_v21 }
 0x4b4   :  { %v1810_v0 = vsel %vm1727_vm12, %v1678_v8, %v1769_v61  ;;  %v1878_v7 = vld [vmem:[#allocation2 + $0x108] ss:$3 sm:$0xff]  ;;  %v1906_v11 = vld [vmem:[#allocation2 + $0x109] ss:$3 sm:$0xff]  ;;  %v2062_v48 = vpop.f32.mrf.mxu2  ;;  %2221 = vmatmul.bf16.gmra.mxu3 %v2134_v52  ;;  %v1948_v53 = vld [vmem:[#allocation2 + $0x10a] ss:$3 sm:$0xff] }
 0x4b5   :  { %1851 = vst [vmem:[#allocation2 + $0x120] sm:$0xff] %v1810_v0  ;;  %v1922_v46 = vmax.f32 %v1878_v7, %v1906_v11  ;;  %v2063_v63 = vadd.f32 %v4920_v23, %v2062_v48  ;;  %v4956_v48 = vld [vmem:[#allocation17] ss:$0 sm:$0xff] }
 0x4b7   :  { %v1679_v36 = vpop.f32.mrf.mxu3  ;;  %v1964_v32 = vmax.f32 %v1922_v46, %v1948_v53  ;;  %v2109_v50 = vmul.f32 %v4925_v43, %v2063_v63  ;;  %vm2091_vm14 = vcmp.ge.f32.partialorder %v2063_v63, 0.0  ;;  %v4961_v53 = vstv %s2744_s10 }
 0x4b8   :  { %v1680_v58 = vadd.f32 %v3076_v45, %v1679_v36 }
 0x4b9   :  { %v1972_v33 = vpack.c.bf16 %v1964_v32, %v1963_v56  ;;  %v2123_v47 = vsel %vm2091_vm14, %v2063_v63, %v2109_v50 }
 0x4ba   :  { %vm1728_vm13 = vcmp.ge.f32.partialorder %v1680_v58, 0.0  ;;  %v1770_v6 = vmul.f32 %v4112_v54, %v1680_v58 }
 0x4bb   :  { %2076 = vmatmul.bf16.gmra.mxu2 %v1972_v33  ;;  %v2936_v33 = vld [vmem:[%s5100_s13 + $0x28] sm:$0xff] }
 0x4bc   :  { %v1811_v55 = vsel %vm1728_vm13, %v1680_v58, %v1770_v6  ;;  %v2064_v18 = vpop.f32.mrf.mxu2 }
 0x4bd   :  { %1852 = vst [vmem:[#allocation2 + $0x128] sm:$0xff] %v1811_v55  ;;  %v2065_v31 = vadd.f32 %v4920_v23, %v2064_v18  ;;  %v2935_v18 = vld [vmem:[%s5100_s13 + $0x20] sm:$0xff] }
 0x4bf   :  { %v1682_v9 = vpop.f32.mrf.mxu3  ;;  %v2110_v3 = vmul.f32 %v4925_v43, %v2065_v31  ;;  %vm2092_vm15 = vcmp.ge.f32.partialorder %v2065_v31, 0.0 }
 0x4c0   :  { %v1683_v15 = vadd.f32 %v3076_v45, %v1682_v9 }
 0x4c1   :  { %v2124_v30 = vsel %vm2092_vm15, %v2065_v31, %v2110_v3  ;;  %v2934_v31 = vld [vmem:[%s5100_s13 + $0x18] sm:$0xff] }
 0x4c2   :  { %vm1729_vm1 = vcmp.ge.f32.partialorder %v1683_v15, 0.0  ;;  %v1771_v10 = vmul.f32 %v4112_v54, %v1683_v15  ;;  %v2135_v51 = vpack.c.bf16 %v2124_v30, %v2123_v47  ;;  %v2933_v47 = vld [vmem:[%s5100_s13 + $0x10] sm:$0xff] }
 0x4c4   :  { %v1812_v4 = vsel %vm1729_vm1, %v1683_v15, %v1771_v10  ;;  %v2067_v59 = vpop.f32.mrf.mxu2  ;;  %2226 = vmatmul.bf16.gmra.mxu3 %v2135_v51 }
 0x4c5   :  { %1853 = vst [vmem:[#allocation2 + $0x130] sm:$0xff] %v1812_v4  ;;  %v2068_v35 = vadd.f32 %v4920_v23, %v2067_v59  ;;  %v2932_v4 = vld [vmem:[%s5100_s13 + $0x8] sm:$0xff] }
 0x4c7   :  { %v1684_v22 = vpop.f32.mrf.mxu3  ;;  %v2111_v27 = vmul.f32 %v4925_v43, %v2068_v35  ;;  %vm2093_vm3 = vcmp.ge.f32.partialorder %v2068_v35, 0.0 }
 0x4c8   :  { %v1685_v28 = vadd.f32 %v3076_v45, %v1684_v22 }
 0x4c9   :  { %v2125_v49 = vsel %vm2093_vm3, %v2068_v35, %v2111_v27 }
 0x4ca   :  { %vm1730_vm2 = vcmp.ge.f32.partialorder %v1685_v28, 0.0  ;;  %v1772_v17 = vmul.f32 %v4112_v54, %v1685_v28 }
 0x4cc   :  { %v1813_v60 = vsel %vm1730_vm2, %v1685_v28, %v1772_v17  ;;  %v2069_v13 = vpop.f32.mrf.mxu2  ;;  %v1880_v2 = vld [vmem:[#allocation2 + $0x120] ss:$3 sm:$0xff]  ;;  %v1908_v14 = vld [vmem:[#allocation2 + $0x121] ss:$3 sm:$0xff]  ;;  %v1950_v0 = vld [vmem:[#allocation2 + $0x122] ss:$3 sm:$0xff] }
 0x4cd   :  { %1854 = vst [vmem:[#allocation2 + $0x138] sm:$0xff] %v1813_v60  ;;  %v2070_v5 = vadd.f32 %v4920_v23, %v2069_v13  ;;  %v1923_v61 = vmax.f32 %v1880_v2, %v1908_v14  ;;  %v2931_v13 = vld [vmem:[%s5100_s13] sm:$0xff] }
 0x4cf   :  { %v2112_v62 = vmul.f32 %v4925_v43, %v2070_v5  ;;  %vm2094_vm4 = vcmp.ge.f32.partialorder %v2070_v5, 0.0  ;;  %v1965_v7 = vmax.f32 %v1923_v61, %v1950_v0 }
 0x4d1   :  { %v2126_v29 = vsel %vm2094_vm4, %v2070_v5, %v2112_v62 }
 0x4d2   :  { %v2136_v38 = vpack.c.bf16 %v2126_v29, %v2125_v49 }
 0x4d4   :  { %v2072_v57 = vpop.f32.mrf.mxu2  ;;  %2231 = vmatmul.bf16.gmra.mxu3 %v2136_v38 }
 0x4d5   :  { %v2073_v20 = vadd.f32 %v4920_v23, %v2072_v57 }
 0x4d7   :  { %v2113_v19 = vmul.f32 %v4925_v43, %v2073_v20  ;;  %vm2095_vm5 = vcmp.ge.f32.partialorder %v2073_v20, 0.0 }
 0x4d9   :  { %v2127_v34 = vsel %vm2095_vm5, %v2073_v20, %v2113_v19 }
 0x4dc   :  { %v2074_v40 = vpop.f32.mrf.mxu2 }
 0x4dd   :  { %v2075_v1 = vadd.f32 %v4920_v23, %v2074_v40 }
 0x4df   :  { %v2114_v26 = vmul.f32 %v4925_v43, %v2075_v1  ;;  %vm2096_vm6 = vcmp.ge.f32.partialorder %v2075_v1, 0.0 }
 0x4e1   :  { %v2128_v16 = vsel %vm2096_vm6, %v2075_v1, %v2114_v26 }
 0x4e2   :  { %v2137_v37 = vpack.c.bf16 %v2128_v16, %v2127_v34 }
 0x4e4   :  { %2236 = vmatmul.bf16.gmra.mxu3 %v2137_v37 }
 0x50f   :  { %v1687_v25 = vpop.f32.mrf.mxu3 }
 0x510   :  { %v1688_v41 = vadd.f32 %v3076_v45, %v1687_v25  ;;  %v2937_v45 = vld [vmem:[%s5100_s13 + $0x30] sm:$0xff] }
 0x512   :  { %vm1731_vm0 = vcmp.ge.f32.partialorder %v1688_v41, 0.0  ;;  %v1773_v12 = vmul.f32 %v4112_v54, %v1688_v41  ;;  %v2938_v54 = vld [vmem:[%s5100_s13 + $0x38] sm:$0xff] }
 0x513   :  { %2420 = vmatpush.bf16.msra.mxu2 %v2938_v54 }
 0x514   :  { %v1814_v8 = vsel %vm1731_vm0, %v1688_v41, %v1773_v12 }
 0x515   :  { %1855 = vst [vmem:[#allocation2 + $0x140] sm:$0xf] %v1814_v8 }
 0x517   :  { %v1689_v44 = vpop.f32.mrf.mxu3  ;;  %2421 = vmatpush.bf16.msra.mxu2 %v2937_v45 }
 0x51b   :  { %2422 = vmatpush.bf16.msra.mxu2 %v2936_v33 }
 0x51c   :  { %v1882_v21 = vld [vmem:[#allocation2 + $0x138] ss:$3 sm:$0xf]  ;;  %v1910_v24 = vld [vmem:[#allocation2 + $0x139] ss:$3 sm:$0xf] }
 0x51d   :  { %v1924_v39 = vmax.f32 %v1882_v21, %v1910_v24  ;;  %v1952_v52 = vld [vmem:[#allocation2 + $0x13a] ss:$3 sm:$0xf] }
 0x51f   :  { %v1966_v11 = vmax.f32 %v1924_v39, %v1952_v52  ;;  %2423 = vmatpush.bf16.msra.mxu2 %v2935_v18 }
 0x521   :  { %v1973_v46 = vpack.c.bf16 %v1966_v11, %v1965_v7 }
 0x523   :  { %2081 = vmatmul.bf16.gmra.mxu2 %v1973_v46 }
 0x524   :  { %2424 = vmatpush.bf16.msra.mxu2 %v2934_v31 }
 0x527   :  { %v2217_v42 = vpop.f32.mrf.mxu3 }
 0x528   :  { %v2218_v36 = vadd.f32 %v4956_v48, %v2217_v42  ;;  %2425 = vmatpush.bf16.msra.mxu2 %v2933_v47  ;;  %v2945_v47 = vld [vmem:[%s5102_s15 + $0x30] sm:$0xff] }
 0x52a   :  { %vm2252_vm7 = vcmp.ge.f32.partialorder %v2218_v36, 0.0  ;;  %v2267_v56 = vmul.f32 %v4961_v53, %v2218_v36 }
 0x52c   :  { %v2281_v32 = vsel %vm2252_vm7, %v2218_v36, %v2267_v56  ;;  %2426 = vmatpush.bf16.msra.mxu2 %v2932_v4  ;;  %v2941_v4 = vld [vmem:[%s5102_s15 + $0x10] sm:$0xff] }
 0x52d   :  { %2295 = vst [vmem:[#allocation3] sm:$0xff] %v2281_v32 }
 0x52f   :  { %v2219_v58 = vpop.f32.mrf.mxu3 }
 0x530   :  { %v2220_v6 = vadd.f32 %v4956_v48, %v2219_v58  ;;  %2427 = vmatpush.bf16.msra.mxu2 %v2931_v13 }
 0x532   :  { %vm2253_vm8 = vcmp.ge.f32.partialorder %v2220_v6, 0.0  ;;  %v2268_v63 = vmul.f32 %v4961_v53, %v2220_v6 }
 0x534   :  { %v2282_v55 = vsel %vm2253_vm8, %v2220_v6, %v2268_v63 }
 0x535   :  { %2296 = vst [vmem:[#allocation3 + $0x8] sm:$0xff] %v2282_v55 }
 0x537   :  { %v2222_v50 = vpop.f32.mrf.mxu3 }
 0x538   :  { %v2223_v9 = vadd.f32 %v4956_v48, %v2222_v50 }
 0x53a   :  { %vm2254_vm9 = vcmp.ge.f32.partialorder %v2223_v9, 0.0  ;;  %v2269_v15 = vmul.f32 %v4961_v53, %v2223_v9 }
 0x53c   :  { %v2283_v3 = vsel %vm2254_vm9, %v2223_v9, %v2269_v15 }
 0x53d   :  { %2297 = vst [vmem:[#allocation3 + $0x10] sm:$0xff] %v2283_v3 }
 0x53e   :  { %v2077_v10 = vpop.f32.mrf.mxu2 }
 0x53f   :  { %v2224_v30 = vpop.f32.mrf.mxu3  ;;  %v2078_v59 = vadd.f32 %v4920_v23, %v2077_v10  ;;  %v2946_v10 = vld [vmem:[%s5102_s15 + $0x38] sm:$0xff] }
 0x540   :  { %v2225_v51 = vadd.f32 %v4956_v48, %v2224_v30  ;;  %2533 = vmatpush.bf16.msra.mxu3 %v2946_v10  ;;  %v2942_v30 = vld [vmem:[%s5102_s15 + $0x18] sm:$0xff] }
 0x541   :  { %v2115_v35 = vmul.f32 %v4925_v43, %v2078_v59  ;;  %vm2097_vm11 = vcmp.ge.f32.partialorder %v2078_v59, 0.0 }
 0x542   :  { %vm2255_vm10 = vcmp.ge.f32.partialorder %v2225_v51, 0.0  ;;  %v2270_v22 = vmul.f32 %v4961_v53, %v2225_v51 }
 0x543   :  { %v2129_v49 = vsel %vm2097_vm11, %v2078_v59, %v2115_v35  ;;  %v2939_v35 = vld [vmem:[%s5102_s15] sm:$0xff] }
 0x544   :  { %v2284_v28 = vsel %vm2255_vm10, %v2225_v51, %v2270_v22  ;;  %v2309_v37 = vld [vmem:[#allocation3] ss:$3 sm:$0xff]  ;;  %v2319_v25 = vld [vmem:[#allocation3 + $0x1] ss:$3 sm:$0xff]  ;;  %v2334_v61 = vld [vmem:[#allocation3 + $0x2] ss:$3 sm:$0xff]  ;;  %2534 = vmatpush.bf16.msra.mxu3 %v2945_v47 }
 0x545   :  { %2298 = vst [vmem:[#allocation3 + $0x18] sm:$0xff] %v2284_v28  ;;  %v2328_v12 = vmax.f32 %v2309_v37, %v2319_v25 }
 0x546   :  { %v2079_v17 = vpop.f32.mrf.mxu2 }
 0x547   :  { %v2080_v60 = vadd.f32 %v4920_v23, %v2079_v17  ;;  %v2227_v5 = vpop.f32.mrf.mxu3  ;;  %v2343_v39 = vmax.f32 %v2328_v12, %v2334_v61  ;;  %v2940_v17 = vld [vmem:[%s5102_s15 + $0x8] sm:$0xff] }
 0x548   :  { %v2228_v62 = vadd.f32 %v4956_v48, %v2227_v5 }
 0x549   :  { %v2116_v27 = vmul.f32 %v4925_v43, %v2080_v60  ;;  %vm2098_vm12 = vcmp.ge.f32.partialorder %v2080_v60, 0.0 }
 0x54a   :  { %vm2256_vm13 = vcmp.ge.f32.partialorder %v2228_v62, 0.0  ;;  %v2271_v38 = vmul.f32 %v4961_v53, %v2228_v62 }
 0x54b   :  { %v2130_v29 = vsel %vm2098_vm12, %v2080_v60, %v2116_v27 }
 0x54c   :  { %v2138_v57 = vpack.c.bf16 %v2130_v29, %v2129_v49  ;;  %v2285_v20 = vsel %vm2256_vm13, %v2228_v62, %v2271_v38 }
 0x54d   :  { %2299 = vst [vmem:[#allocation3 + $0x20] sm:$0xff] %v2285_v20 }
 0x54e   :  { %2241 = vmatmul.bf16.gmra.mxu3 %v2138_v57 }
 0x54f   :  { %v2229_v40 = vpop.f32.mrf.mxu3 }
 0x550   :  { %v2230_v19 = vadd.f32 %v4956_v48, %v2229_v40 }
 0x552   :  { %vm2257_vm14 = vcmp.ge.f32.partialorder %v2230_v19, 0.0  ;;  %v2272_v1 = vmul.f32 %v4961_v53, %v2230_v19 }
 0x554   :  { %v2286_v26 = vsel %vm2257_vm14, %v2230_v19, %v2272_v1 }
 0x555   :  { %2300 = vst [vmem:[#allocation3 + $0x28] sm:$0xff] %v2286_v26  ;;  %v5040_v26 = vld [vmem:[#allocation20] ss:$0 sm:$0xff] }
 0x557   :  { %v2232_v34 = vpop.f32.mrf.mxu3 }
 0x558   :  { %v2233_v16 = vadd.f32 %v4956_v48, %v2232_v34 }
 0x55a   :  { %vm2258_vm15 = vcmp.ge.f32.partialorder %v2233_v16, 0.0  ;;  %v2273_v41 = vmul.f32 %v4961_v53, %v2233_v16 }
 0x55c   :  { %v2287_v8 = vsel %vm2258_vm15, %v2233_v16, %v2273_v41  ;;  %v2311_v44 = vld [vmem:[#allocation3 + $0x18] ss:$3 sm:$0xff]  ;;  %v2321_v2 = vld [vmem:[#allocation3 + $0x19] ss:$3 sm:$0xff]  ;;  %v2336_v21 = vld [vmem:[#allocation3 + $0x1a] ss:$3 sm:$0xff] }
 0x55d   :  { %2301 = vst [vmem:[#allocation3 + $0x30] sm:$0xff] %v2287_v8  ;;  %v2329_v14 = vmax.f32 %v2311_v44, %v2321_v2  ;;  %v2984_v41 = vld [vmem:[#allocation18] ss:$0 sm:$0xff] }
 0x55f   :  { %v2234_v24 = vpop.f32.mrf.mxu3  ;;  %v2344_v0 = vmax.f32 %v2329_v14, %v2336_v21 }
 0x560   :  { %v2235_v52 = vadd.f32 %v4956_v48, %v2234_v24 }
 0x561   :  { %v2348_v7 = vpack.c.bf16 %v2344_v0, %v2343_v39 }
 0x562   :  { %vm2259_vm1 = vcmp.ge.f32.partialorder %v2235_v52, 0.0  ;;  %v2274_v11 = vmul.f32 %v4961_v53, %v2235_v52 }
 0x563   :  { %2428 = vmatmul.bf16.vlgmr.msra.gmra.mxu2 %v2348_v7 }
 0x564   :  { %v2288_v46 = vsel %vm2259_vm1, %v2235_v52, %v2274_v11 }
 0x565   :  { %2302 = vst [vmem:[#allocation3 + $0x38] sm:$0xff] %v2288_v46 }
 0x567   :  { %v2237_v54 = vpop.f32.mrf.mxu3 }
 0x568   :  { %v2238_v42 = vadd.f32 %v4956_v48, %v2237_v54 }
 0x56a   :  { %vm2260_vm2 = vcmp.ge.f32.partialorder %v2238_v42, 0.0  ;;  %v2275_v36 = vmul.f32 %v4961_v53, %v2238_v42 }
 0x56c   :  { %v2289_v56 = vsel %vm2260_vm2, %v2238_v42, %v2275_v36 }
 0x56d   :  { %2303 = vst [vmem:[#allocation3 + $0x40] sm:$0xff] %v2289_v56 }
 0x56f   :  { %v2239_v32 = vpop.f32.mrf.mxu3 }
 0x570   :  { %v2240_v45 = vadd.f32 %v4956_v48, %v2239_v32 }
 0x572   :  { %vm2261_vm3 = vcmp.ge.f32.partialorder %v2240_v45, 0.0  ;;  %v2276_v58 = vmul.f32 %v4961_v53, %v2240_v45 }
 0x574   :  { %v2290_v33 = vsel %vm2261_vm3, %v2240_v45, %v2276_v58  ;;  %v2313_v62 = vld [vmem:[#allocation3 + $0x30] ss:$3 sm:$0xff]  ;;  %v2323_v49 = vld [vmem:[#allocation3 + $0x31] ss:$3 sm:$0xff]  ;;  %v2338_v19 = vld [vmem:[#allocation3 + $0x32] ss:$3 sm:$0xff] }
 0x575   :  { %2304 = vst [vmem:[#allocation3 + $0x48] sm:$0xff] %v2290_v33  ;;  %v2330_v29 = vmax.f32 %v2313_v62, %v2323_v49  ;;  %v2951_v62 = vld [vmem:[%s5104_s17 + $0x20] sm:$0xff]  ;;  %v2950_v49 = vld [vmem:[%s5104_s17 + $0x18] sm:$0xff] }
 0x577   :  { %v2345_v34 = vmax.f32 %v2330_v29, %v2338_v19 }
 0x5a6   :  { %v2082_v6 = vpop.f32.mrf.mxu2 }
 0x5a7   :  { %v2083_v63 = vadd.f32 %v4920_v23, %v2082_v6 }
 0x5a9   :  { %v2117_v18 = vmul.f32 %v4925_v43, %v2083_v63  ;;  %vm2099_vm4 = vcmp.ge.f32.partialorder %v2083_v63, 0.0 }
 0x5ab   :  { %v2131_v9 = vsel %vm2099_vm4, %v2083_v63, %v2117_v18 }
 0x5ae   :  { %v2084_v55 = vpop.f32.mrf.mxu2 }
 0x5af   :  { %v2085_v50 = vadd.f32 %v4920_v23, %v2084_v55  ;;  %v2944_v23 = vld [vmem:[%s5102_s15 + $0x28] sm:$0xff] }
 0x5b0   :  { %2535 = vmatpush.bf16.msra.mxu3 %v2944_v23 }
 0x5b1   :  { %v2118_v31 = vmul.f32 %v4925_v43, %v2085_v50  ;;  %vm2100_vm5 = vcmp.ge.f32.partialorder %v2085_v50, 0.0  ;;  %v2943_v43 = vld [vmem:[%s5102_s15 + $0x20] sm:$0xff]  ;;  %s2809_s15 = sld [smem:[#allocation5 + $0x2]] }
 0x5b3   :  { %v2132_v15 = vsel %vm2100_vm5, %v2085_v50, %v2118_v31 }
 0x5b4   :  { %v2139_v3 = vpack.c.bf16 %v2132_v15, %v2131_v9  ;;  %2536 = vmatpush.bf16.msra.mxu3 %v2943_v43 }
 0x5b6   :  { %2246 = vmatmul.bf16.gmra.mxu3 %v2139_v3 }
 0x5b7   :  { %v2561_v31 = vstv %s2809_s15 }
 0x5b8   :  { %2537 = vmatpush.bf16.msra.mxu3 %v2942_v30 }
 0x5bc   :  { %2538 = vmatpush.bf16.msra.mxu3 %v2941_v4 }
 0x5c0   :  { %2539 = vmatpush.bf16.msra.mxu3 %v2940_v17 }
 0x5c4   :  { %2540 = vmatpush.bf16.msra.mxu3 %v2939_v35 }
 0x5d1   :  { %v2242_v51 = vpop.f32.mrf.mxu3 }
 0x5d2   :  { %v2243_v59 = vadd.f32 %v4956_v48, %v2242_v51 }
 0x5d4   :  { %vm2262_vm6 = vcmp.ge.f32.partialorder %v2243_v59, 0.0  ;;  %v2277_v22 = vmul.f32 %v4961_v53, %v2243_v59 }
 0x5d6   :  { %v2291_v28 = vsel %vm2262_vm6, %v2243_v59, %v2277_v22 }
 0x5d7   :  { %2305 = vst [vmem:[#allocation3 + $0x50] sm:$0xff] %v2291_v28 }
 0x5d9   :  { %v2244_v60 = vpop.f32.mrf.mxu3 }
 0x5da   :  { %v2245_v13 = vadd.f32 %v4956_v48, %v2244_v60 }
 0x5dc   :  { %vm2263_vm0 = vcmp.ge.f32.partialorder %v2245_v13, 0.0  ;;  %v2278_v27 = vmul.f32 %v4961_v53, %v2245_v13 }
 0x5de   :  { %v2292_v5 = vsel %vm2263_vm0, %v2245_v13, %v2278_v27  ;;  %v2954_v13 = vld [vmem:[%s5104_s17 + $0x38] sm:$0xff]  ;;  %v2953_v27 = vld [vmem:[%s5104_s17 + $0x30] sm:$0xff] }
 0x5df   :  { %2306 = vst [vmem:[#allocation3 + $0x58] sm:$0xff] %v2292_v5  ;;  %2661 = vmatpush.bf16.msrb.mxu2 %v2954_v13  ;;  %v2952_v5 = vld [vmem:[%s5104_s17 + $0x28] sm:$0xff] }
 0x5e3   :  { %2662 = vmatpush.bf16.msrb.mxu2 %v2953_v27 }
 0x5e6   :  { %v2315_v38 = vld [vmem:[#allocation3 + $0x48] ss:$3 sm:$0xff]  ;;  %v2325_v57 = vld [vmem:[#allocation3 + $0x49] ss:$3 sm:$0xff]  ;;  %v2429_v40 = vpop.f32.mrf.mxu2  ;;  %v2340_v1 = vld [vmem:[#allocation3 + $0x4a] ss:$3 sm:$0xff] }
 0x5e7   :  { %v2331_v20 = vmax.f32 %v2315_v38, %v2325_v57  ;;  %v2430_v25 = vadd.f32 %v5040_v26, %v2429_v40  ;;  %2663 = vmatpush.bf16.msrb.mxu2 %v2952_v5 }
 0x5e9   :  { %v2346_v16 = vmax.f32 %v2331_v20, %v2340_v1  ;;  %v2452_v8 = vmul.f32 %v2984_v41, %v2430_v25  ;;  %vm2443_vm7 = vcmp.ge.f32.partialorder %v2430_v25, 0.0 }
 0x5eb   :  { %v2349_v37 = vpack.c.bf16 %v2346_v16, %v2345_v34  ;;  %v2457_v14 = vsel %vm2443_vm7, %v2430_v25, %v2452_v8  ;;  %2664 = vmatpush.bf16.msrb.mxu2 %v2951_v62  ;;  %v2949_v34 = vld [vmem:[%s5104_s17 + $0x10] sm:$0xff]  ;;  %v2948_v16 = vld [vmem:[%s5104_s17 + $0x8] sm:$0xff] }
 0x5ed   :  { %2433 = vmatmul.bf16.gmra.mxu2 %v2349_v37  ;;  %v2947_v37 = vld [vmem:[%s5104_s17] sm:$0xff] }
 0x5ee   :  { %v2431_v12 = vpop.f32.mrf.mxu2 }
 0x5ef   :  { %v2432_v44 = vadd.f32 %v5040_v26, %v2431_v12  ;;  %2665 = vmatpush.bf16.msrb.mxu2 %v2950_v49 }
 0x5f1   :  { %vm2444_vm8 = vcmp.ge.f32.partialorder %v2432_v44, 0.0  ;;  %v2453_v2 = vmul.f32 %v2984_v41, %v2432_v44 }
 0x5f3   :  { %v2458_v61 = vsel %vm2444_vm8, %v2432_v44, %v2453_v2  ;;  %2666 = vmatpush.bf16.msrb.mxu2 %v2949_v34 }
 0x5f4   :  { %v2462_v21 = vpack.c.bf16 %v2458_v61, %v2457_v14 }
 0x5f6   :  { %2541 = vmatmul.bf16.vlgmr.msra.gmra.mxu3 %v2462_v21 }
 0x5f7   :  { %2667 = vmatpush.bf16.msrb.mxu2 %v2948_v16 }
 0x5fb   :  { %2668 = vmatpush.bf16.msrb.mxu2 %v2947_v37 }
 0x639   :  { %v2247_v24 = vpop.f32.mrf.mxu3 }
 0x63a   :  { %v2248_v39 = vadd.f32 %v4956_v48, %v2247_v24 }
 0x63c   :  { %vm2264_vm9 = vcmp.ge.f32.partialorder %v2248_v39, 0.0  ;;  %v2279_v0 = vmul.f32 %v4961_v53, %v2248_v39 }
 0x63e   :  { %v2293_v52 = vsel %vm2264_vm9, %v2248_v39, %v2279_v0 }
 0x63f   :  { %2307 = vst [vmem:[#allocation3 + $0x60] sm:$0xff] %v2293_v52 }
 0x641   :  { %v2249_v7 = vpop.f32.mrf.mxu3 }
 0x642   :  { %v2250_v11 = vadd.f32 %v4956_v48, %v2249_v7  ;;  %v2985_v48 = vld [vmem:[%s5103_s16] ss:$0 sm:$0xff] }
 0x644   :  { %vm2265_vm10 = vcmp.ge.f32.partialorder %v2250_v11, 0.0  ;;  %v2280_v46 = vmul.f32 %v4961_v53, %v2250_v11 }
 0x646   :  { %v2294_v54 = vsel %vm2265_vm10, %v2250_v11, %v2280_v46 }
 0x647   :  { %2308 = vst [vmem:[#allocation3 + $0x68] sm:$0xf] %v2294_v54  ;;  %v2986_v54 = vld [vmem:[%s5105_s18] ss:$0 sm:$0xff] }
 0x64e   :  { %v2317_v42 = vld [vmem:[#allocation3 + $0x60] ss:$3 sm:$0xf]  ;;  %v2327_v36 = vld [vmem:[#allocation3 + $0x61] ss:$3 sm:$0xf] }
 0x64f   :  { %v2332_v56 = vmax.f32 %v2317_v42, %v2327_v36  ;;  %v2342_v32 = vld [vmem:[#allocation3 + $0x62] ss:$3 sm:$0xf] }
 0x651   :  { %v2347_v45 = vmax.f32 %v2332_v56, %v2342_v32 }
 0x653   :  { %v2350_v58 = vpack.c.bf16 %v2347_v45, %v2347_v45 }
 0x655   :  { %2438 = vmatmul.bf16.gmra.mxu2 %v2350_v58 }
 0x670   :  { %v2434_v33 = vpop.f32.mrf.mxu2 }
 0x671   :  { %v2435_v6 = vadd.f32 %v5040_v26, %v2434_v33 }
 0x673   :  { %v2454_v55 = vmul.f32 %v2984_v41, %v2435_v6  ;;  %vm2445_vm11 = vcmp.ge.f32.partialorder %v2435_v6, 0.0 }
 0x675   :  { %v2459_v15 = vsel %vm2445_vm11, %v2435_v6, %v2454_v55 }
 0x678   :  { %v2436_v63 = vpop.f32.mrf.mxu2 }
 0x679   :  { %v2437_v53 = vadd.f32 %v5040_v26, %v2436_v63  ;;  %v2542_v50 = vpop.f32.mrf.mxu3 }
 0x67a   :  { %v2543_v9 = vadd.f32 %v2985_v48, %v2542_v50 }
 0x67b   :  { %vm2446_vm12 = vcmp.ge.f32.partialorder %v2437_v53, 0.0  ;;  %v2455_v18 = vmul.f32 %v2984_v41, %v2437_v53 }
 0x67c   :  { %vm2556_vm13 = vcmp.ge.f32.partialorder %v2543_v9, 0.0  ;;  %v2562_v10 = vmul.f32 %v2561_v31, %v2543_v9 }
 0x67d   :  { %v2460_v3 = vsel %vm2446_vm12, %v2437_v53, %v2455_v18 }
 0x67e   :  { %v2463_v47 = vpack.c.bf16 %v2460_v3, %v2459_v15  ;;  %v2567_v23 = vsel %vm2556_vm13, %v2543_v9, %v2562_v10 }
 0x67f   :  { %2572 = vst [vmem:[#allocation4] sm:$0xff] %v2567_v23 }
 0x680   :  { %2546 = vmatmul.bf16.gmra.mxu3 %v2463_v47 }
 0x681   :  { %v2544_v43 = vpop.f32.mrf.mxu3 }
 0x682   :  { %v2545_v30 = vadd.f32 %v2985_v48, %v2544_v43 }
 0x684   :  { %vm2557_vm14 = vcmp.ge.f32.partialorder %v2545_v30, 0.0  ;;  %v2563_v4 = vmul.f32 %v2561_v31, %v2545_v30 }
 0x686   :  { %v2568_v51 = vsel %vm2557_vm14, %v2545_v30, %v2563_v4 }
 0x687   :  { %2573 = vst [vmem:[#allocation4 + $0x8] sm:$0xff] %v2568_v51 }
 0x6d8   :  { %v2439_v59 = vpop.f32.mrf.mxu2 }
 0x6d9   :  { %v2440_v22 = vadd.f32 %v5040_v26, %v2439_v59 }
 0x6db   :  { %vm2447_vm15 = vcmp.ge.f32.partialorder %v2440_v22, 0.0  ;;  %v2456_v28 = vmul.f32 %v2984_v41, %v2440_v22 }
 0x6dd   :  { %v2461_v17 = vsel %vm2447_vm15, %v2440_v22, %v2456_v28 }
 0x6de   :  { %v2464_v35 = vpack.c.bf16 %v2461_v17, %v2461_v17 }
 0x6e0   :  { %v2441_v60 = vpop.f32.mrf.mxu2  ;;  %2551 = vmatmul.bf16.gmra.mxu3 %v2464_v35 }
 0x703   :  { %v2547_v29 = vpop.f32.mrf.mxu3 }
 0x704   :  { %v2548_v38 = vadd.f32 %v2985_v48, %v2547_v29 }
 0x706   :  { %vm2558_vm1 = vcmp.ge.f32.partialorder %v2548_v38, 0.0  ;;  %v2564_v57 = vmul.f32 %v2561_v31, %v2548_v38 }
 0x708   :  { %v2569_v20 = vsel %vm2558_vm1, %v2548_v38, %v2564_v57 }
 0x709   :  { %2574 = vst [vmem:[#allocation4 + $0x10] sm:$0xff] %v2569_v20 }
 0x70b   :  { %v2549_v40 = vpop.f32.mrf.mxu3 }
 0x70c   :  { %v2550_v19 = vadd.f32 %v2985_v48, %v2549_v40 }
 0x70e   :  { %vm2559_vm2 = vcmp.ge.f32.partialorder %v2550_v19, 0.0  ;;  %v2565_v1 = vmul.f32 %v2561_v31, %v2550_v19 }
 0x710   :  { %v2570_v26 = vsel %vm2559_vm2, %v2550_v19, %v2565_v1  ;;  %v2577_v2 = vld [vmem:[#allocation4] ss:$3 sm:$0xff]  ;;  %v2581_v14 = vld [vmem:[#allocation4 + $0x1] ss:$3 sm:$0xff]  ;;  %v2587_v0 = vld [vmem:[#allocation4 + $0x2] ss:$3 sm:$0xff] }
 0x711   :  { %2575 = vst [vmem:[#allocation4 + $0x18] sm:$0xff] %v2570_v26  ;;  %v2584_v61 = vmax.f32 %v2577_v2, %v2581_v14 }
 0x713   :  { %v2590_v7 = vmax.f32 %v2584_v61, %v2587_v0 }
 0x763   :  { %v2552_v25 = vpop.f32.mrf.mxu3 }
 0x764   :  { %v2553_v41 = vadd.f32 %v2985_v48, %v2552_v25 }
 0x766   :  { %vm2560_vm3 = vcmp.ge.f32.partialorder %v2553_v41, 0.0  ;;  %v2566_v12 = vmul.f32 %v2561_v31, %v2553_v41 }
 0x768   :  { %v2571_v8 = vsel %vm2560_vm3, %v2553_v41, %v2566_v12 }
 0x769   :  { %2576 = vst [vmem:[#allocation4 + $0x20] sm:$0xf] %v2571_v8 }
 0x76b   :  { %v2554_v44 = vpop.f32.mrf.mxu3 }
 0x770   :  { %v2579_v21 = vld [vmem:[#allocation4 + $0x18] ss:$3 sm:$0xf]  ;;  %v2583_v24 = vld [vmem:[#allocation4 + $0x19] ss:$3 sm:$0xf] }
 0x771   :  { %v2585_v39 = vmax.f32 %v2579_v21, %v2583_v24  ;;  %v2589_v52 = vld [vmem:[#allocation4 + $0x1a] ss:$3 sm:$0xf] }
 0x773   :  { %v2591_v11 = vmax.f32 %v2585_v39, %v2589_v52 }
 0x775   :  { %v2592_v46 = vpack.c.bf16 %v2591_v11, %v2590_v7 }
 0x777   :  { %2669 = vmatmul.bf16.vlgmr.msrb.gmra.mxu2 %v2592_v46 }
 0x7fa   :  { %v2670_v42 = vpop.f32.mrf.mxu2 }
 0x7fb   :  { %v2671_v36 = vadd.f32 %v2986_v54, %v2670_v42 }
 0x7fd   :  { %2675 = vst [vmem:[%s5172_s9] sm:$0xff] %v2671_v36 }
 0x802   :  { %v2672_v56 = vpop.f32.mrf.mxu2 }
 0x803   :  { %v2673_v32 = vadd.f32 %v2986_v54, %v2672_v56 }
 0x805   :  { %2676 = vst [vmem:[%s5172_s9 + $0x8] sm:$0xf] %v2673_v32 }
 0x806   :  { %2681 = vsyncpa [#allocation6], 1 }
 0x807   :  { %2682 = vsyncpa [#allocation10], 1 }
 0x808   :  { %2683 = vsyncpa [#allocation13], 1 }
 0x809   :  { %2684 = vsyncpa [#allocation16], 1 }
 0x80a   :  { %2685 = vsyncpa [#allocation19], 1 }
 0x80b   :  { %2686 = vsyncpa [#allocation7], 1 }

</bundles_post_ra>
